<compile_context>
chip_gen: v5e
topology: v5e:2x2
jax: 0.10.0
libtpu: 0.0.40
codegen_flags: <defaults>
</compile_context>

<pallas_src>
import functools

import jax
import jax.numpy as jnp
import numpy as np
from jax import lax
from jax.experimental import pallas as pl
from jax.experimental.pallas import tpu as pltpu

N_BONES = 55
HIDDEN = 64
LANES = 128
# Points per grid step.  Must be a multiple of 1024 so the dense per-point
# layout (TILE//128, 128) keeps a sublane dim that is a multiple of 8.
# Sweep 1024/2048 per generation; keep n_pts // TILE >= 2 (ideally even) on
# v7x so both TensorCores receive blocks via the "parallel" grid axis.
TILE = 1024


def _skinning_kernel(pts_ref, ptsd_ref, w1_ref, b1_ref, w2_ref, b2_ref,
                     w3_ref, b3_ref, tfs_ref, out_ref):
    """Fused skinning kernel.

    pts_ref : (7, T)            lane-major per-point inputs (rows 0-2 xyz, 3-6 quat)
                                -> feeds the channel-major MLP matmuls (MXU).
    ptsd_ref: (7, T//128, 128)  same bytes, dense per-point layout
                                -> feeds the elementwise geometry at full density.
    w*_ref  : transposed MLP params (out_features, in_features); biases (out, 1).
    tfs_ref : (12, 55)          first 3 rows of every bone 4x4 (constant last row
                                [0,0,0,1] is reconstituted in the wrapper).
    out_ref : (28, T//128, 128) rows 0-11 T_fwd[:3,:], 12-14 x_bar, 15-23 R_bar,
                                24-27 quat; every store is a dense unmasked tile.
    """
    p = ptsd_ref.shape[1]                               # TILE // 128

    # ---- LBS MLP, channel-major: h = W x + b.  AABB sym-normalisation is
    # folded into w1/b1 in the wrapper, so the first matmul takes raw xyz.
    xyz_lane = pts_ref[0:3, :]                          # (3, T)
    h = jnp.dot(w1_ref[...], xyz_lane, preferred_element_type=jnp.float32) + b1_ref[...]
    h = jnp.maximum(h, 0.0)
    h = jnp.dot(w2_ref[...], h, preferred_element_type=jnp.float32) + b2_ref[...]
    h = jnp.maximum(h, 0.0)
    logits = (jnp.dot(w3_ref[...], h, preferred_element_type=jnp.float32)
              + b3_ref[...])                            # (55, T)

    # ---- softmax over bones (sublane axis) ----------------------------------
    m = jnp.max(logits, axis=0, keepdims=True)          # (1, T)
    e = jnp.exp(logits - m)                             # (55, T)
    s = jnp.sum(e, axis=0, keepdims=True)               # (1, T)
    # EUP approximate reciprocal + one Newton step: keeps the divide off the
    # VALU while staying ~f32-accurate.
    inv = pl.reciprocal(s, approx=True)
    inv = inv * (2.0 - s * inv)
    w = e * inv                                         # (55, T)

    # ---- T_fwd rows 0-2 (row 3 is constant):  (12, 55) @ (55, T) ------------
    tf_lane = jnp.dot(tfs_ref[...], w, preferred_element_type=jnp.float32)   # (12, T)

    # Single relayout: densify the 12 per-point T_fwd scalars to (p, 128) tiles
    # so the entire elementwise geometry below runs at full vreg density.
    tf = tf_lane.reshape(12, p, LANES)                  # (12, p, 128)
    out_ref[0:12, :, :] = tf                            # dense, unmasked stores

    F00 = tf[0];  F01 = tf[1];  F02 = tf[2];  F03 = tf[3]
    F10 = tf[4];  F11 = tf[5];  F12 = tf[6];  F13 = tf[7]
    F20 = tf[8];  F21 = tf[9];  F22 = tf[10]; F23 = tf[11]

    # ---- x_bar = (T_fwd @ [xyz, 1])[:3]  (uses the UN-normalised xyz) --------
    x0 = ptsd_ref[0]; x1 = ptsd_ref[1]; x2 = ptsd_ref[2]            # (p, 128)
    xb0 = F00 * x0 + F01 * x1 + F02 * x2 + F03
    xb1 = F10 * x0 + F11 * x1 + F12 * x2 + F13
    xb2 = F20 * x0 + F21 * x1 + F22 * x2 + F23

    # ---- build_rotation(_rotation): quat (w,x,y,z) -> 3x3, dense tiles -------
    qw_in = ptsd_ref[3]; qx_in = ptsd_ref[4]; qy_in = ptsd_ref[5]; qz_in = ptsd_ref[6]
    n2 = qw_in * qw_in + qx_in * qx_in + qy_in * qy_in + qz_in * qz_in
    qn = lax.rsqrt(n2)                                  # EUP rsqrt
    r = qw_in * qn; x = qx_in * qn; y = qy_in * qn; z = qz_in * qn
    R00 = 1.0 - 2.0 * (y * y + z * z); R01 = 2.0 * (x * y - r * z); R02 = 2.0 * (x * z + r * y)
    R10 = 2.0 * (x * y + r * z); R11 = 1.0 - 2.0 * (x * x + z * z); R12 = 2.0 * (y * z - r * x)
    R20 = 2.0 * (x * z - r * y); R21 = 2.0 * (y * z + r * x); R22 = 1.0 - 2.0 * (x * x + y * y)

    # ---- rotation_bar = T_fwd[:, :3, :3] @ R_hat -----------------------------
    B00 = F00 * R00 + F01 * R10 + F02 * R20
    B01 = F00 * R01 + F01 * R11 + F02 * R21
    B02 = F00 * R02 + F01 * R12 + F02 * R22
    B10 = F10 * R00 + F11 * R10 + F12 * R20
    B11 = F10 * R01 + F11 * R11 + F12 * R21
    B12 = F10 * R02 + F11 * R12 + F12 * R22
    B20 = F20 * R00 + F21 * R10 + F22 * R20
    B21 = F20 * R01 + F21 * R11 + F22 * R21
    B22 = F20 * R02 + F21 * R12 + F22 * R22

    # ---- rotation_matrix_to_quaternion (pytorch3d-style, returns (w,x,y,z)) --
    def sqrtp(v):
        return jnp.sqrt(jnp.maximum(v, 0.0))

    qa0 = sqrtp(1.0 + B00 + B11 + B22)
    qa1 = sqrtp(1.0 + B00 - B11 - B22)
    qa2 = sqrtp(1.0 - B00 + B11 - B22)
    qa3 = sqrtp(1.0 - B00 - B11 + B22)

    def half_recip(q):
        # 0.5 / max(q, 0.1) on the EUP (approx reciprocal + one Newton step).
        d = jnp.maximum(q, 0.1)
        rr = pl.reciprocal(d, approx=True)
        rr = rr * (2.0 - d * rr)
        return 0.5 * rr

    i0 = half_recip(qa0); i1 = half_recip(qa1); i2 = half_recip(qa2); i3 = half_recip(qa3)

    # Diagonal candidates: sum_k qa_k^2 >= 4, so the selected branch always has
    # qa_k >= 1 > 0.1 and qa_k^2 * (0.5/qa_k) == 0.5*qa_k exactly there.
    c0w = 0.5 * qa0;        c0x = (B21 - B12) * i0; c0y = (B02 - B20) * i0; c0z = (B10 - B01) * i0
    c1w = (B21 - B12) * i1; c1x = 0.5 * qa1;        c1y = (B10 + B01) * i1; c1z = (B02 + B20) * i1
    c2w = (B02 - B20) * i2; c2x = (B10 + B01) * i2; c2y = 0.5 * qa2;        c2z = (B12 + B21) * i2
    c3w = (B10 - B01) * i3; c3x = (B20 + B02) * i3; c3y = (B21 + B12) * i3; c3z = 0.5 * qa3

    maxq = jnp.maximum(jnp.maximum(qa0, qa1), jnp.maximum(qa2, qa3))
    s0 = qa0 >= maxq; s1 = qa1 >= maxq; s2 = qa2 >= maxq

    def sel(a, b, c, d):
        return jnp.where(s0, a, jnp.where(s1, b, jnp.where(s2, c, d)))

    qw = sel(c0w, c1w, c2w, c3w)
    qx = sel(c0x, c1x, c2x, c3x)
    qy = sel(c0y, c1y, c2y, c3y)
    qz = sel(c0z, c1z, c2z, c3z)

    # ---- remaining 16 output rows: each is one dense (p, 128) unmasked store -
    geo_rows = (xb0, xb1, xb2,
                B00, B01, B02, B10, B11, B12, B20, B21, B22,
                qw, qx, qy, qz)
    for k, row in enumerate(geo_rows):
        out_ref[12 + k, :, :] = row


@functools.partial(jax.jit, static_argnames=("tile",))
def skinning_field_forward(xyz, rotation, tfs, cmin, cmax,
                           w1, b1, w2, b2, w3, b3, *, tile=TILE):
    """Fused SkinningField forward.

    Returns (T_fwd (N,4,4), x_bar (N,3), rotation_bar (N,3,3), quat (N,4)).
    """
    assert tile % 1024 == 0, "tile must be a multiple of 1024 (dense (8k,128) layout)"
    n_pts = xyz.shape[0]
    n_pad = ((n_pts + tile - 1) // tile) * tile
    pad = n_pad - n_pts

    # Fold aabb.normalize(xyz, sym=True) into the first MLP layer (exact):
    #   xyz_n = xyz * scale + shift,   scale = 2/(max-min), shift = -2*min/(max-min) - 1
    #   xyz_n @ w1 + b1  ==  xyz @ (scale[:,None] * w1) + (b1 + shift @ w1)
    scale = 2.0 / (cmax - cmin)                       # (1, 3)
    shift = -2.0 * cmin / (cmax - cmin) - 1.0         # (1, 3)
    w1f = scale.reshape(3, 1) * w1                    # (3, H)
    b1f = b1.reshape(1, -1) + shift @ w1              # (1, H)

    # Channel-major (transposed) parameters for the kernel.
    w1t = w1f.T                                       # (H, 3)
    b1t = b1f.reshape(-1, 1)                          # (H, 1)
    w2t = w2.T                                        # (H, H)
    b2t = b2.reshape(-1, 1)                           # (H, 1)
    w3t = w3.T                                        # (55, H)
    b3t = b3.reshape(-1, 1)                           # (55, 1)
    # T_fwd's last row is exactly [0,0,0,1] (affine bone transforms, softmax
    # weights sum to 1), so only the first 3 rows (12 scalars) are computed in
    # the kernel; the constant row is reconstituted below.
    tfst = tfs.reshape(N_BONES, 16)[:, :12].T         # (12, 55)

    # Single fused, channel-major per-point input: rows 0-2 xyz, rows 3-6 quat.
    # Pad the point axis to a tile multiple; padded quats are set to identity
    # so the kernel never sees a zero-norm quaternion (outputs are trimmed).
    xyz_p = jnp.pad(xyz.astype(jnp.float32), ((0, pad), (0, 0)))
    rot_fill = jnp.tile(jnp.array([[1.0, 0.0, 0.0, 0.0]], jnp.float32), (pad, 1))
    rot_p = jnp.concatenate([rotation.astype(jnp.float32), rot_fill], axis=0)
    pts = jnp.concatenate([xyz_p, rot_p], axis=1).T   # (7, n_pad) lane-major
    pts_d = pts.reshape(7, n_pad // LANES, LANES)     # same bytes, dense view
    # TODO(synk): callers that can supply xyz/rotation pre-concatenated
    #             channel-major would remove the input transpose HBM pass.

    full = lambda a: pl.BlockSpec(a.shape, lambda i: (0,) * a.ndim)

    flops_pp = 2 * (3 * HIDDEN + HIDDEN * HIDDEN + HIDDEN * N_BONES + N_BONES * 12) + 260
    cost = pl.CostEstimate(
        flops=int(n_pad) * flops_pp,
        transcendentals=int(n_pad) * (N_BONES + 12),
        bytes_accessed=int(n_pad) * (7 + 7 + 28) * 4)

    out = pl.pallas_call(
        _skinning_kernel,
        grid=(n_pad // tile,),
        in_specs=[
            pl.BlockSpec((7, tile), lambda i: (0, i)),                    # lane-major pts
            pl.BlockSpec((7, tile // LANES, LANES), lambda i: (0, i, 0)), # dense pts
            full(w1t), full(b1t), full(w2t), full(b2t), full(w3t), full(b3t),
            full(tfst),
        ],
        out_specs=pl.BlockSpec((28, tile // LANES, LANES), lambda i: (0, i, 0)),
        out_shape=jax.ShapeDtypeStruct((28, n_pad // LANES, LANES), jnp.float32),
        compiler_params=pltpu.CompilerParams(
            dimension_semantics=("parallel",)),
        cost_estimate=cost,
    )(pts, pts_d, w1t, b1t, w2t, b2t, w3t, b3t, tfst)

    # (28, P, 128) -> (28, n_pad) is a free trailing-dim merge; the transpose
    # back to point-major exists only because the module's public API returns
    # (N, ...) tensors.
    # TODO(synk): expose the channel-major slab to consumers that accept it and
    #             drop this extra HBM pass.
    out = out.reshape(28, n_pad)[:, :n_pts].T         # (n_pts, 28)
    t12 = out[:, 0:12].reshape(n_pts, 3, 4)
    last_row = jnp.broadcast_to(
        jnp.array([0.0, 0.0, 0.0, 1.0], jnp.float32), (n_pts, 1, 4))
    T_fwd = jnp.concatenate([t12, last_row], axis=1)  # (n_pts, 4, 4)
    x_bar = out[:, 12:15]
    rot_bar = out[:, 15:24].reshape(n_pts, 3, 3)
    quat = out[:, 24:28]
    return T_fwd, x_bar, rot_bar, quat


# ---------------------------- pure-JAX reference ----------------------------
def _reference(xyz, rotation, tfs, cmin, cmax, w1, b1, w2, b2, w3, b3):
    xyz_n = (xyz - cmin) / (cmax - cmin) * 2.0 - 1.0
    h = jnp.maximum(xyz_n @ w1 + b1, 0.0)
    h = jnp.maximum(h @ w2 + b2, 0.0)
    logits = h @ w3 + b3
    w = jax.nn.softmax(logits, axis=-1)
    T_fwd = (w @ tfs.reshape(N_BONES, 16)).reshape(-1, 4, 4)

    homo = jnp.concatenate([xyz, jnp.ones((xyz.shape[0], 1), jnp.float32)], -1)
    x_bar = jnp.einsum('nij,nj->ni', T_fwd, homo)[:, :3]

    q = rotation / jnp.linalg.norm(rotation, axis=-1, keepdims=True)
    r, x, y, z = q[:, 0], q[:, 1], q[:, 2], q[:, 3]
    R = jnp.stack([
        1 - 2 * (y * y + z * z), 2 * (x * y - r * z), 2 * (x * z + r * y),
        2 * (x * y + r * z), 1 - 2 * (x * x + z * z), 2 * (y * z - r * x),
        2 * (x * z - r * y), 2 * (y * z + r * x), 1 - 2 * (x * x + y * y)],
        axis=-1).reshape(-1, 3, 3)
    R_bar = jnp.einsum('nij,njk->nik', T_fwd[:, :3, :3], R)

    B = R_bar.reshape(-1, 9)
    B00, B01, B02, B10, B11, B12, B20, B21, B22 = [B[:, i:i + 1] for i in range(9)]
    sqrtp = lambda v: jnp.sqrt(jnp.maximum(v, 0.0))
    qa = [sqrtp(1 + B00 + B11 + B22), sqrtp(1 + B00 - B11 - B22),
          sqrtp(1 - B00 + B11 - B22), sqrtp(1 - B00 - B11 + B22)]
    cands = [
        jnp.concatenate([qa[0] ** 2, B21 - B12, B02 - B20, B10 - B01], -1),
        jnp.concatenate([B21 - B12, qa[1] ** 2, B10 + B01, B02 + B20], -1),
        jnp.concatenate([B02 - B20, B10 + B01, qa[2] ** 2, B12 + B21], -1),
        jnp.concatenate([B10 - B01, B20 + B02, B21 + B12, qa[3] ** 2], -1)]
    cands = [c / (2.0 * jnp.maximum(a, 0.1)) for c, a in zip(cands, qa)]
    maxq = jnp.maximum(jnp.maximum(qa[0], qa[1]), jnp.maximum(qa[2], qa[3]))
    quat = jnp.where(qa[0] >= maxq, cands[0],
           jnp.where(qa[1] >= maxq, cands[1],
           jnp.where(qa[2] >= maxq, cands[2], cands[3])))
    return T_fwd, x_bar, R_bar, quat


if __name__ == "__main__":
    key = jax.random.PRNGKey(0)
    k_xyz, k_rot, k_tfs, k1, k2, k3 = jax.random.split(key, 6)

    n_pts = 2000      # not a multiple of the tile -> exercises padding; 2 grid steps
    tile = 1024

    xyz = jax.random.normal(k_xyz, (n_pts, 3), jnp.float32)
    rotation = jax.random.normal(k_rot, (n_pts, 4), jnp.float32) + 0.1  # avoid zero quats

    # aabb (coord_min / coord_max) with a small margin around the points
    cmin = (jnp.min(xyz, axis=0, keepdims=True) - 0.1).astype(jnp.float32)   # (1, 3)
    cmax = (jnp.max(xyz, axis=0, keepdims=True) + 0.1).astype(jnp.float32)   # (1, 3)

    # bone transforms: identity + small perturbation, last row fixed to [0,0,0,1]
    tfs = jnp.eye(4, dtype=jnp.float32)[None] + 0.1 * jax.random.normal(
        k_tfs, (N_BONES, 4, 4), jnp.float32)
    tfs = tfs.at[:, 3, :].set(jnp.array([0.0, 0.0, 0.0, 1.0], jnp.float32))

    # deterministic synthetic MLP parameters (3 -> H -> H -> 55)
    w1 = jax.random.normal(k1, (3, HIDDEN), jnp.float32) * np.sqrt(2.0 / 3.0)
    b1 = jnp.zeros((1, HIDDEN), jnp.float32)
    w2 = jax.random.normal(k2, (HIDDEN, HIDDEN), jnp.float32) * np.sqrt(2.0 / HIDDEN)
    b2 = jnp.zeros((1, HIDDEN), jnp.float32)
    w3 = jax.random.normal(k3, (HIDDEN, N_BONES), jnp.float32) * np.sqrt(2.0 / HIDDEN)
    b3 = jnp.zeros((1, N_BONES), jnp.float32)

    outs = skinning_field_forward(xyz, rotation, tfs, cmin, cmax,
                                  w1, b1, w2, b2, w3, b3, tile=tile)
    outs = jax.block_until_ready(outs)

    refs = _reference(xyz, rotation, tfs, cmin, cmax, w1, b1, w2, b2, w3, b3)
    for got, ref in zip(outs, refs):
        np.testing.assert_allclose(np.asarray(got), np.asarray(ref),
                                   rtol=1e-3, atol=1e-4)

    print("KERNEL_OK")
</pallas_src>

<mosaic_0001>
module attributes {stable_mosaic.version = 11 : i64} {
  func.func @_skinning_kernel(%arg0: i32, %arg1: memref<7x1024xf32, #tpu.memory_space<vmem>>, %arg2: memref<7x8x128xf32, #tpu.memory_space<vmem>>, %arg3: memref<64x3xf32, #tpu.memory_space<vmem>>, %arg4: memref<64x1xf32, #tpu.memory_space<vmem>>, %arg5: memref<64x64xf32, #tpu.memory_space<vmem>>, %arg6: memref<64x1xf32, #tpu.memory_space<vmem>>, %arg7: memref<55x64xf32, #tpu.memory_space<vmem>>, %arg8: memref<55x1xf32, #tpu.memory_space<vmem>>, %arg9: memref<12x55xf32, #tpu.memory_space<vmem>>, %arg10: memref<28x8x128xf32, #tpu.memory_space<vmem>>) attributes {dimension_semantics = [#tpu.dimension_semantics<parallel>], iteration_bounds = array<i64: 2>, scalar_prefetch = 0 : i64, scratch_operands = 0 : i64, tpu.core_type = #tpu.core_type<tc>, window_params = [{transform_indices = @transform_0, window_bounds = array<i64: 7, 1024>}, {transform_indices = @transform_1, window_bounds = array<i64: 7, 8, 128>}, {pipeline_mode = #tpu.pipeline_mode<synchronous>, transform_indices = @transform_2, window_bounds = array<i64: 64, 3>}, {pipeline_mode = #tpu.pipeline_mode<synchronous>, transform_indices = @transform_3, window_bounds = array<i64: 64, 1>}, {pipeline_mode = #tpu.pipeline_mode<synchronous>, transform_indices = @transform_4, window_bounds = array<i64: 64, 64>}, {pipeline_mode = #tpu.pipeline_mode<synchronous>, transform_indices = @transform_5, window_bounds = array<i64: 64, 1>}, {pipeline_mode = #tpu.pipeline_mode<synchronous>, transform_indices = @transform_6, window_bounds = array<i64: 55, 64>}, {pipeline_mode = #tpu.pipeline_mode<synchronous>, transform_indices = @transform_7, window_bounds = array<i64: 55, 1>}, {pipeline_mode = #tpu.pipeline_mode<synchronous>, transform_indices = @transform_8, window_bounds = array<i64: 12, 55>}, {transform_indices = @transform_9, window_bounds = array<i64: 28, 8, 128>}]} {
    %c0 = arith.constant 0 : index
    %c0_0 = arith.constant 0 : index
    %0 = vector.load %arg1[%c0, %c0_0] : memref<7x1024xf32, #tpu.memory_space<vmem>>, vector<3x1024xf32>
    %c0_1 = arith.constant 0 : index
    %c0_2 = arith.constant 0 : index
    %1 = vector.load %arg3[%c0_1, %c0_2] : memref<64x3xf32, #tpu.memory_space<vmem>>, vector<64x3xf32>
    %cst = arith.constant dense<0.000000e+00> : vector<64x1024xf32>
    %2 = tpu.matmul %1, %0, %cst {dimension_numbers = #tpu.dot_dimension_numbers<[1], [0], [0], [1], [0, 0, 1, 1], [], []>} : vector<64x3xf32>, vector<3x1024xf32>, vector<64x1024xf32> -> vector<64x1024xf32>
    %c0_3 = arith.constant 0 : index
    %c0_4 = arith.constant 0 : index
    %3 = vector.load %arg4[%c0_3, %c0_4] : memref<64x1xf32, #tpu.memory_space<vmem>>, vector<64x1xf32>
    %4 = vector.broadcast %3 : vector<64x1xf32> to vector<64x1024xf32>
    %5 = arith.addf %2, %4 : vector<64x1024xf32>
    %cst_5 = arith.constant 0.000000e+00 : f32
    %6 = vector.broadcast %cst_5 : f32 to vector<64x1024xf32>
    %7 = arith.maximumf %5, %6 : vector<64x1024xf32>
    %c0_6 = arith.constant 0 : index
    %c0_7 = arith.constant 0 : index
    %8 = vector.load %arg5[%c0_6, %c0_7] : memref<64x64xf32, #tpu.memory_space<vmem>>, vector<64x64xf32>
    %cst_8 = arith.constant dense<0.000000e+00> : vector<64x1024xf32>
    %9 = tpu.matmul %8, %7, %cst_8 {dimension_numbers = #tpu.dot_dimension_numbers<[1], [0], [0], [1], [0, 0, 1, 1], [], []>} : vector<64x64xf32>, vector<64x1024xf32>, vector<64x1024xf32> -> vector<64x1024xf32>
    %c0_9 = arith.constant 0 : index
    %c0_10 = arith.constant 0 : index
    %10 = vector.load %arg6[%c0_9, %c0_10] : memref<64x1xf32, #tpu.memory_space<vmem>>, vector<64x1xf32>
    %11 = vector.broadcast %10 : vector<64x1xf32> to vector<64x1024xf32>
    %12 = arith.addf %9, %11 : vector<64x1024xf32>
    %cst_11 = arith.constant 0.000000e+00 : f32
    %13 = vector.broadcast %cst_11 : f32 to vector<64x1024xf32>
    %14 = arith.maximumf %12, %13 : vector<64x1024xf32>
    %c0_12 = arith.constant 0 : index
    %c0_13 = arith.constant 0 : index
    %15 = vector.load %arg7[%c0_12, %c0_13] : memref<55x64xf32, #tpu.memory_space<vmem>>, vector<55x64xf32>
    %cst_14 = arith.constant dense<0.000000e+00> : vector<55x1024xf32>
    %16 = tpu.matmul %15, %14, %cst_14 {dimension_numbers = #tpu.dot_dimension_numbers<[1], [0], [0], [1], [0, 0, 1, 1], [], []>} : vector<55x64xf32>, vector<64x1024xf32>, vector<55x1024xf32> -> vector<55x1024xf32>
    %c0_15 = arith.constant 0 : index
    %c0_16 = arith.constant 0 : index
    %17 = vector.load %arg8[%c0_15, %c0_16] : memref<55x1xf32, #tpu.memory_space<vmem>>, vector<55x1xf32>
    %18 = vector.broadcast %17 : vector<55x1xf32> to vector<55x1024xf32>
    %19 = arith.addf %16, %18 : vector<55x1024xf32>
    %cst_17 = arith.constant dense<0xFF800000> : vector<1024xf32>
    %20 = vector.multi_reduction <maximumf>, %19, %cst_17 [0] : vector<55x1024xf32> to vector<1024xf32>
    %21 = vector.shape_cast %20 : vector<1024xf32> to vector<1x1024xf32>
    %22 = vector.broadcast %21 : vector<1x1024xf32> to vector<55x1024xf32>
    %23 = arith.subf %19, %22 : vector<55x1024xf32>
    %24 = math.exp %23 : vector<55x1024xf32>
    %cst_18 = arith.constant dense<0.000000e+00> : vector<1024xf32>
    %25 = vector.multi_reduction <add>, %24, %cst_18 [0] : vector<55x1024xf32> to vector<1024xf32>
    %26 = vector.shape_cast %25 : vector<1024xf32> to vector<1x1024xf32>
    %27 = tpu.reciprocal %26 {approx = true} : vector<1x1024xf32> -> vector<1x1024xf32>
    %28 = arith.mulf %26, %27 : vector<1x1024xf32>
    %cst_19 = arith.constant 2.000000e+00 : f32
    %29 = vector.broadcast %cst_19 : f32 to vector<1x1024xf32>
    %30 = arith.subf %29, %28 : vector<1x1024xf32>
    %31 = arith.mulf %27, %30 : vector<1x1024xf32>
    %32 = vector.broadcast %31 : vector<1x1024xf32> to vector<55x1024xf32>
    %33 = arith.mulf %24, %32 : vector<55x1024xf32>
    %c0_20 = arith.constant 0 : index
    %c0_21 = arith.constant 0 : index
    %34 = vector.load %arg9[%c0_20, %c0_21] : memref<12x55xf32, #tpu.memory_space<vmem>>, vector<12x55xf32>
    %cst_22 = arith.constant dense<0.000000e+00> : vector<12x1024xf32>
    %35 = tpu.matmul %34, %33, %cst_22 {dimension_numbers = #tpu.dot_dimension_numbers<[1], [0], [0], [1], [0, 0, 1, 1], [], []>} : vector<12x55xf32>, vector<55x1024xf32>, vector<12x1024xf32> -> vector<12x1024xf32>
    %36 = vector.shape_cast %35 : vector<12x1024xf32> to vector<12x8x128xf32>
    %c0_23 = arith.constant 0 : index
    %c0_24 = arith.constant 0 : index
    %c0_25 = arith.constant 0 : index
    %37 = vector.load %arg10[%c0_23, %c0_24, %c0_25] : memref<28x8x128xf32, #tpu.memory_space<vmem>>, vector<12x8x128xf32>
    tpu.vector_store %arg10[%c0_23, %c0_24, %c0_25], %36 {strides = array<i32>} : memref<28x8x128xf32, #tpu.memory_space<vmem>>, vector<12x8x128xf32>,
    %38 = vector.extract_strided_slice %36 {offsets = [0, 0, 0], sizes = [1, 8, 128], strides = [1, 1, 1]} : vector<12x8x128xf32> to vector<1x8x128xf32>
    %39 = vector.shape_cast %38 : vector<1x8x128xf32> to vector<8x128xf32>
    %40 = vector.extract_strided_slice %36 {offsets = [1, 0, 0], sizes = [1, 8, 128], strides = [1, 1, 1]} : vector<12x8x128xf32> to vector<1x8x128xf32>
    %41 = vector.shape_cast %40 : vector<1x8x128xf32> to vector<8x128xf32>
    %42 = vector.extract_strided_slice %36 {offsets = [2, 0, 0], sizes = [1, 8, 128], strides = [1, 1, 1]} : vector<12x8x128xf32> to vector<1x8x128xf32>
    %43 = vector.shape_cast %42 : vector<1x8x128xf32> to vector<8x128xf32>
    %44 = vector.extract_strided_slice %36 {offsets = [3, 0, 0], sizes = [1, 8, 128], strides = [1, 1, 1]} : vector<12x8x128xf32> to vector<1x8x128xf32>
    %45 = vector.shape_cast %44 : vector<1x8x128xf32> to vector<8x128xf32>
    %46 = vector.extract_strided_slice %36 {offsets = [4, 0, 0], sizes = [1, 8, 128], strides = [1, 1, 1]} : vector<12x8x128xf32> to vector<1x8x128xf32>
    %47 = vector.shape_cast %46 : vector<1x8x128xf32> to vector<8x128xf32>
    %48 = vector.extract_strided_slice %36 {offsets = [5, 0, 0], sizes = [1, 8, 128], strides = [1, 1, 1]} : vector<12x8x128xf32> to vector<1x8x128xf32>
    %49 = vector.shape_cast %48 : vector<1x8x128xf32> to vector<8x128xf32>
    %50 = vector.extract_strided_slice %36 {offsets = [6, 0, 0], sizes = [1, 8, 128], strides = [1, 1, 1]} : vector<12x8x128xf32> to vector<1x8x128xf32>
    %51 = vector.shape_cast %50 : vector<1x8x128xf32> to vector<8x128xf32>
    %52 = vector.extract_strided_slice %36 {offsets = [7, 0, 0], sizes = [1, 8, 128], strides = [1, 1, 1]} : vector<12x8x128xf32> to vector<1x8x128xf32>
    %53 = vector.shape_cast %52 : vector<1x8x128xf32> to vector<8x128xf32>
    %54 = vector.extract_strided_slice %36 {offsets = [8, 0, 0], sizes = [1, 8, 128], strides = [1, 1, 1]} : vector<12x8x128xf32> to vector<1x8x128xf32>
    %55 = vector.shape_cast %54 : vector<1x8x128xf32> to vector<8x128xf32>
    %56 = vector.extract_strided_slice %36 {offsets = [9, 0, 0], sizes = [1, 8, 128], strides = [1, 1, 1]} : vector<12x8x128xf32> to vector<1x8x128xf32>
    %57 = vector.shape_cast %56 : vector<1x8x128xf32> to vector<8x128xf32>
    %58 = vector.extract_strided_slice %36 {offsets = [10, 0, 0], sizes = [1, 8, 128], strides = [1, 1, 1]} : vector<12x8x128xf32> to vector<1x8x128xf32>
    %59 = vector.shape_cast %58 : vector<1x8x128xf32> to vector<8x128xf32>
    %60 = vector.extract_strided_slice %36 {offsets = [11, 0, 0], sizes = [1, 8, 128], strides = [1, 1, 1]} : vector<12x8x128xf32> to vector<1x8x128xf32>
    %61 = vector.shape_cast %60 : vector<1x8x128xf32> to vector<8x128xf32>
    %c0_26 = arith.constant 0 : index
    %c0_27 = arith.constant 0 : index
    %c0_28 = arith.constant 0 : index
    %62 = vector.load %arg2[%c0_26, %c0_27, %c0_28] : memref<7x8x128xf32, #tpu.memory_space<vmem>>, vector<1x8x128xf32>
    %63 = vector.shape_cast %62 : vector<1x8x128xf32> to vector<8x128xf32>
    %c1 = arith.constant 1 : index
    %c0_29 = arith.constant 0 : index
    %c0_30 = arith.constant 0 : index
    %64 = vector.load %arg2[%c1, %c0_29, %c0_30] : memref<7x8x128xf32, #tpu.memory_space<vmem>>, vector<1x8x128xf32>
    %65 = vector.shape_cast %64 : vector<1x8x128xf32> to vector<8x128xf32>
    %c2 = arith.constant 2 : index
    %c0_31 = arith.constant 0 : index
    %c0_32 = arith.constant 0 : index
    %66 = vector.load %arg2[%c2, %c0_31, %c0_32] : memref<7x8x128xf32, #tpu.memory_space<vmem>>, vector<1x8x128xf32>
    %67 = vector.shape_cast %66 : vector<1x8x128xf32> to vector<8x128xf32>
    %68 = arith.mulf %39, %63 : vector<8x128xf32>
    %69 = arith.mulf %41, %65 : vector<8x128xf32>
    %70 = arith.addf %68, %69 : vector<8x128xf32>
    %71 = arith.mulf %43, %67 : vector<8x128xf32>
    %72 = arith.addf %70, %71 : vector<8x128xf32>
    %73 = arith.addf %72, %45 : vector<8x128xf32>
    %74 = arith.mulf %47, %63 : vector<8x128xf32>
    %75 = arith.mulf %49, %65 : vector<8x128xf32>
    %76 = arith.addf %74, %75 : vector<8x128xf32>
    %77 = arith.mulf %51, %67 : vector<8x128xf32>
    %78 = arith.addf %76, %77 : vector<8x128xf32>
    %79 = arith.addf %78, %53 : vector<8x128xf32>
    %80 = arith.mulf %55, %63 : vector<8x128xf32>
    %81 = arith.mulf %57, %65 : vector<8x128xf32>
    %82 = arith.addf %80, %81 : vector<8x128xf32>
    %83 = arith.mulf %59, %67 : vector<8x128xf32>
    %84 = arith.addf %82, %83 : vector<8x128xf32>
    %85 = arith.addf %84, %61 : vector<8x128xf32>
    %c3 = arith.constant 3 : index
    %c0_33 = arith.constant 0 : index
    %c0_34 = arith.constant 0 : index
    %86 = vector.load %arg2[%c3, %c0_33, %c0_34] : memref<7x8x128xf32, #tpu.memory_space<vmem>>, vector<1x8x128xf32>
    %87 = vector.shape_cast %86 : vector<1x8x128xf32> to vector<8x128xf32>
    %c4 = arith.constant 4 : index
    %c0_35 = arith.constant 0 : index
    %c0_36 = arith.constant 0 : index
    %88 = vector.load %arg2[%c4, %c0_35, %c0_36] : memref<7x8x128xf32, #tpu.memory_space<vmem>>, vector<1x8x128xf32>
    %89 = vector.shape_cast %88 : vector<1x8x128xf32> to vector<8x128xf32>
    %c5 = arith.constant 5 : index
    %c0_37 = arith.constant 0 : index
    %c0_38 = arith.constant 0 : index
    %90 = vector.load %arg2[%c5, %c0_37, %c0_38] : memref<7x8x128xf32, #tpu.memory_space<vmem>>, vector<1x8x128xf32>
    %91 = vector.shape_cast %90 : vector<1x8x128xf32> to vector<8x128xf32>
    %c6 = arith.constant 6 : index
    %c0_39 = arith.constant 0 : index
    %c0_40 = arith.constant 0 : index
    %92 = vector.load %arg2[%c6, %c0_39, %c0_40] : memref<7x8x128xf32, #tpu.memory_space<vmem>>, vector<1x8x128xf32>
    %93 = vector.shape_cast %92 : vector<1x8x128xf32> to vector<8x128xf32>
    %94 = arith.mulf %87, %87 : vector<8x128xf32>
    %95 = arith.mulf %89, %89 : vector<8x128xf32>
    %96 = arith.addf %94, %95 : vector<8x128xf32>
    %97 = arith.mulf %91, %91 : vector<8x128xf32>
    %98 = arith.addf %96, %97 : vector<8x128xf32>
    %99 = arith.mulf %93, %93 : vector<8x128xf32>
    %100 = arith.addf %98, %99 : vector<8x128xf32>
    %101 = math.rsqrt %100 : vector<8x128xf32>
    %102 = arith.mulf %87, %101 : vector<8x128xf32>
    %103 = arith.mulf %89, %101 : vector<8x128xf32>
    %104 = arith.mulf %91, %101 : vector<8x128xf32>
    %105 = arith.mulf %93, %101 : vector<8x128xf32>
    %106 = arith.mulf %104, %104 : vector<8x128xf32>
    %107 = arith.mulf %105, %105 : vector<8x128xf32>
    %108 = arith.addf %106, %107 : vector<8x128xf32>
    %cst_41 = arith.constant 2.000000e+00 : f32
    %109 = vector.broadcast %cst_41 : f32 to vector<8x128xf32>
    %110 = arith.mulf %109, %108 : vector<8x128xf32>
    %cst_42 = arith.constant 1.000000e+00 : f32
    %111 = vector.broadcast %cst_42 : f32 to vector<8x128xf32>
    %112 = arith.subf %111, %110 : vector<8x128xf32>
    %113 = arith.mulf %103, %104 : vector<8x128xf32>
    %114 = arith.mulf %102, %105 : vector<8x128xf32>
    %115 = arith.subf %113, %114 : vector<8x128xf32>
    %cst_43 = arith.constant 2.000000e+00 : f32
    %116 = vector.broadcast %cst_43 : f32 to vector<8x128xf32>
    %117 = arith.mulf %116, %115 : vector<8x128xf32>
    %118 = arith.mulf %103, %105 : vector<8x128xf32>
    %119 = arith.mulf %102, %104 : vector<8x128xf32>
    %120 = arith.addf %118, %119 : vector<8x128xf32>
    %cst_44 = arith.constant 2.000000e+00 : f32
    %121 = vector.broadcast %cst_44 : f32 to vector<8x128xf32>
    %122 = arith.mulf %121, %120 : vector<8x128xf32>
    %123 = arith.mulf %103, %104 : vector<8x128xf32>
    %124 = arith.mulf %102, %105 : vector<8x128xf32>
    %125 = arith.addf %123, %124 : vector<8x128xf32>
    %cst_45 = arith.constant 2.000000e+00 : f32
    %126 = vector.broadcast %cst_45 : f32 to vector<8x128xf32>
    %127 = arith.mulf %126, %125 : vector<8x128xf32>
    %128 = arith.mulf %103, %103 : vector<8x128xf32>
    %129 = arith.mulf %105, %105 : vector<8x128xf32>
    %130 = arith.addf %128, %129 : vector<8x128xf32>
    %cst_46 = arith.constant 2.000000e+00 : f32
    %131 = vector.broadcast %cst_46 : f32 to vector<8x128xf32>
    %132 = arith.mulf %131, %130 : vector<8x128xf32>
    %cst_47 = arith.constant 1.000000e+00 : f32
    %133 = vector.broadcast %cst_47 : f32 to vector<8x128xf32>
    %134 = arith.subf %133, %132 : vector<8x128xf32>
    %135 = arith.mulf %104, %105 : vector<8x128xf32>
    %136 = arith.mulf %102, %103 : vector<8x128xf32>
    %137 = arith.subf %135, %136 : vector<8x128xf32>
    %cst_48 = arith.constant 2.000000e+00 : f32
    %138 = vector.broadcast %cst_48 : f32 to vector<8x128xf32>
    %139 = arith.mulf %138, %137 : vector<8x128xf32>
    %140 = arith.mulf %103, %105 : vector<8x128xf32>
    %141 = arith.mulf %102, %104 : vector<8x128xf32>
    %142 = arith.subf %140, %141 : vector<8x128xf32>
    %cst_49 = arith.constant 2.000000e+00 : f32
    %143 = vector.broadcast %cst_49 : f32 to vector<8x128xf32>
    %144 = arith.mulf %143, %142 : vector<8x128xf32>
    %145 = arith.mulf %104, %105 : vector<8x128xf32>
    %146 = arith.mulf %102, %103 : vector<8x128xf32>
    %147 = arith.addf %145, %146 : vector<8x128xf32>
    %cst_50 = arith.constant 2.000000e+00 : f32
    %148 = vector.broadcast %cst_50 : f32 to vector<8x128xf32>
    %149 = arith.mulf %148, %147 : vector<8x128xf32>
    %150 = arith.mulf %103, %103 : vector<8x128xf32>
    %151 = arith.mulf %104, %104 : vector<8x128xf32>
    %152 = arith.addf %150, %151 : vector<8x128xf32>
    %cst_51 = arith.constant 2.000000e+00 : f32
    %153 = vector.broadcast %cst_51 : f32 to vector<8x128xf32>
    %154 = arith.mulf %153, %152 : vector<8x128xf32>
    %cst_52 = arith.constant 1.000000e+00 : f32
    %155 = vector.broadcast %cst_52 : f32 to vector<8x128xf32>
    %156 = arith.subf %155, %154 : vector<8x128xf32>
    %157 = arith.mulf %39, %112 : vector<8x128xf32>
    %158 = arith.mulf %41, %127 : vector<8x128xf32>
    %159 = arith.addf %157, %158 : vector<8x128xf32>
    %160 = arith.mulf %43, %144 : vector<8x128xf32>
    %161 = arith.addf %159, %160 : vector<8x128xf32>
    %162 = arith.mulf %39, %117 : vector<8x128xf32>
    %163 = arith.mulf %41, %134 : vector<8x128xf32>
    %164 = arith.addf %162, %163 : vector<8x128xf32>
    %165 = arith.mulf %43, %149 : vector<8x128xf32>
    %166 = arith.addf %164, %165 : vector<8x128xf32>
    %167 = arith.mulf %39, %122 : vector<8x128xf32>
    %168 = arith.mulf %41, %139 : vector<8x128xf32>
    %169 = arith.addf %167, %168 : vector<8x128xf32>
    %170 = arith.mulf %43, %156 : vector<8x128xf32>
    %171 = arith.addf %169, %170 : vector<8x128xf32>
    %172 = arith.mulf %47, %112 : vector<8x128xf32>
    %173 = arith.mulf %49, %127 : vector<8x128xf32>
    %174 = arith.addf %172, %173 : vector<8x128xf32>
    %175 = arith.mulf %51, %144 : vector<8x128xf32>
    %176 = arith.addf %174, %175 : vector<8x128xf32>
    %177 = arith.mulf %47, %117 : vector<8x128xf32>
    %178 = arith.mulf %49, %134 : vector<8x128xf32>
    %179 = arith.addf %177, %178 : vector<8x128xf32>
    %180 = arith.mulf %51, %149 : vector<8x128xf32>
    %181 = arith.addf %179, %180 : vector<8x128xf32>
    %182 = arith.mulf %47, %122 : vector<8x128xf32>
    %183 = arith.mulf %49, %139 : vector<8x128xf32>
    %184 = arith.addf %182, %183 : vector<8x128xf32>
    %185 = arith.mulf %51, %156 : vector<8x128xf32>
    %186 = arith.addf %184, %185 : vector<8x128xf32>
    %187 = arith.mulf %55, %112 : vector<8x128xf32>
    %188 = arith.mulf %57, %127 : vector<8x128xf32>
    %189 = arith.addf %187, %188 : vector<8x128xf32>
    %190 = arith.mulf %59, %144 : vector<8x128xf32>
    %191 = arith.addf %189, %190 : vector<8x128xf32>
    %192 = arith.mulf %55, %117 : vector<8x128xf32>
    %193 = arith.mulf %57, %134 : vector<8x128xf32>
    %194 = arith.addf %192, %193 : vector<8x128xf32>
    %195 = arith.mulf %59, %149 : vector<8x128xf32>
    %196 = arith.addf %194, %195 : vector<8x128xf32>
    %197 = arith.mulf %55, %122 : vector<8x128xf32>
    %198 = arith.mulf %57, %139 : vector<8x128xf32>
    %199 = arith.addf %197, %198 : vector<8x128xf32>
    %200 = arith.mulf %59, %156 : vector<8x128xf32>
    %201 = arith.addf %199, %200 : vector<8x128xf32>
    %cst_53 = arith.constant 1.000000e+00 : f32
    %202 = vector.broadcast %cst_53 : f32 to vector<8x128xf32>
    %203 = arith.addf %202, %161 : vector<8x128xf32>
    %204 = arith.addf %203, %181 : vector<8x128xf32>
    %205 = arith.addf %204, %201 : vector<8x128xf32>
    %cst_54 = arith.constant 0.000000e+00 : f32
    %206 = vector.broadcast %cst_54 : f32 to vector<8x128xf32>
    %207 = arith.maximumf %205, %206 : vector<8x128xf32>
    %208 = math.sqrt %207 : vector<8x128xf32>
    %cst_55 = arith.constant 1.000000e+00 : f32
    %209 = vector.broadcast %cst_55 : f32 to vector<8x128xf32>
    %210 = arith.addf %209, %161 : vector<8x128xf32>
    %211 = arith.subf %210, %181 : vector<8x128xf32>
    %212 = arith.subf %211, %201 : vector<8x128xf32>
    %cst_56 = arith.constant 0.000000e+00 : f32
    %213 = vector.broadcast %cst_56 : f32 to vector<8x128xf32>
    %214 = arith.maximumf %212, %213 : vector<8x128xf32>
    %215 = math.sqrt %214 : vector<8x128xf32>
    %cst_57 = arith.constant 1.000000e+00 : f32
    %216 = vector.broadcast %cst_57 : f32 to vector<8x128xf32>
    %217 = arith.subf %216, %161 : vector<8x128xf32>
    %218 = arith.addf %217, %181 : vector<8x128xf32>
    %219 = arith.subf %218, %201 : vector<8x128xf32>
    %cst_58 = arith.constant 0.000000e+00 : f32
    %220 = vector.broadcast %cst_58 : f32 to vector<8x128xf32>
    %221 = arith.maximumf %219, %220 : vector<8x128xf32>
    %222 = math.sqrt %221 : vector<8x128xf32>
    %cst_59 = arith.constant 1.000000e+00 : f32
    %223 = vector.broadcast %cst_59 : f32 to vector<8x128xf32>
    %224 = arith.subf %223, %161 : vector<8x128xf32>
    %225 = arith.subf %224, %181 : vector<8x128xf32>
    %226 = arith.addf %225, %201 : vector<8x128xf32>
    %cst_60 = arith.constant 0.000000e+00 : f32
    %227 = vector.broadcast %cst_60 : f32 to vector<8x128xf32>
    %228 = arith.maximumf %226, %227 : vector<8x128xf32>
    %229 = math.sqrt %228 : vector<8x128xf32>
    %cst_61 = arith.constant 1.000000e-01 : f32
    %230 = vector.broadcast %cst_61 : f32 to vector<8x128xf32>
    %231 = arith.maximumf %208, %230 : vector<8x128xf32>
    %232 = tpu.reciprocal %231 {approx = true} : vector<8x128xf32> -> vector<8x128xf32>
    %233 = arith.mulf %231, %232 : vector<8x128xf32>
    %cst_62 = arith.constant 2.000000e+00 : f32
    %234 = vector.broadcast %cst_62 : f32 to vector<8x128xf32>
    %235 = arith.subf %234, %233 : vector<8x128xf32>
    %236 = arith.mulf %232, %235 : vector<8x128xf32>
    %cst_63 = arith.constant 5.000000e-01 : f32
    %237 = vector.broadcast %cst_63 : f32 to vector<8x128xf32>
    %238 = arith.mulf %237, %236 : vector<8x128xf32>
    %cst_64 = arith.constant 1.000000e-01 : f32
    %239 = vector.broadcast %cst_64 : f32 to vector<8x128xf32>
    %240 = arith.maximumf %215, %239 : vector<8x128xf32>
    %241 = tpu.reciprocal %240 {approx = true} : vector<8x128xf32> -> vector<8x128xf32>
    %242 = arith.mulf %240, %241 : vector<8x128xf32>
    %cst_65 = arith.constant 2.000000e+00 : f32
    %243 = vector.broadcast %cst_65 : f32 to vector<8x128xf32>
    %244 = arith.subf %243, %242 : vector<8x128xf32>
    %245 = arith.mulf %241, %244 : vector<8x128xf32>
    %cst_66 = arith.constant 5.000000e-01 : f32
    %246 = vector.broadcast %cst_66 : f32 to vector<8x128xf32>
    %247 = arith.mulf %246, %245 : vector<8x128xf32>
    %cst_67 = arith.constant 1.000000e-01 : f32
    %248 = vector.broadcast %cst_67 : f32 to vector<8x128xf32>
    %249 = arith.maximumf %222, %248 : vector<8x128xf32>
    %250 = tpu.reciprocal %249 {approx = true} : vector<8x128xf32> -> vector<8x128xf32>
    %251 = arith.mulf %249, %250 : vector<8x128xf32>
    %cst_68 = arith.constant 2.000000e+00 : f32
    %252 = vector.broadcast %cst_68 : f32 to vector<8x128xf32>
    %253 = arith.subf %252, %251 : vector<8x128xf32>
    %254 = arith.mulf %250, %253 : vector<8x128xf32>
    %cst_69 = arith.constant 5.000000e-01 : f32
    %255 = vector.broadcast %cst_69 : f32 to vector<8x128xf32>
    %256 = arith.mulf %255, %254 : vector<8x128xf32>
    %cst_70 = arith.constant 1.000000e-01 : f32
    %257 = vector.broadcast %cst_70 : f32 to vector<8x128xf32>
    %258 = arith.maximumf %229, %257 : vector<8x128xf32>
    %259 = tpu.reciprocal %258 {approx = true} : vector<8x128xf32> -> vector<8x128xf32>
    %260 = arith.mulf %258, %259 : vector<8x128xf32>
    %cst_71 = arith.constant 2.000000e+00 : f32
    %261 = vector.broadcast %cst_71 : f32 to vector<8x128xf32>
    %262 = arith.subf %261, %260 : vector<8x128xf32>
    %263 = arith.mulf %259, %262 : vector<8x128xf32>
    %cst_72 = arith.constant 5.000000e-01 : f32
    %264 = vector.broadcast %cst_72 : f32 to vector<8x128xf32>
    %265 = arith.mulf %264, %263 : vector<8x128xf32>
    %cst_73 = arith.constant 5.000000e-01 : f32
    %266 = vector.broadcast %cst_73 : f32 to vector<8x128xf32>
    %267 = arith.mulf %266, %208 : vector<8x128xf32>
    %268 = arith.subf %196, %186 : vector<8x128xf32>
    %269 = arith.mulf %268, %238 : vector<8x128xf32>
    %270 = arith.subf %171, %191 : vector<8x128xf32>
    %271 = arith.mulf %270, %238 : vector<8x128xf32>
    %272 = arith.subf %176, %166 : vector<8x128xf32>
    %273 = arith.mulf %272, %238 : vector<8x128xf32>
    %274 = arith.subf %196, %186 : vector<8x128xf32>
    %275 = arith.mulf %274, %247 : vector<8x128xf32>
    %cst_74 = arith.constant 5.000000e-01 : f32
    %276 = vector.broadcast %cst_74 : f32 to vector<8x128xf32>
    %277 = arith.mulf %276, %215 : vector<8x128xf32>
    %278 = arith.addf %176, %166 : vector<8x128xf32>
    %279 = arith.mulf %278, %247 : vector<8x128xf32>
    %280 = arith.addf %171, %191 : vector<8x128xf32>
    %281 = arith.mulf %280, %247 : vector<8x128xf32>
    %282 = arith.subf %171, %191 : vector<8x128xf32>
    %283 = arith.mulf %282, %256 : vector<8x128xf32>
    %284 = arith.addf %176, %166 : vector<8x128xf32>
    %285 = arith.mulf %284, %256 : vector<8x128xf32>
    %cst_75 = arith.constant 5.000000e-01 : f32
    %286 = vector.broadcast %cst_75 : f32 to vector<8x128xf32>
    %287 = arith.mulf %286, %222 : vector<8x128xf32>
    %288 = arith.addf %186, %196 : vector<8x128xf32>
    %289 = arith.mulf %288, %256 : vector<8x128xf32>
    %290 = arith.subf %176, %166 : vector<8x128xf32>
    %291 = arith.mulf %290, %265 : vector<8x128xf32>
    %292 = arith.addf %191, %171 : vector<8x128xf32>
    %293 = arith.mulf %292, %265 : vector<8x128xf32>
    %294 = arith.addf %196, %186 : vector<8x128xf32>
    %295 = arith.mulf %294, %265 : vector<8x128xf32>
    %cst_76 = arith.constant 5.000000e-01 : f32
    %296 = vector.broadcast %cst_76 : f32 to vector<8x128xf32>
    %297 = arith.mulf %296, %229 : vector<8x128xf32>
    %298 = arith.maximumf %208, %215 : vector<8x128xf32>
    %299 = arith.maximumf %222, %229 : vector<8x128xf32>
    %300 = arith.maximumf %298, %299 : vector<8x128xf32>
    %301 = arith.cmpf oge, %208, %300 : vector<8x128xf32>
    %302 = arith.cmpf oge, %215, %300 : vector<8x128xf32>
    %303 = arith.cmpf oge, %222, %300 : vector<8x128xf32>
    %304 = arith.select %303, %283, %291 : vector<8x128xi1>, vector<8x128xf32>
    %305 = arith.select %302, %275, %304 : vector<8x128xi1>, vector<8x128xf32>
    %306 = arith.select %301, %267, %305 : vector<8x128xi1>, vector<8x128xf32>
    %307 = arith.select %303, %285, %293 : vector<8x128xi1>, vector<8x128xf32>
    %308 = arith.select %302, %277, %307 : vector<8x128xi1>, vector<8x128xf32>
    %309 = arith.select %301, %269, %308 : vector<8x128xi1>, vector<8x128xf32>
    %310 = arith.select %303, %287, %295 : vector<8x128xi1>, vector<8x128xf32>
    %311 = arith.select %302, %279, %310 : vector<8x128xi1>, vector<8x128xf32>
    %312 = arith.select %301, %271, %311 : vector<8x128xi1>, vector<8x128xf32>
    %313 = arith.select %303, %289, %297 : vector<8x128xi1>, vector<8x128xf32>
    %314 = arith.select %302, %281, %313 : vector<8x128xi1>, vector<8x128xf32>
    %315 = arith.select %301, %273, %314 : vector<8x128xi1>, vector<8x128xf32>
    %c12 = arith.constant 12 : index
    %c0_77 = arith.constant 0 : index
    %c0_78 = arith.constant 0 : index
    %316 = vector.load %arg10[%c12, %c0_77, %c0_78] : memref<28x8x128xf32, #tpu.memory_space<vmem>>, vector<1x8x128xf32>
    %317 = vector.shape_cast %316 : vector<1x8x128xf32> to vector<8x128xf32>
    %318 = vector.shape_cast %73 : vector<8x128xf32> to vector<1x8x128xf32>
    tpu.vector_store %arg10[%c12, %c0_77, %c0_78], %318 {strides = array<i32>} : memref<28x8x128xf32, #tpu.memory_space<vmem>>, vector<1x8x128xf32>,
    %c13 = arith.constant 13 : index
    %c0_79 = arith.constant 0 : index
    %c0_80 = arith.constant 0 : index
    %319 = vector.load %arg10[%c13, %c0_79, %c0_80] : memref<28x8x128xf32, #tpu.memory_space<vmem>>, vector<1x8x128xf32>
    %320 = vector.shape_cast %319 : vector<1x8x128xf32> to vector<8x128xf32>
    %321 = vector.shape_cast %79 : vector<8x128xf32> to vector<1x8x128xf32>
    tpu.vector_store %arg10[%c13, %c0_79, %c0_80], %321 {strides = array<i32>} : memref<28x8x128xf32, #tpu.memory_space<vmem>>, vector<1x8x128xf32>,
    %c14 = arith.constant 14 : index
    %c0_81 = arith.constant 0 : index
    %c0_82 = arith.constant 0 : index
    %322 = vector.load %arg10[%c14, %c0_81, %c0_82] : memref<28x8x128xf32, #tpu.memory_space<vmem>>, vector<1x8x128xf32>
    %323 = vector.shape_cast %322 : vector<1x8x128xf32> to vector<8x128xf32>
    %324 = vector.shape_cast %85 : vector<8x128xf32> to vector<1x8x128xf32>
    tpu.vector_store %arg10[%c14, %c0_81, %c0_82], %324 {strides = array<i32>} : memref<28x8x128xf32, #tpu.memory_space<vmem>>, vector<1x8x128xf32>,
    %c15 = arith.constant 15 : index
    %c0_83 = arith.constant 0 : index
    %c0_84 = arith.constant 0 : index
    %325 = vector.load %arg10[%c15, %c0_83, %c0_84] : memref<28x8x128xf32, #tpu.memory_space<vmem>>, vector<1x8x128xf32>
    %326 = vector.shape_cast %325 : vector<1x8x128xf32> to vector<8x128xf32>
    %327 = vector.shape_cast %161 : vector<8x128xf32> to vector<1x8x128xf32>
    tpu.vector_store %arg10[%c15, %c0_83, %c0_84], %327 {strides = array<i32>} : memref<28x8x128xf32, #tpu.memory_space<vmem>>, vector<1x8x128xf32>,
    %c16 = arith.constant 16 : index
    %c0_85 = arith.constant 0 : index
    %c0_86 = arith.constant 0 : index
    %328 = vector.load %arg10[%c16, %c0_85, %c0_86] : memref<28x8x128xf32, #tpu.memory_space<vmem>>, vector<1x8x128xf32>
    %329 = vector.shape_cast %328 : vector<1x8x128xf32> to vector<8x128xf32>
    %330 = vector.shape_cast %166 : vector<8x128xf32> to vector<1x8x128xf32>
    tpu.vector_store %arg10[%c16, %c0_85, %c0_86], %330 {strides = array<i32>} : memref<28x8x128xf32, #tpu.memory_space<vmem>>, vector<1x8x128xf32>,
    %c17 = arith.constant 17 : index
    %c0_87 = arith.constant 0 : index
    %c0_88 = arith.constant 0 : index
    %331 = vector.load %arg10[%c17, %c0_87, %c0_88] : memref<28x8x128xf32, #tpu.memory_space<vmem>>, vector<1x8x128xf32>
    %332 = vector.shape_cast %331 : vector<1x8x128xf32> to vector<8x128xf32>
    %333 = vector.shape_cast %171 : vector<8x128xf32> to vector<1x8x128xf32>
    tpu.vector_store %arg10[%c17, %c0_87, %c0_88], %333 {strides = array<i32>} : memref<28x8x128xf32, #tpu.memory_space<vmem>>, vector<1x8x128xf32>,
    %c18 = arith.constant 18 : index
    %c0_89 = arith.constant 0 : index
    %c0_90 = arith.constant 0 : index
    %334 = vector.load %arg10[%c18, %c0_89, %c0_90] : memref<28x8x128xf32, #tpu.memory_space<vmem>>, vector<1x8x128xf32>
    %335 = vector.shape_cast %334 : vector<1x8x128xf32> to vector<8x128xf32>
    %336 = vector.shape_cast %176 : vector<8x128xf32> to vector<1x8x128xf32>
    tpu.vector_store %arg10[%c18, %c0_89, %c0_90], %336 {strides = array<i32>} : memref<28x8x128xf32, #tpu.memory_space<vmem>>, vector<1x8x128xf32>,
    %c19 = arith.constant 19 : index
    %c0_91 = arith.constant 0 : index
    %c0_92 = arith.constant 0 : index
    %337 = vector.load %arg10[%c19, %c0_91, %c0_92] : memref<28x8x128xf32, #tpu.memory_space<vmem>>, vector<1x8x128xf32>
    %338 = vector.shape_cast %337 : vector<1x8x128xf32> to vector<8x128xf32>
    %339 = vector.shape_cast %181 : vector<8x128xf32> to vector<1x8x128xf32>
    tpu.vector_store %arg10[%c19, %c0_91, %c0_92], %339 {strides = array<i32>} : memref<28x8x128xf32, #tpu.memory_space<vmem>>, vector<1x8x128xf32>,
    %c20 = arith.constant 20 : index
    %c0_93 = arith.constant 0 : index
    %c0_94 = arith.constant 0 : index
    %340 = vector.load %arg10[%c20, %c0_93, %c0_94] : memref<28x8x128xf32, #tpu.memory_space<vmem>>, vector<1x8x128xf32>
    %341 = vector.shape_cast %340 : vector<1x8x128xf32> to vector<8x128xf32>
    %342 = vector.shape_cast %186 : vector<8x128xf32> to vector<1x8x128xf32>
    tpu.vector_store %arg10[%c20, %c0_93, %c0_94], %342 {strides = array<i32>} : memref<28x8x128xf32, #tpu.memory_space<vmem>>, vector<1x8x128xf32>,
    %c21 = arith.constant 21 : index
    %c0_95 = arith.constant 0 : index
    %c0_96 = arith.constant 0 : index
    %343 = vector.load %arg10[%c21, %c0_95, %c0_96] : memref<28x8x128xf32, #tpu.memory_space<vmem>>, vector<1x8x128xf32>
    %344 = vector.shape_cast %343 : vector<1x8x128xf32> to vector<8x128xf32>
    %345 = vector.shape_cast %191 : vector<8x128xf32> to vector<1x8x128xf32>
    tpu.vector_store %arg10[%c21, %c0_95, %c0_96], %345 {strides = array<i32>} : memref<28x8x128xf32, #tpu.memory_space<vmem>>, vector<1x8x128xf32>,
    %c22 = arith.constant 22 : index
    %c0_97 = arith.constant 0 : index
    %c0_98 = arith.constant 0 : index
    %346 = vector.load %arg10[%c22, %c0_97, %c0_98] : memref<28x8x128xf32, #tpu.memory_space<vmem>>, vector<1x8x128xf32>
    %347 = vector.shape_cast %346 : vector<1x8x128xf32> to vector<8x128xf32>
    %348 = vector.shape_cast %196 : vector<8x128xf32> to vector<1x8x128xf32>
    tpu.vector_store %arg10[%c22, %c0_97, %c0_98], %348 {strides = array<i32>} : memref<28x8x128xf32, #tpu.memory_space<vmem>>, vector<1x8x128xf32>,
    %c23 = arith.constant 23 : index
    %c0_99 = arith.constant 0 : index
    %c0_100 = arith.constant 0 : index
    %349 = vector.load %arg10[%c23, %c0_99, %c0_100] : memref<28x8x128xf32, #tpu.memory_space<vmem>>, vector<1x8x128xf32>
    %350 = vector.shape_cast %349 : vector<1x8x128xf32> to vector<8x128xf32>
    %351 = vector.shape_cast %201 : vector<8x128xf32> to vector<1x8x128xf32>
    tpu.vector_store %arg10[%c23, %c0_99, %c0_100], %351 {strides = array<i32>} : memref<28x8x128xf32, #tpu.memory_space<vmem>>, vector<1x8x128xf32>,
    %c24 = arith.constant 24 : index
    %c0_101 = arith.constant 0 : index
    %c0_102 = arith.constant 0 : index
    %352 = vector.load %arg10[%c24, %c0_101, %c0_102] : memref<28x8x128xf32, #tpu.memory_space<vmem>>, vector<1x8x128xf32>
    %353 = vector.shape_cast %352 : vector<1x8x128xf32> to vector<8x128xf32>
    %354 = vector.shape_cast %306 : vector<8x128xf32> to vector<1x8x128xf32>
    tpu.vector_store %arg10[%c24, %c0_101, %c0_102], %354 {strides = array<i32>} : memref<28x8x128xf32, #tpu.memory_space<vmem>>, vector<1x8x128xf32>,
    %c25 = arith.constant 25 : index
    %c0_103 = arith.constant 0 : index
    %c0_104 = arith.constant 0 : index
    %355 = vector.load %arg10[%c25, %c0_103, %c0_104] : memref<28x8x128xf32, #tpu.memory_space<vmem>>, vector<1x8x128xf32>
    %356 = vector.shape_cast %355 : vector<1x8x128xf32> to vector<8x128xf32>
    %357 = vector.shape_cast %309 : vector<8x128xf32> to vector<1x8x128xf32>
    tpu.vector_store %arg10[%c25, %c0_103, %c0_104], %357 {strides = array<i32>} : memref<28x8x128xf32, #tpu.memory_space<vmem>>, vector<1x8x128xf32>,
    %c26 = arith.constant 26 : index
    %c0_105 = arith.constant 0 : index
    %c0_106 = arith.constant 0 : index
    %358 = vector.load %arg10[%c26, %c0_105, %c0_106] : memref<28x8x128xf32, #tpu.memory_space<vmem>>, vector<1x8x128xf32>
    %359 = vector.shape_cast %358 : vector<1x8x128xf32> to vector<8x128xf32>
    %360 = vector.shape_cast %312 : vector<8x128xf32> to vector<1x8x128xf32>
    tpu.vector_store %arg10[%c26, %c0_105, %c0_106], %360 {strides = array<i32>} : memref<28x8x128xf32, #tpu.memory_space<vmem>>, vector<1x8x128xf32>,
    %c27 = arith.constant 27 : index
    %c0_107 = arith.constant 0 : index
    %c0_108 = arith.constant 0 : index
    %361 = vector.load %arg10[%c27, %c0_107, %c0_108] : memref<28x8x128xf32, #tpu.memory_space<vmem>>, vector<1x8x128xf32>
    %362 = vector.shape_cast %361 : vector<1x8x128xf32> to vector<8x128xf32>
    %363 = vector.shape_cast %315 : vector<8x128xf32> to vector<1x8x128xf32>
    tpu.vector_store %arg10[%c27, %c0_107, %c0_108], %363 {strides = array<i32>} : memref<28x8x128xf32, #tpu.memory_space<vmem>>, vector<1x8x128xf32>,
    return
  }
  func.func @transform_0(%arg0: i32) -> (i32, i32) {
    %c0_i32 = arith.constant 0 : i32
    %c0_i32_0 = arith.constant 0 : i32
    return %c0_i32, %arg0 : i32, i32
  }
  func.func @transform_1(%arg0: i32) -> (i32, i32, i32) {
    %c0_i32 = arith.constant 0 : i32
    %c0_i32_0 = arith.constant 0 : i32
    %c0_i32_1 = arith.constant 0 : i32
    return %c0_i32, %arg0, %c0_i32_0 : i32, i32, i32
  }
  func.func @transform_2(%arg0: i32) -> (i32, i32) {
    %c0_i32 = arith.constant 0 : i32
    %c0_i32_0 = arith.constant 0 : i32
    %c0_i32_1 = arith.constant 0 : i32
    return %c0_i32, %c0_i32_0 : i32, i32
  }
  func.func @transform_3(%arg0: i32) -> (i32, i32) {
    %c0_i32 = arith.constant 0 : i32
    %c0_i32_0 = arith.constant 0 : i32
    %c0_i32_1 = arith.constant 0 : i32
    return %c0_i32, %c0_i32_0 : i32, i32
  }
  func.func @transform_4(%arg0: i32) -> (i32, i32) {
    %c0_i32 = arith.constant 0 : i32
    %c0_i32_0 = arith.constant 0 : i32
    %c0_i32_1 = arith.constant 0 : i32
    return %c0_i32, %c0_i32_0 : i32, i32
  }
  func.func @transform_5(%arg0: i32) -> (i32, i32) {
    %c0_i32 = arith.constant 0 : i32
    %c0_i32_0 = arith.constant 0 : i32
    %c0_i32_1 = arith.constant 0 : i32
    return %c0_i32, %c0_i32_0 : i32, i32
  }
  func.func @transform_6(%arg0: i32) -> (i32, i32) {
    %c0_i32 = arith.constant 0 : i32
    %c0_i32_0 = arith.constant 0 : i32
    %c0_i32_1 = arith.constant 0 : i32
    return %c0_i32, %c0_i32_0 : i32, i32
  }
  func.func @transform_7(%arg0: i32) -> (i32, i32) {
    %c0_i32 = arith.constant 0 : i32
    %c0_i32_0 = arith.constant 0 : i32
    %c0_i32_1 = arith.constant 0 : i32
    return %c0_i32, %c0_i32_0 : i32, i32
  }
  func.func @transform_8(%arg0: i32) -> (i32, i32) {
    %c0_i32 = arith.constant 0 : i32
    %c0_i32_0 = arith.constant 0 : i32
    %c0_i32_1 = arith.constant 0 : i32
    return %c0_i32, %c0_i32_0 : i32, i32
  }
  func.func @transform_9(%arg0: i32) -> (i32, i32, i32) {
    %c0_i32 = arith.constant 0 : i32
    %c0_i32_0 = arith.constant 0 : i32
    %c0_i32_1 = arith.constant 0 : i32
    return %c0_i32, %arg0, %c0_i32_0 : i32, i32, i32
  }
}

</mosaic_0001>

<bundles_post_ra>
// kernel: skinning_field_forward.1
= control target key start
LH: loop header
LB: loop body
LE: loop exit
PB: predicated region body
PF: predicated region fallthrough
CT: control target
= control target key end

     0   :  { %s3632_s30 = smov 0   ;;  %s3634_s10 = smov 0   ;;  %s5622_s0 = inlined_call_operand.vmem [shape: f32[7,2048], index: 0, kind: input, shape index: {}]   ;;  %s5623_s1 = inlined_call_operand.vmem [shape: f32[7,16,128], index: 1, kind: input, shape index: {}]   ;;  %s5624_s2 = inlined_call_operand.vmem [shape: f32[64,3], index: 2, kind: input, shape index: {}]   ;;  %s5625_s3 = inlined_call_operand.vmem [shape: f32[64,1], index: 3, kind: input, shape index: {}]   ;;  %s5626_s4 = inlined_call_operand.vmem [shape: f32[64,64], index: 4, kind: input, shape index: {}]   ;;  %s5627_s5 = inlined_call_operand.vmem [shape: f32[64,1], index: 5, kind: input, shape index: {}]   ;;  %s5628_s6 = inlined_call_operand.vmem [shape: f32[55,64], index: 6, kind: input, shape index: {}]   ;;  %s5629_s7 = inlined_call_operand.vmem [shape: f32[55,1], index: 7, kind: input, shape index: {}]   ;;  %s5630_s8 = inlined_call_operand.vmem [shape: f32[12,55], index: 8, kind: input, shape index: {}]   ;;  %s5631_s9 = inlined_call_operand.vmem [shape: f32[28,16,128], index: 9, kind: output, shape index: {}]  }
   0x1   :  { %s3636_s11 = smov 0  }
   0x2 LB: > { %s3127_s12 = sadd.s32 4294967295, %s3577_s11   ;;  %s3649_s13 = sadd.s32 1, %s3577_s11   ;;  %s3577_s11 = sphi %s3636_s11, %s5671_s11   ;;  %s3573_s10 = sphi %s3634_s10, %s5670_s10   ;;  %s3569_s30 = sphi %s3632_s30, %s5669_s30  }
   0x3   : > { %s49_s14 = ssub.s32 %s3577_s11, %s3649_s13  ;;  %s52_s15 = sadd.s32 1, %s3573_s10 }
   0x4   : > { %p50_p0 = scmp.eq.s32.totalorder %s49_s14, 0  ;;  %p59_p1 = scmp.ne.s32.totalorder %s3573_s10, %s3569_s30 }
   0x5   : > { %p60_p2 = scmp.eq.s32.totalorder %s3577_s11, 0  ;;  %p236_p3 = scmp.eq.s32.totalorder %s3127_s12, 1 }
   0x6   : > { %s3660_s16 = scalar_select %p50_p0, %s3573_s10, %s52_s15  }
   0x7   : > { %p61_p4 = por %p60_p2, %p59_p1  ;;  %p3662_p5 = por %p236_p3, %p59_p1 }
   0x8   : > { %p3130_p6 = scmp.ge.s32.totalorder %s3577_s11, 2 }
   0xa   : > { %279 = sbr.rel (%p3130_p6) target bundleno = 26 (0x1a), region = 44 }
   0xf   : > { %291 = sbr.rel (!%p61_p4) target bundleno = 26 (0x1a), region = 52  ;;  %s293_s18 = sand.u32 (%p61_p4), 1, %s3573_s10  }
  0x10   : > { %s3131_s19 = sshll.u32 (%p61_p4), %s3577_s11, 3  ;;  %s3376_s20 = smul.u32 (%p61_p4), 56, %s293_s18 }
  0x11   : > { %s297_s23 = scalar_lea.vmem (%p61_p4), %s5623_s1, %s3131_s19 }
  0x12   : > { %v338_v0 = vld [vmem:[%s297_s23] sm:$0xff] (%p61_p4)  ;;  %v340_v1 = vld [vmem:[%s297_s23 + $0x10] sm:$0xff] (%p61_p4)  ;;  %s295_s24 = scalar_lea.vmem (%p61_p4), [#allocation2], %s3376_s20 }
  0x13   : > { %v342_v2 = vld [vmem:[%s297_s23 + $0x20] sm:$0xff] (%p61_p4)  ;;  %339 = vst [vmem:[%s295_s24] sm:$0xff] (%p61_p4), %v338_v0  ;;  %v344_v3 = vld [vmem:[%s297_s23 + $0x30] sm:$0xff] (%p61_p4) }
  0x14   : > { %341 = vst [vmem:[%s295_s24 + $0x8] sm:$0xff] %v340_v1  ;;  %v346_v4 = vld [vmem:[%s297_s23 + $0x40] sm:$0xff]  ;;  %v348_v5 = vld [vmem:[%s297_s23 + $0x50] sm:$0xff] }
  0x15   : > { %343 = vst [vmem:[%s295_s24 + $0x10] sm:$0xff] %v342_v2  ;;  %v350_v6 = vld [vmem:[%s297_s23 + $0x60] sm:$0xff] }
  0x16   : > { %345 = vst [vmem:[%s295_s24 + $0x18] sm:$0xff] %v344_v3 }
  0x17   : > { %347 = vst [vmem:[%s295_s24 + $0x20] sm:$0xff] %v346_v4 }
  0x18   : > { %349 = vst [vmem:[%s295_s24 + $0x28] sm:$0xff] %v348_v5 }
  0x19   : > { %351 = vst [vmem:[%s295_s24 + $0x30] sm:$0xff] %v350_v6 }
  0x1a PF: > { %p3132_p7 = scmp.ge.s32.totalorder %s3577_s11, 1  ;;  %p356_p8 = scmp.lt.s32.totalorder %s3577_s11, 3 }
  0x1c   : > { %p357_p9 = pnand %p3132_p7, %p356_p8 }
  0x1e   : > { %360 = sbr.rel (%p357_p9) target bundleno = 1037 (0x40d), region = 90 }
  0x23   : > { %s3676_s25 = sshll.u32 %s3127_s12, 3  ;;  %v429_v7 = vld [vmem:[%s5625_s3 + $0x28] sm:$0xff]  ;;  %v3579_v8 = vmov 0   ;;  %v431_v9 = vld [vmem:[%s5625_s3 + $0x38] sm:$0xff]  ;;  %vm497_vm0 = vcmask 1042432   ;;  %v3694_v10 = vld [vmem:[%s5624_s2] sm:$0xff] }
  0x24   : > { %p403_p10 = scmp.lt.s32.totalorder %s3676_s25, 15  ;;  %3407 = vset.pattern.permute.xlu1 %v3579_v8  ;;  %3406 = vset.pattern.permute.xlu0 %v3579_v8  ;;  %vm472_vm1 = vcmask 23552   ;;  %v428_v15 = vld [vmem:[%s5625_s3 + $0x20] sm:$0xff]  ;;  %v430_v16 = vld [vmem:[%s5625_s3 + $0x30] sm:$0xff]  ;;  %v3721_v17 = vld [vmem:[%s5624_s2 + $0x8] sm:$0xff]  ;;  %vm970_vm2 = vcmask 523264   ;;  %s5554_s29 = scalar_lea.vmem (%p3662_p5), %s5631_s9, %s3676_s25 }
  0x25   : > { %459 = vperm.xlu1 %3407, %v429_v7   ;;  %469 = vperm.xlu0 %3406, %v431_v9   ;;  %v424_v18 = vld [vmem:[%s5625_s3] sm:$0xff]  ;;  %v425_v19 = vld [vmem:[%s5625_s3 + $0x8] sm:$0xff]  ;;  %v3740_v20 = vld [vmem:[%s5624_s2 + $0x10] sm:$0xff]  ;;  %vm1766_vm3 = vcmask 1046528   ;;  %vm2228_vm4 = vcmask 449536   ;;  %s363_s23 = sand.u32 1, %s3569_s30  }
  0x26   : > { %s404_s14 = scalar_select %p403_p10, %s3676_s25, 15  ;;  %3408 = vset.pattern.permute.xlu2 %v3579_v8  ;;  %v928_v21 = vld [vmem:[%s5627_s5 + $0x30] sm:$0xff]  ;;  %v927_v22 = vld [vmem:[%s5627_s5 + $0x28] sm:$0xff]  ;;  %v427_v23 = vld [vmem:[%s5625_s3 + $0x18] sm:$0xff]  ;;  %vm2444_vm5 = vcmask 1047556  }
  0x27   : > { %449 = vperm.xlu2 %3408, %v427_v23   ;;  %v3766_v26 = vld [vmem:[%s5624_s2 + $0x18] sm:$0xff]  ;;  %v924_v28 = vld [vmem:[%s5627_s5 + $0x10] sm:$0xff]  ;;  %v420_v32 = vld [vmem:[%s5624_s2 + $0x20] sm:$0xff]  ;;  %s3377_s24 = smul.u32 56, %s363_s23 }
  0x28   : > { %s3134_s11 = sshll.u32 %s404_s14, 3  ;;  %v925_v27 = vld [vmem:[%s5627_s5 + $0x18] sm:$0xff]  ;;  %v426_v29 = vld [vmem:[%s5625_s3 + $0x10] sm:$0xff]  ;;  %v922_v33 = vld [vmem:[%s5627_s5] sm:$0xff]  ;;  %s3378_s26 = smul.u32 224, %s363_s23 }
  0x29   : > { %s3689_s18 = scalar_lea.vmem %s5622_s0, %s3134_s11  ;;  %v1394_v34 = vld [vmem:[%s5629_s7] sm:$0xff]  ;;  %v929_v35 = vld [vmem:[%s5627_s5 + $0x38] sm:$0xff]  ;;  %v421_v36 = vld [vmem:[%s5624_s2 + $0x28] sm:$0xff] }
  0x2a   : > { %v408_v11 = vld [vmem:[%s3689_s18] sm:$0x7]  ;;  %v409_v12 = vld [vmem:[%s3689_s18 + $0x8] sm:$0x7]  ;;  %v410_v13 = vld [vmem:[%s3689_s18 + $0x10] sm:$0x7] }
  0x2b   : > { %3135 = vmatpush.msk.msra.mxu0 %vm497_vm0, %v408_v11  ;;  %3144 = vmatpush.msk.msra.mxu1 %vm497_vm0, %v409_v12  ;;  %v411_v14 = vld [vmem:[%s3689_s18 + $0x18] sm:$0x7]  ;;  %v414_v25 = vld [vmem:[%s3689_s18 + $0x30] sm:$0x7]  ;;  %v412_v30 = vld [vmem:[%s3689_s18 + $0x20] sm:$0x7] }
  0x2c   : > { %3153 = vmatpush.msk.msra.mxu2 %vm497_vm0, %v410_v13  ;;  %3162 = vmatpush.msk.msra.mxu3 %vm497_vm0, %v411_v14  ;;  %v415_v24 = vld [vmem:[%s3689_s18 + $0x38] sm:$0x7]  ;;  %v413_v31 = vld [vmem:[%s3689_s18 + $0x28] sm:$0x7]  ;;  %v1396_v37 = vld [vmem:[%s5629_s7 + $0x10] sm:$0xff]  ;;  %s5263_s18 = scalar_lea.vmem [#allocation2], %s3377_s24 }
  0x2d   : > { %3136 = vmatmul.msk.f32.vlgmr.msra.gmra.mxu0 %vm472_vm1, %v3694_v10  ;;  %3145 = vmatmul.msk.f32.vlgmr.msra.gmra.mxu1 %vm472_vm1, %v3694_v10  ;;  %v1397_v38 = vld [vmem:[%s5629_s7 + $0x18] sm:$0xff]  ;;  %v926_v39 = vld [vmem:[%s5627_s5 + $0x20] sm:$0xff]  ;;  %v422_v40 = vld [vmem:[%s5624_s2 + $0x30] sm:$0xff]  ;;  %s5349_s30 = scalar_lea.vmem [#allocation3], %s3378_s26 }
  0x2e   : > { %3154 = vmatmul.msk.f32.vlgmr.msra.gmra.mxu2 %vm472_vm1, %v3694_v10  ;;  %3163 = vmatmul.msk.f32.vlgmr.msra.gmra.mxu3 %vm472_vm1, %v3694_v10  ;;  %v1399_v41 = vld [vmem:[%s5629_s7 + $0x28] sm:$0xff]  ;;  %v1400_v42 = vld [vmem:[%s5629_s7 + $0x30] sm:$0x7f]  ;;  %v423_v44 = vld [vmem:[%s5624_s2 + $0x38] sm:$0xff] }
  0x2f   : > { %454 = vperm.xlu1 %3407, %v428_v15   ;;  %464 = vperm.xlu0 %3406, %v430_v16   ;;  %v923_v43 = vld [vmem:[%s5627_s5 + $0x8] sm:$0xff]  ;;  %v1398_v46 = vld [vmem:[%s5629_s7 + $0x20] sm:$0xff] }
  0x30   : > { %3198 = vmatpush.msk.msrb.mxu3 %vm497_vm0, %v415_v24  ;;  %3189 = vmatpush.msk.msrb.mxu2 %vm497_vm0, %v414_v25  ;;  %v1395_v45 = vld [vmem:[%s5629_s7 + $0x8] sm:$0xff] }
  0x31   : > { %444 = vperm.xlu2 %3408, %v426_v29   ;;  %3171 = vmatpush.msk.msrb.mxu0 %vm497_vm0, %v412_v30 }
  0x32   : > { %3180 = vmatpush.msk.msrb.mxu1 %vm497_vm0, %v413_v31 }
  0x35   : > { %3137 = vmatmul.msk.f32.gmra.mxu0 %vm472_vm1, %v3721_v17  ;;  %3146 = vmatmul.msk.f32.gmra.mxu1 %vm472_vm1, %v3721_v17 }
  0x36   : > { %3155 = vmatmul.msk.f32.gmra.mxu2 %vm472_vm1, %v3721_v17  ;;  %3164 = vmatmul.msk.f32.gmra.mxu3 %vm472_vm1, %v3721_v17 }
  0x37   : > { %434 = vperm.xlu1 %3407, %v424_v18   ;;  %439 = vperm.xlu0 %3406, %v425_v19  }
  0x39   : > { %967 = vperm.xlu2 %3408, %v929_v35  }
  0x3d   : > { %3138 = vmatmul.msk.f32.gmra.mxu0 %vm472_vm1, %v3740_v20  ;;  %3147 = vmatmul.msk.f32.gmra.mxu1 %vm472_vm1, %v3740_v20 }
  0x3e   : > { %3156 = vmatmul.msk.f32.gmra.mxu2 %vm472_vm1, %v3740_v20  ;;  %3165 = vmatmul.msk.f32.gmra.mxu3 %vm472_vm1, %v3740_v20 }
  0x3f   : > { %962 = vperm.xlu0 %3406, %v928_v21   ;;  %957 = vperm.xlu1 %3407, %v927_v22  }
  0x41   : > { %952 = vperm.xlu2 %3408, %v926_v39  }
  0x45   : > { %3139 = vmatmul.msk.f32.gmra.mxu0 %vm472_vm1, %v3766_v26  ;;  %3148 = vmatmul.msk.f32.gmra.mxu1 %vm472_vm1, %v3766_v26 }
  0x46   : > { %3157 = vmatmul.msk.f32.gmra.mxu2 %vm472_vm1, %v3766_v26  ;;  %3166 = vmatmul.msk.f32.gmra.mxu3 %vm472_vm1, %v3766_v26 }
  0x47   : > { %947 = vperm.xlu0 %3406, %v925_v27   ;;  %942 = vperm.xlu1 %3407, %v924_v28  }
  0x49   : > { %937 = vperm.xlu2 %3408, %v923_v43  }
  0x4d   : > { %3140 = vmatmul.msk.f32.gmra.mxu0 %vm472_vm1, %v420_v32  ;;  %3149 = vmatmul.msk.f32.gmra.mxu1 %vm472_vm1, %v420_v32 }
  0x4e   : > { %3158 = vmatmul.msk.f32.gmra.mxu2 %vm472_vm1, %v420_v32  ;;  %3167 = vmatmul.msk.f32.gmra.mxu3 %vm472_vm1, %v420_v32 }
  0x4f   : > { %932 = vperm.xlu0 %3406, %v922_v33   ;;  %1403 = vperm.xlu1 %3407, %v1394_v34  }
  0x51   : > { %1408 = vperm.xlu2 %3408, %v1395_v45  }
  0x55   : > { %3141 = vmatmul.msk.f32.gmra.mxu0 %vm472_vm1, %v421_v36  ;;  %3150 = vmatmul.msk.f32.gmra.mxu1 %vm472_vm1, %v421_v36 }
  0x56   : > { %3159 = vmatmul.msk.f32.gmra.mxu2 %vm472_vm1, %v421_v36  ;;  %3168 = vmatmul.msk.f32.gmra.mxu3 %vm472_vm1, %v421_v36 }
  0x57   : > { %1413 = vperm.xlu0 %3406, %v1396_v37   ;;  %1418 = vperm.xlu1 %3407, %v1397_v38  }
  0x59   : > { %1423 = vperm.xlu2 %3408, %v1398_v46  }
  0x5d   : > { %3142 = vmatmul.msk.f32.gmra.mxu0 %vm472_vm1, %v422_v40  ;;  %3151 = vmatmul.msk.f32.gmra.mxu1 %vm472_vm1, %v422_v40 }
  0x5e   : > { %3160 = vmatmul.msk.f32.gmra.mxu2 %vm472_vm1, %v422_v40  ;;  %3169 = vmatmul.msk.f32.gmra.mxu3 %vm472_vm1, %v422_v40 }
  0x5f   : > { %1428 = vperm.xlu0 %3406, %v1399_v41   ;;  %1433 = vperm.xlu1 %3407, %v1400_v42  }
  0x65   : > { %3143 = vmatmul.msk.f32.gmra.mxu0 %vm472_vm1, %v423_v44  ;;  %3152 = vmatmul.msk.f32.gmra.mxu1 %vm472_vm1, %v423_v44 }
  0x66   : > { %3161 = vmatmul.msk.f32.gmra.mxu2 %vm472_vm1, %v423_v44  ;;  %3170 = vmatmul.msk.f32.gmra.mxu3 %vm472_vm1, %v423_v44 }
  0x6d   : > { %3172 = vmatmul.msk.f32.vlgmr.msrb.gmra.mxu0 %vm472_vm1, %v3694_v10  ;;  %3181 = vmatmul.msk.f32.vlgmr.msrb.gmra.mxu1 %vm472_vm1, %v3694_v10 }
  0x6e   : > { %3190 = vmatmul.msk.f32.vlgmr.msrb.gmra.mxu2 %vm472_vm1, %v3694_v10  ;;  %3199 = vmatmul.msk.f32.vlgmr.msrb.gmra.mxu3 %vm472_vm1, %v3694_v10 }
  0x75   : > { %3173 = vmatmul.msk.f32.gmra.mxu0 %vm472_vm1, %v3721_v17  ;;  %3182 = vmatmul.msk.f32.gmra.mxu1 %vm472_vm1, %v3721_v17 }
  0x76   : > { %3191 = vmatmul.msk.f32.gmra.mxu2 %vm472_vm1, %v3721_v17  ;;  %3200 = vmatmul.msk.f32.gmra.mxu3 %vm472_vm1, %v3721_v17 }
  0x7d   : > { %3174 = vmatmul.msk.f32.gmra.mxu0 %vm472_vm1, %v3740_v20  ;;  %3183 = vmatmul.msk.f32.gmra.mxu1 %vm472_vm1, %v3740_v20 }
  0x7e   : > { %3192 = vmatmul.msk.f32.gmra.mxu2 %vm472_vm1, %v3740_v20  ;;  %3201 = vmatmul.msk.f32.gmra.mxu3 %vm472_vm1, %v3740_v20 }
  0x81   : > { %v3930_v11 = vpop.permute.xlu2 %449 }
  0x85   : > { %3175 = vmatmul.msk.f32.gmra.mxu0 %vm472_vm1, %v3766_v26  ;;  %3184 = vmatmul.msk.f32.gmra.mxu1 %vm472_vm1, %v3766_v26 }
  0x86   : > { %3193 = vmatmul.msk.f32.gmra.mxu2 %vm472_vm1, %v3766_v26  ;;  %3202 = vmatmul.msk.f32.gmra.mxu3 %vm472_vm1, %v3766_v26 }
  0x8d   : > { %3176 = vmatmul.msk.f32.gmra.mxu0 %vm472_vm1, %v420_v32  ;;  %3185 = vmatmul.msk.f32.gmra.mxu1 %vm472_vm1, %v420_v32 }
  0x8e   : > { %3194 = vmatmul.msk.f32.gmra.mxu2 %vm472_vm1, %v420_v32  ;;  %3203 = vmatmul.msk.f32.gmra.mxu3 %vm472_vm1, %v420_v32  ;;  %v3944_v32 = vpop.permute.xlu2 %444 }
  0x95   : > { %3177 = vmatmul.msk.f32.gmra.mxu0 %vm472_vm1, %v421_v36  ;;  %3186 = vmatmul.msk.f32.gmra.mxu1 %vm472_vm1, %v421_v36 }
  0x96   : > { %3195 = vmatmul.msk.f32.gmra.mxu2 %vm472_vm1, %v421_v36  ;;  %3204 = vmatmul.msk.f32.gmra.mxu3 %vm472_vm1, %v421_v36 }
  0x97   : > { %v3926_v5 = vpop.permute.xlu0 %469  ;;  %v3928_v6 = vpop.permute.xlu1 %459 }
  0x9d   : > { %3178 = vmatmul.msk.f32.gmra.mxu0 %vm472_vm1, %v422_v40  ;;  %3187 = vmatmul.msk.f32.gmra.mxu1 %vm472_vm1, %v422_v40 }
  0x9e   : > { %3196 = vmatmul.msk.f32.gmra.mxu2 %vm472_vm1, %v422_v40  ;;  %3205 = vmatmul.msk.f32.gmra.mxu3 %vm472_vm1, %v422_v40 }
  0xa1   : > { %v3932_v12 = vpop.permute.xlu0 %464  ;;  %v3940_v23 = vpop.permute.xlu1 %454 }
  0xa5   : > { %3179 = vmatmul.msk.f32.gmra.mxu0 %vm472_vm1, %v423_v44  ;;  %3188 = vmatmul.msk.f32.gmra.mxu1 %vm472_vm1, %v423_v44 }
  0xa6   : > { %3197 = vmatmul.msk.f32.gmra.mxu2 %vm472_vm1, %v423_v44  ;;  %3206 = vmatmul.msk.f32.gmra.mxu3 %vm472_vm1, %v423_v44 }
  0xaa   : > { %v3898_v47 = vpop.f32.mrf.mxu0  ;;  %v3900_v48 = vpop.f32.mrf.mxu1 }
  0xb1   : > { %v3902_v49 = vpop.f32.mrf.mxu2  ;;  %v3904_v50 = vpop.f32.mrf.mxu3 }
  0xb2   : > { %v3906_v51 = vpop.f32.mrf.mxu0  ;;  %v3908_v52 = vpop.f32.mrf.mxu1 }
  0xb9   : > { %v3910_v53 = vpop.f32.mrf.mxu2  ;;  %v3912_v54 = vpop.f32.mrf.mxu3 }
  0xba   : > { %v545_v55 = vpop.f32.mrf.mxu0  ;;  %v586_v56 = vpop.f32.mrf.mxu1 }
  0xbb   : > { %v546_v45 = vadd.f32 %v545_v55, %v3944_v32  ;;  %v587_v46 = vadd.f32 %v586_v56, %v3944_v32 }
  0xc1   : > { %v3914_v57 = vpop.f32.mrf.mxu2  ;;  %v3916_v58 = vpop.f32.mrf.mxu3 }
  0xc2   : > { %v548_v59 = vpop.f32.mrf.mxu0  ;;  %v589_v60 = vpop.f32.mrf.mxu1 }
  0xc3   : > { %v549_v33 = vadd.f32 %v548_v59, %v3930_v11  ;;  %v590_v34 = vadd.f32 %v589_v60, %v3930_v11  ;;  %v3958_v59 = vpop.permute.xlu0 %439 }
  0xc4   : > { %v584_v55 = vadd.f32 %v3908_v52, %v3958_v59 }
  0xc9   : > { %v3918_v61 = vpop.f32.mrf.mxu2  ;;  %v3920_v62 = vpop.f32.mrf.mxu3 }
  0xca   : > { %v551_v63 = vpop.f32.mrf.mxu0  ;;  %v592_v0 = vpop.f32.mrf.mxu1 }
  0xcb   : > { %v552_v26 = vadd.f32 %v551_v63, %v3940_v23  ;;  %v593_v27 = vadd.f32 %v592_v0, %v3940_v23 }
  0xcd   : > { %v882_v43 = vmax.f32 %v552_v26, 0.0  ;;  %v883_v44 = vmax.f32 %v593_v27, 0.0  ;;  %v625_v26 = vadd.f32 %v3910_v53, %v3958_v59 }
  0xd1   : > { %v3922_v1 = vpop.f32.mrf.mxu2  ;;  %v3924_v2 = vpop.f32.mrf.mxu3 }
  0xd2   : > { %v554_v3 = vpop.f32.mrf.mxu0  ;;  %v595_v4 = vpop.f32.mrf.mxu1  ;;  %v634_v56 = vadd.f32 %v3922_v1, %v3940_v23  ;;  %v631_v1 = vadd.f32 %v3918_v61, %v3930_v11  ;;  %v669_v61 = vadd.f32 %v3916_v58, %v3944_v32 }
  0xd3   : > { %v555_v15 = vadd.f32 %v554_v3, %v3928_v6  ;;  %v596_v16 = vadd.f32 %v595_v4, %v3928_v6  ;;  %v874_v4 = vmax.f32 %v549_v33, 0.0 }
  0xd5   : > { %v890_v28 = vmax.f32 %v555_v15, 0.0  ;;  %v891_v29 = vmax.f32 %v596_v16, 0.0  ;;  %v866_v15 = vmax.f32 %v546_v45, 0.0  ;;  %v867_v16 = vmax.f32 %v587_v46, 0.0 }
  0xd9   : > { %v636_v7 = vpop.f32.mrf.mxu2  ;;  %v677_v8 = vpop.f32.mrf.mxu3 }
  0xda   : > { %v557_v9 = vpop.f32.mrf.mxu0  ;;  %v598_v10 = vpop.f32.mrf.mxu1  ;;  %v637_v60 = vadd.f32 %v636_v7, %v3928_v6  ;;  %v678_v63 = vadd.f32 %v677_v8, %v3928_v6  ;;  %v675_v7 = vadd.f32 %v3924_v2, %v3940_v23  ;;  %v672_v2 = vadd.f32 %v3920_v62, %v3930_v11 }
  0xdb   : > { %v558_v19 = vadd.f32 %v557_v9, %v3932_v12  ;;  %v599_v20 = vadd.f32 %v598_v10, %v3932_v12  ;;  %v875_v9 = vmax.f32 %v590_v34, 0.0  ;;  %v543_v10 = vadd.f32 %v3906_v51, %v3958_v59 }
  0xdc   : > { %v885_v62 = vmax.f32 %v675_v7, 0.0  ;;  %v877_v58 = vmax.f32 %v672_v2, 0.0  ;;  %v860_v34 = vmax.f32 %v625_v26, 0.0 }
  0xdd   : > { %v898_v30 = vmax.f32 %v558_v19, 0.0  ;;  %v899_v31 = vmax.f32 %v599_v20, 0.0 }
  0xe1   : > { %v639_v13 = vpop.f32.mrf.mxu2  ;;  %v680_v14 = vpop.f32.mrf.mxu3 }
  0xe2   : > { %v560_v17 = vpop.f32.mrf.mxu0  ;;  %v601_v18 = vpop.f32.mrf.mxu1  ;;  %v640_v37 = vadd.f32 %v639_v13, %v3932_v12  ;;  %v681_v38 = vadd.f32 %v680_v14, %v3932_v12 }
  0xe3   : > { %v561_v21 = vadd.f32 %v560_v17, %v3926_v5  ;;  %v602_v22 = vadd.f32 %v601_v18, %v3926_v5  ;;  %v3966_v13 = vpop.permute.xlu1 %434  ;;  %v892_v17 = vmax.f32 %v637_v60, 0.0  ;;  %v893_v18 = vmax.f32 %v678_v63, 0.0  ;;  %v4041_v60 = vld [vmem:[%s5626_s4 + $0x10] sm:$0xff] }
  0xe4   : > { %v900_v8 = vmax.f32 %v640_v37, 0.0  ;;  %v901_v14 = vmax.f32 %v681_v38, 0.0  ;;  %v540_v51 = vadd.f32 %v3898_v47, %v3966_v13  ;;  %v581_v52 = vadd.f32 %v3900_v48, %v3966_v13 }
  0xe5   : > { %v906_v24 = vmax.f32 %v561_v21, 0.0  ;;  %v907_v25 = vmax.f32 %v602_v22, 0.0  ;;  %v858_v47 = vmax.f32 %v543_v10, 0.0  ;;  %v859_v21 = vmax.f32 %v584_v55, 0.0 }
  0xe6   : > { %v628_v48 = vadd.f32 %v3914_v57, %v3944_v32  ;;  %v884_v22 = vmax.f32 %v634_v56, 0.0  ;;  %v850_v27 = vmax.f32 %v540_v51, 0.0  ;;  %v666_v57 = vadd.f32 %v3912_v54, %v3958_v59 }
  0xe7   : > { %1003 = vmatpush.msra.mxu0 %v906_v24  ;;  %1044 = vmatpush.msra.mxu1 %v907_v25  ;;  %v622_v53 = vadd.f32 %v3902_v49, %v3966_v13  ;;  %v869_v54 = vmax.f32 %v669_v61, 0.0 }
  0xe8   : > { %v868_v33 = vmax.f32 %v628_v48, 0.0 }
  0xe9   : > { %v642_v35 = vpop.f32.mrf.mxu2  ;;  %v683_v36 = vpop.f32.mrf.mxu3  ;;  %1004 = vmatpush.msra.mxu0 %v898_v30  ;;  %1045 = vmatpush.msra.mxu1 %v899_v31  ;;  %v3999_v30 = vld [vmem:[%s5626_s4] sm:$0xff]  ;;  %v663_v31 = vadd.f32 %v3904_v50, %v3966_v13  ;;  %v852_v37 = vmax.f32 %v622_v53, 0.0 }
  0xea   : > { %v643_v39 = vadd.f32 %v642_v35, %v3926_v5  ;;  %v684_v40 = vadd.f32 %v683_v36, %v3926_v5  ;;  %v3952_v41 = vpop.f32.mrf.mxu0  ;;  %v3954_v42 = vpop.f32.mrf.mxu1  ;;  %v861_v35 = vmax.f32 %v666_v57, 0.0 }
  0xeb   : > { %1005 = vmatpush.msra.mxu0 %v890_v28  ;;  %1046 = vmatpush.msra.mxu1 %v891_v29  ;;  %v851_v28 = vmax.f32 %v581_v52, 0.0  ;;  %v876_v29 = vmax.f32 %v631_v1, 0.0  ;;  %v853_v50 = vmax.f32 %v663_v31, 0.0  ;;  %v4088_v52 = vld [vmem:[%s5626_s4 + $0x28] sm:$0xff] }
  0xec   : > { %v908_v0 = vmax.f32 %v643_v39, 0.0  ;;  %v909_v3 = vmax.f32 %v684_v40, 0.0  ;;  %v4020_v40 = vld [vmem:[%s5626_s4 + $0x8] sm:$0xff] }
  0xed   : > { %1006 = vmatpush.msra.mxu0 %v882_v43  ;;  %1047 = vmatpush.msra.mxu1 %v883_v44 }
  0xee   : > { %1085 = vmatpush.msra.mxu2 %v908_v0  ;;  %1126 = vmatpush.msra.mxu3 %v909_v3 }
  0xef   : > { %1007 = vmatpush.msra.mxu0 %v874_v4  ;;  %1048 = vmatpush.msra.mxu1 %v875_v9  ;;  %v4058_v9 = vld [vmem:[%s5626_s4 + $0x18] sm:$0xff] }
  0xf0   : > { %1086 = vmatpush.msra.mxu2 %v900_v8  ;;  %1127 = vmatpush.msra.mxu3 %v901_v14  ;;  %v4075_v8 = vld [vmem:[%s5626_s4 + $0x20] sm:$0xff] }
  0xf1   : > { %v3980_v19 = vpop.f32.mrf.mxu2  ;;  %v3982_v20 = vpop.f32.mrf.mxu3  ;;  %1008 = vmatpush.msra.mxu0 %v866_v15  ;;  %1049 = vmatpush.msra.mxu1 %v867_v16 }
  0xf2   : > { %1087 = vmatpush.msra.mxu2 %v892_v17  ;;  %1128 = vmatpush.msra.mxu3 %v893_v18  ;;  %v3988_v24 = vpop.f32.mrf.mxu0  ;;  %v3990_v25 = vpop.f32.mrf.mxu1 }
  0xf3   : > { %1009 = vmatpush.msra.mxu0 %v858_v47  ;;  %1050 = vmatpush.msra.mxu1 %v859_v21 }
  0xf4   : > { %1088 = vmatpush.msra.mxu2 %v884_v22  ;;  %1129 = vmatpush.msra.mxu3 %v885_v62  ;;  %v4105_v22 = vld [vmem:[%s5626_s4 + $0x30] sm:$0xff] }
  0xf5   : > { %1010 = vmatpush.msra.mxu0 %v850_v27  ;;  %1051 = vmatpush.msra.mxu1 %v851_v28 }
  0xf6   : > { %1089 = vmatpush.msra.mxu2 %v876_v29  ;;  %1130 = vmatpush.msra.mxu3 %v877_v58 }
  0xf7   : > { %3207 = vmatmul.msk.f32.vlgmr.msra.gmra.mxu0 %vm970_vm2, %v3999_v30  ;;  %3215 = vmatmul.msk.f32.vlgmr.msra.gmra.mxu1 %vm970_vm2, %v3999_v30 }
  0xf8   : > { %1090 = vmatpush.msra.mxu2 %v868_v33  ;;  %1131 = vmatpush.msra.mxu3 %v869_v54 }
  0xf9   : > { %v4009_v36 = vpop.f32.mrf.mxu2  ;;  %v4011_v49 = vpop.f32.mrf.mxu3 }
  0xfa   : > { %1091 = vmatpush.msra.mxu2 %v860_v34  ;;  %1132 = vmatpush.msra.mxu3 %v861_v35  ;;  %v4013_v38 = vpop.f32.mrf.mxu0  ;;  %v4015_v39 = vpop.f32.mrf.mxu1 }
  0xfc   : > { %1092 = vmatpush.msra.mxu2 %v852_v37  ;;  %1133 = vmatpush.msra.mxu3 %v853_v50 }
  0xfd   : > { %3223 = vmatmul.msk.f32.vlgmr.msra.gmra.mxu2 %vm970_vm2, %v3999_v30  ;;  %3231 = vmatmul.msk.f32.vlgmr.msra.gmra.mxu3 %vm970_vm2, %v3999_v30 }
  0xff   : > { %3208 = vmatmul.msk.f32.gmra.mxu0 %vm970_vm2, %v4020_v40  ;;  %3216 = vmatmul.msk.f32.gmra.mxu1 %vm970_vm2, %v4020_v40 }
 0x101   : > { %v4030_v43 = vpop.f32.mrf.mxu2  ;;  %v4032_v44 = vpop.f32.mrf.mxu3 }
 0x102   : > { %v4034_v45 = vpop.f32.mrf.mxu0  ;;  %v4036_v46 = vpop.f32.mrf.mxu1 }
 0x103   : > { %v713_v50 = vadd.f32 %v4034_v45, %v3930_v11 }
 0x105   : > { %3224 = vmatmul.msk.f32.gmra.mxu2 %vm970_vm2, %v4020_v40  ;;  %3232 = vmatmul.msk.f32.gmra.mxu3 %vm970_vm2, %v4020_v40 }
 0x107   : > { %3209 = vmatmul.msk.f32.gmra.mxu0 %vm970_vm2, %v4041_v60  ;;  %3217 = vmatmul.msk.f32.gmra.mxu1 %vm970_vm2, %v4041_v60 }
 0x109   : > { %v4051_v63 = vpop.f32.mrf.mxu2  ;;  %v4053_v0 = vpop.f32.mrf.mxu3 }
 0x10a   : > { %v715_v3 = vpop.f32.mrf.mxu0  ;;  %v756_v4 = vpop.f32.mrf.mxu1 }
 0x10b   : > { %v716_v57 = vadd.f32 %v715_v3, %v3940_v23  ;;  %v757_v29 = vadd.f32 %v756_v4, %v3940_v23  ;;  %v754_v3 = vadd.f32 %v4036_v46, %v3930_v11 }
 0x10d   : > { %3225 = vmatmul.msk.f32.gmra.mxu2 %vm970_vm2, %v4041_v60  ;;  %3233 = vmatmul.msk.f32.gmra.mxu3 %vm970_vm2, %v4041_v60  ;;  %v886_v4 = vmax.f32 %v716_v57, 0.0 }
 0x10f   : > { %3210 = vmatmul.msk.f32.gmra.mxu0 %vm970_vm2, %v4058_v9  ;;  %3218 = vmatmul.msk.f32.gmra.mxu1 %vm970_vm2, %v4058_v9 }
 0x111   : > { %v4068_v10 = vpop.f32.mrf.mxu2  ;;  %v4070_v55 = vpop.f32.mrf.mxu3 }
 0x112   : > { %v718_v56 = vpop.f32.mrf.mxu0  ;;  %v759_v7 = vpop.f32.mrf.mxu1 }
 0x113   : > { %v719_v27 = vadd.f32 %v718_v56, %v3928_v6  ;;  %v760_v28 = vadd.f32 %v759_v7, %v3928_v6  ;;  %v887_v56 = vmax.f32 %v757_v29, 0.0 }
 0x115   : > { %3226 = vmatmul.msk.f32.gmra.mxu2 %vm970_vm2, %v4058_v9  ;;  %3234 = vmatmul.msk.f32.gmra.mxu3 %vm970_vm2, %v4058_v9  ;;  %v894_v54 = vmax.f32 %v719_v27, 0.0  ;;  %v895_v34 = vmax.f32 %v760_v28, 0.0 }
 0x117   : > { %3211 = vmatmul.msk.f32.gmra.mxu0 %vm970_vm2, %v4075_v8  ;;  %3219 = vmatmul.msk.f32.gmra.mxu1 %vm970_vm2, %v4075_v8 }
 0x119   : > { %v800_v14 = vpop.f32.mrf.mxu2  ;;  %v841_v15 = vpop.f32.mrf.mxu3 }
 0x11a   : > { %v721_v16 = vpop.f32.mrf.mxu0  ;;  %v762_v51 = vpop.f32.mrf.mxu1  ;;  %v801_v45 = vadd.f32 %v800_v14, %v3928_v6  ;;  %v842_v46 = vadd.f32 %v841_v15, %v3928_v6  ;;  %v839_v14 = vadd.f32 %v4070_v55, %v3940_v23  ;;  %v704_v15 = vadd.f32 %v3952_v41, %v3966_v13 }
 0x11b   : > { %v722_v48 = vadd.f32 %v721_v16, %v3932_v12  ;;  %v763_v61 = vadd.f32 %v762_v51, %v3932_v12  ;;  %v792_v41 = vadd.f32 %v4030_v43, %v3944_v32  ;;  %v827_v43 = vadd.f32 %v3982_v20, %v3966_v13 }
 0x11c   : > { %v889_v28 = vmax.f32 %v839_v14, 0.0  ;;  %v854_v57 = vmax.f32 %v704_v15, 0.0 }
 0x11d   : > { %3227 = vmatmul.msk.f32.gmra.mxu2 %vm970_vm2, %v4075_v8  ;;  %3235 = vmatmul.msk.f32.gmra.mxu3 %vm970_vm2, %v4075_v8  ;;  %v902_v58 = vmax.f32 %v722_v48, 0.0  ;;  %v903_v53 = vmax.f32 %v763_v61, 0.0  ;;  %v896_v48 = vmax.f32 %v801_v45, 0.0 }
 0x11f   : > { %3212 = vmatmul.msk.f32.gmra.mxu0 %vm970_vm2, %v4088_v52  ;;  %3220 = vmatmul.msk.f32.gmra.mxu1 %vm970_vm2, %v4088_v52 }
 0x121   : > { %v803_v1 = vpop.f32.mrf.mxu2  ;;  %v844_v2 = vpop.f32.mrf.mxu3 }
 0x122   : > { %v724_v17 = vpop.f32.mrf.mxu0  ;;  %v765_v18 = vpop.f32.mrf.mxu1  ;;  %v804_v7 = vadd.f32 %v803_v1, %v3932_v12  ;;  %v845_v16 = vadd.f32 %v844_v2, %v3932_v12  ;;  %v4138_v12 = vld [vmem:[%s5626_s4 + $0x38] sm:$0xff]  ;;  %v878_v1 = vmax.f32 %v713_v50, 0.0  ;;  %v879_v2 = vmax.f32 %v754_v3, 0.0 }
 0x123   : > { %v725_v47 = vadd.f32 %v724_v17, %v3926_v5  ;;  %v766_v21 = vadd.f32 %v765_v18, %v3926_v5  ;;  %v751_v18 = vadd.f32 %v4015_v39, %v3944_v32  ;;  %v748_v39 = vadd.f32 %v3990_v25, %v3958_v59 }
 0x124   : > { %v905_v6 = vmax.f32 %v845_v16, 0.0 }
 0x125   : > { %v910_v62 = vmax.f32 %v725_v47, 0.0  ;;  %v911_v26 = vmax.f32 %v766_v21, 0.0  ;;  %3228 = vmatmul.msk.f32.gmra.mxu2 %vm970_vm2, %v4088_v52  ;;  %3236 = vmatmul.msk.f32.gmra.mxu3 %vm970_vm2, %v4088_v52  ;;  %v798_v47 = vadd.f32 %v4068_v10, %v3940_v23  ;;  %v904_v21 = vmax.f32 %v804_v7, 0.0 }
 0x126   : > { %v871_v25 = vmax.f32 %v751_v18, 0.0  ;;  %v745_v10 = vadd.f32 %v3954_v42, %v3966_v13  ;;  %v897_v23 = vmax.f32 %v842_v46, 0.0  ;;  %v863_v61 = vmax.f32 %v748_v39, 0.0 }
 0x127   : > { %3213 = vmatmul.msk.f32.gmra.mxu0 %vm970_vm2, %v4105_v22  ;;  %3221 = vmatmul.msk.f32.gmra.mxu1 %vm970_vm2, %v4105_v22  ;;  %v888_v27 = vmax.f32 %v798_v47, 0.0  ;;  %v833_v42 = vadd.f32 %v4032_v44, %v3944_v32 }
 0x128   : > { %1167 = vmatpush.msrb.mxu0 %v910_v62  ;;  %1208 = vmatpush.msrb.mxu1 %v911_v26  ;;  %v795_v62 = vadd.f32 %v4051_v63, %v3930_v11  ;;  %v836_v26 = vadd.f32 %v4053_v0, %v3930_v11  ;;  %v855_v29 = vmax.f32 %v745_v10, 0.0  ;;  %v789_v11 = vadd.f32 %v4009_v36, %v3958_v59 }
 0x129   : > { %v806_v31 = vpop.f32.mrf.mxu2  ;;  %v847_v33 = vpop.f32.mrf.mxu3  ;;  %v830_v63 = vadd.f32 %v4011_v49, %v3958_v59  ;;  %v872_v36 = vmax.f32 %v792_v41, 0.0  ;;  %v873_v44 = vmax.f32 %v833_v42, 0.0 }
 0x12a   : > { %v807_v35 = vadd.f32 %v806_v31, %v3926_v5  ;;  %v848_v37 = vadd.f32 %v847_v33, %v3926_v5  ;;  %1168 = vmatpush.msrb.mxu0 %v902_v58  ;;  %1209 = vmatpush.msrb.mxu1 %v903_v53  ;;  %v710_v5 = vadd.f32 %v4013_v38, %v3944_v32  ;;  %v880_v0 = vmax.f32 %v795_v62, 0.0 }
 0x12b   : > { %v707_v38 = vadd.f32 %v3988_v24, %v3958_v59  ;;  %v881_v58 = vmax.f32 %v836_v26, 0.0  ;;  %v786_v32 = vadd.f32 %v3980_v19, %v3966_v13  ;;  %v864_v59 = vmax.f32 %v789_v11, 0.0 }
 0x12c   : > { %v912_v51 = vmax.f32 %v807_v35, 0.0  ;;  %v913_v17 = vmax.f32 %v848_v37, 0.0  ;;  %1169 = vmatpush.msrb.mxu0 %v894_v54  ;;  %1210 = vmatpush.msrb.mxu1 %v895_v34  ;;  %v870_v24 = vmax.f32 %v710_v5, 0.0  ;;  %v865_v49 = vmax.f32 %v830_v63, 0.0 }
 0x12d   : > { %3229 = vmatmul.msk.f32.gmra.mxu2 %vm970_vm2, %v4105_v22  ;;  %3237 = vmatmul.msk.f32.gmra.mxu3 %vm970_vm2, %v4105_v22  ;;  %v862_v55 = vmax.f32 %v707_v38, 0.0  ;;  %v856_v53 = vmax.f32 %v786_v32, 0.0  ;;  %v857_v31 = vmax.f32 %v827_v43, 0.0  ;;  %v4274_v38 = vpop.permute.xlu1 %957 }
 0x12e   : > { %1170 = vmatpush.msrb.mxu0 %v886_v4  ;;  %1211 = vmatpush.msrb.mxu1 %v887_v56 }
 0x12f   : > { %1249 = vmatpush.msrb.mxu2 %v912_v51  ;;  %1290 = vmatpush.msrb.mxu3 %v913_v17  ;;  %v4270_v17 = vpop.permute.xlu2 %967 }
 0x130   : > { %3214 = vmatmul.msk.f32.gmra.mxu0 %vm970_vm2, %v4138_v12  ;;  %3222 = vmatmul.msk.f32.gmra.mxu1 %vm970_vm2, %v4138_v12 }
 0x131   : > { %1171 = vmatpush.msrb.mxu0 %v878_v1  ;;  %1212 = vmatpush.msrb.mxu1 %v879_v2 }
 0x132   : > { %1250 = vmatpush.msrb.mxu2 %v904_v21  ;;  %1291 = vmatpush.msrb.mxu3 %v905_v6 }
 0x133   : > { %1172 = vmatpush.msrb.mxu0 %v870_v24  ;;  %1213 = vmatpush.msrb.mxu1 %v871_v25 }
 0x134   : > { %1251 = vmatpush.msrb.mxu2 %v896_v48  ;;  %1292 = vmatpush.msrb.mxu3 %v897_v23 }
 0x135   : > { %1173 = vmatpush.msrb.mxu0 %v862_v55  ;;  %1214 = vmatpush.msrb.mxu1 %v863_v61 }
 0x136   : > { %1252 = vmatpush.msrb.mxu2 %v888_v27  ;;  %1293 = vmatpush.msrb.mxu3 %v889_v28 }
 0x137   : > { %3230 = vmatmul.msk.f32.gmra.mxu2 %vm970_vm2, %v4138_v12  ;;  %3238 = vmatmul.msk.f32.gmra.mxu3 %vm970_vm2, %v4138_v12  ;;  %v4276_v39 = vpop.permute.xlu2 %952 }
 0x138   : > { %1174 = vmatpush.msrb.mxu0 %v854_v57  ;;  %1215 = vmatpush.msrb.mxu1 %v855_v29  ;;  %v4290_v29 = vpop.permute.xlu1 %942 }
 0x139   : > { %1253 = vmatpush.msrb.mxu2 %v880_v0  ;;  %1294 = vmatpush.msrb.mxu3 %v881_v58 }
 0x13a   : > { %3239 = vmatmul.msk.f32.vlgmr.msrb.gmra.mxu0 %vm970_vm2, %v3999_v30  ;;  %3247 = vmatmul.msk.f32.vlgmr.msrb.gmra.mxu1 %vm970_vm2, %v3999_v30 }
 0x13b   : > { %1254 = vmatpush.msrb.mxu2 %v872_v36  ;;  %1295 = vmatpush.msrb.mxu3 %v873_v44 }
 0x13d   : > { %1255 = vmatpush.msrb.mxu2 %v864_v59  ;;  %1296 = vmatpush.msrb.mxu3 %v865_v49 }
 0x13f   : > { %1256 = vmatpush.msrb.mxu2 %v856_v53  ;;  %1297 = vmatpush.msrb.mxu3 %v857_v31  ;;  %v4292_v11 = vpop.permute.xlu2 %937 }
 0x140   : > { %3255 = vmatmul.msk.f32.vlgmr.msrb.gmra.mxu2 %vm970_vm2, %v3999_v30  ;;  %3263 = vmatmul.msk.f32.vlgmr.msrb.gmra.mxu3 %vm970_vm2, %v3999_v30 }
 0x142   : > { %3240 = vmatmul.msk.f32.gmra.mxu0 %vm970_vm2, %v4020_v40  ;;  %3248 = vmatmul.msk.f32.gmra.mxu1 %vm970_vm2, %v4020_v40 }
 0x148   : > { %3256 = vmatmul.msk.f32.gmra.mxu2 %vm970_vm2, %v4020_v40  ;;  %3264 = vmatmul.msk.f32.gmra.mxu3 %vm970_vm2, %v4020_v40 }
 0x14a   : > { %3241 = vmatmul.msk.f32.gmra.mxu0 %vm970_vm2, %v4041_v60  ;;  %3249 = vmatmul.msk.f32.gmra.mxu1 %vm970_vm2, %v4041_v60 }
 0x150   : > { %3257 = vmatmul.msk.f32.gmra.mxu2 %vm970_vm2, %v4041_v60  ;;  %3265 = vmatmul.msk.f32.gmra.mxu3 %vm970_vm2, %v4041_v60 }
 0x152   : > { %3242 = vmatmul.msk.f32.gmra.mxu0 %vm970_vm2, %v4058_v9  ;;  %3250 = vmatmul.msk.f32.gmra.mxu1 %vm970_vm2, %v4058_v9 }
 0x158   : > { %3258 = vmatmul.msk.f32.gmra.mxu2 %vm970_vm2, %v4058_v9  ;;  %3266 = vmatmul.msk.f32.gmra.mxu3 %vm970_vm2, %v4058_v9 }
 0x15a   : > { %3243 = vmatmul.msk.f32.gmra.mxu0 %vm970_vm2, %v4075_v8  ;;  %3251 = vmatmul.msk.f32.gmra.mxu1 %vm970_vm2, %v4075_v8 }
 0x160   : > { %3259 = vmatmul.msk.f32.gmra.mxu2 %vm970_vm2, %v4075_v8  ;;  %3267 = vmatmul.msk.f32.gmra.mxu3 %vm970_vm2, %v4075_v8 }
 0x162   : > { %3244 = vmatmul.msk.f32.gmra.mxu0 %vm970_vm2, %v4088_v52  ;;  %3252 = vmatmul.msk.f32.gmra.mxu1 %vm970_vm2, %v4088_v52 }
 0x168   : > { %3260 = vmatmul.msk.f32.gmra.mxu2 %vm970_vm2, %v4088_v52  ;;  %3268 = vmatmul.msk.f32.gmra.mxu3 %vm970_vm2, %v4088_v52 }
 0x16a   : > { %3245 = vmatmul.msk.f32.gmra.mxu0 %vm970_vm2, %v4105_v22  ;;  %3253 = vmatmul.msk.f32.gmra.mxu1 %vm970_vm2, %v4105_v22 }
 0x170   : > { %3261 = vmatmul.msk.f32.gmra.mxu2 %vm970_vm2, %v4105_v22  ;;  %3269 = vmatmul.msk.f32.gmra.mxu3 %vm970_vm2, %v4105_v22 }
 0x172   : > { %3246 = vmatmul.msk.f32.gmra.mxu0 %vm970_vm2, %v4138_v12  ;;  %3254 = vmatmul.msk.f32.gmra.mxu1 %vm970_vm2, %v4138_v12 }
 0x174   : > { %v4238_v13 = vpop.f32.mrf.mxu0  ;;  %v4240_v19 = vpop.f32.mrf.mxu1 }
 0x178   : > { %3262 = vmatmul.msk.f32.gmra.mxu2 %vm970_vm2, %v4138_v12  ;;  %3270 = vmatmul.msk.f32.gmra.mxu3 %vm970_vm2, %v4138_v12  ;;  %v4272_v12 = vpop.permute.xlu0 %962 }
 0x17c   : > { %v4246_v20 = vpop.f32.mrf.mxu0  ;;  %v4248_v30 = vpop.f32.mrf.mxu1 }
 0x17d   : > { %v1016_v44 = vadd.f32 %v4246_v20, %v4292_v11  ;;  %v1057_v59 = vadd.f32 %v4248_v30, %v4292_v11 }
 0x180   : > { %v4250_v40 = vpop.f32.mrf.mxu2  ;;  %v4252_v60 = vpop.f32.mrf.mxu3 }
 0x181   : > { %v4282_v24 = vpop.permute.xlu0 %947 }
 0x184   : > { %v1018_v9 = vpop.f32.mrf.mxu0  ;;  %v1059_v8 = vpop.f32.mrf.mxu1 }
 0x185   : > { %v1019_v63 = vadd.f32 %v1018_v9, %v4290_v29  ;;  %v1060_v0 = vadd.f32 %v1059_v8, %v4290_v29 }
 0x188   : > { %v4254_v52 = vpop.f32.mrf.mxu2  ;;  %v4256_v22 = vpop.f32.mrf.mxu3 }
 0x189   : > { %v4304_v31 = vpop.permute.xlu0 %932 }
 0x18a   : > { %v1013_v9 = vadd.f32 %v4238_v13, %v4304_v31  ;;  %v1054_v8 = vadd.f32 %v4240_v19, %v4304_v31 }
 0x18c   : > { %v1021_v33 = vpop.f32.mrf.mxu0  ;;  %v1062_v54 = vpop.f32.mrf.mxu1 }
 0x18d   : > { %v1022_v28 = vadd.f32 %v1021_v33, %v4282_v24  ;;  %v1063_v41 = vadd.f32 %v1062_v54, %v4282_v24  ;;  %v1339_v33 = vmax.f32 %v1019_v63, 0.0  ;;  %v1340_v54 = vmax.f32 %v1060_v0, 0.0 }
 0x18f   : > { %v1347_v49 = vmax.f32 %v1022_v28, 0.0  ;;  %v1348_v53 = vmax.f32 %v1063_v41, 0.0  ;;  %v1139_v28 = vadd.f32 %v4256_v22, %v4292_v11 }
 0x190   : > { %v4258_v34 = vpop.f32.mrf.mxu2  ;;  %v4260_v35 = vpop.f32.mrf.mxu3 }
 0x194   : > { %v1024_v37 = vpop.f32.mrf.mxu0  ;;  %v1065_v50 = vpop.f32.mrf.mxu1 }
 0x195   : > { %v1025_v61 = vadd.f32 %v1024_v37, %v4276_v39  ;;  %v1066_v62 = vadd.f32 %v1065_v50, %v4276_v39 }
 0x197   : > { %v1355_v58 = vmax.f32 %v1025_v61, 0.0  ;;  %v1356_v32 = vmax.f32 %v1066_v62, 0.0  ;;  %v1142_v61 = vadd.f32 %v4260_v35, %v4290_v29  ;;  %v1136_v35 = vadd.f32 %v4252_v60, %v4304_v31 }
 0x198   : > { %v4262_v3 = vpop.f32.mrf.mxu2  ;;  %v4264_v4 = vpop.f32.mrf.mxu3 }
 0x199   : > { %v1342_v63 = vmax.f32 %v1142_v61, 0.0  ;;  %v1326_v60 = vmax.f32 %v1136_v35, 0.0 }
 0x19c   : > { %v1027_v56 = vpop.f32.mrf.mxu0  ;;  %v1068_v7 = vpop.f32.mrf.mxu1 }
 0x19d   : > { %v1028_v25 = vadd.f32 %v1027_v56, %v4274_v38  ;;  %v1069_v15 = vadd.f32 %v1068_v7, %v4274_v38 }
 0x19f   : > { %v1363_v42 = vmax.f32 %v1028_v25, 0.0  ;;  %v1364_v57 = vmax.f32 %v1069_v15, 0.0 }
 0x1a0   : > { %v4266_v16 = vpop.f32.mrf.mxu2  ;;  %v4268_v51 = vpop.f32.mrf.mxu3 }
 0x1a4   : > { %v1030_v5 = vpop.f32.mrf.mxu0  ;;  %v1071_v18 = vpop.f32.mrf.mxu1 }
 0x1a5   : > { %v1031_v47 = vadd.f32 %v1030_v5, %v4272_v12  ;;  %v1072_v14 = vadd.f32 %v1071_v18, %v4272_v12  ;;  %v1331_v5 = vmax.f32 %v1016_v44, 0.0  ;;  %v1332_v18 = vmax.f32 %v1057_v59, 0.0 }
 0x1a7   : > { %v1371_v26 = vmax.f32 %v1031_v47, 0.0  ;;  %v1372_v27 = vmax.f32 %v1072_v14, 0.0  ;;  %v1323_v47 = vmax.f32 %v1013_v9, 0.0  ;;  %v1324_v14 = vmax.f32 %v1054_v8, 0.0  ;;  %v4377_v9 = vld [vmem:[%s5628_s6 + $0x10] sm:$0xff] }
 0x1a8   : > { %v1109_v45 = vpop.f32.mrf.mxu2  ;;  %v1150_v46 = vpop.f32.mrf.mxu3 }
 0x1a9   : > { %v1110_v13 = vadd.f32 %v1109_v45, %v4274_v38  ;;  %v1151_v19 = vadd.f32 %v1150_v46, %v4274_v38  ;;  %v4327_v45 = vld [vmem:[%s5628_s6] sm:$0xff] }
 0x1ab   : > { %v1365_v46 = vmax.f32 %v1110_v13, 0.0 }
 0x1ad   : > { %v1033_v1 = vpop.f32.mrf.mxu0  ;;  %v1074_v2 = vpop.f32.mrf.mxu1 }
 0x1ae   : > { %v1034_v21 = vadd.f32 %v1033_v1, %v4270_v17  ;;  %v1075_v6 = vadd.f32 %v1074_v2, %v4270_v17 }
 0x1b0   : > { %v1379_v10 = vmax.f32 %v1034_v21, 0.0  ;;  %v1380_v48 = vmax.f32 %v1075_v6, 0.0  ;;  %v1112_v23 = vpop.f32.mrf.mxu2  ;;  %v1153_v55 = vpop.f32.mrf.mxu3  ;;  %v1107_v21 = vadd.f32 %v4266_v16, %v4276_v39  ;;  %v1148_v6 = vadd.f32 %v4268_v51, %v4276_v39 }
 0x1b1   : > { %v1113_v20 = vadd.f32 %v1112_v23, %v4272_v12  ;;  %v1154_v30 = vadd.f32 %v1153_v55, %v4272_v12  ;;  %v1104_v16 = vadd.f32 %v4262_v3, %v4282_v24  ;;  %v1145_v51 = vadd.f32 %v4264_v4, %v4282_v24 }
 0x1b2   : > { %1465 = vmatpush.msra.mxu0 %v1379_v10  ;;  %1503 = vmatpush.msra.mxu1 %v1380_v48  ;;  %v1366_v23 = vmax.f32 %v1151_v19, 0.0  ;;  %v1101_v55 = vadd.f32 %v4258_v34, %v4290_v29  ;;  %v1357_v3 = vmax.f32 %v1107_v21, 0.0  ;;  %v1358_v62 = vmax.f32 %v1148_v6, 0.0 }
 0x1b3   : > { %v1373_v25 = vmax.f32 %v1113_v20, 0.0  ;;  %v1374_v15 = vmax.f32 %v1154_v30, 0.0  ;;  %v1349_v41 = vmax.f32 %v1104_v16, 0.0  ;;  %v1095_v34 = vadd.f32 %v4250_v40, %v4304_v31 }
 0x1b4   : > { %1466 = vmatpush.msra.mxu0 %v1371_v26  ;;  %1504 = vmatpush.msra.mxu1 %v1372_v27  ;;  %v1098_v27 = vadd.f32 %v4254_v52, %v4292_v11  ;;  %v4360_v52 = vld [vmem:[%s5628_s6 + $0x8] sm:$0xff] }
 0x1b5   : > { %v1325_v40 = vmax.f32 %v1095_v34, 0.0 }
 0x1b6   : > { %1467 = vmatpush.msra.mxu0 %v1363_v42  ;;  %1505 = vmatpush.msra.mxu1 %v1364_v57  ;;  %v1350_v42 = vmax.f32 %v1145_v51, 0.0  ;;  %v1341_v57 = vmax.f32 %v1101_v55, 0.0  ;;  %v1333_v22 = vmax.f32 %v1098_v27, 0.0 }
 0x1b7   : > { %v4296_v43 = vpop.f32.mrf.mxu0  ;;  %v4298_v36 = vpop.f32.mrf.mxu1 }
 0x1b8   : > { %1468 = vmatpush.msra.mxu0 %v1355_v58  ;;  %1506 = vmatpush.msra.mxu1 %v1356_v32  ;;  %v1334_v32 = vmax.f32 %v1139_v28, 0.0 }
 0x1ba   : > { %v1115_v37 = vpop.f32.mrf.mxu2  ;;  %v1156_v50 = vpop.f32.mrf.mxu3  ;;  %1469 = vmatpush.msra.mxu0 %v1347_v49  ;;  %1507 = vmatpush.msra.mxu1 %v1348_v53 }
 0x1bb   : > { %v1116_v56 = vadd.f32 %v1115_v37, %v4270_v17  ;;  %v1157_v7 = vadd.f32 %v1156_v50, %v4270_v17  ;;  %v4394_v50 = vld [vmem:[%s5628_s6 + $0x18] sm:$0xff] }
 0x1bc   : > { %1470 = vmatpush.msra.mxu0 %v1339_v33  ;;  %1508 = vmatpush.msra.mxu1 %v1340_v54 }
 0x1bd   : > { %v1381_v1 = vmax.f32 %v1116_v56, 0.0  ;;  %v1382_v2 = vmax.f32 %v1157_v7, 0.0 }
 0x1be   : > { %1471 = vmatpush.msra.mxu0 %v1331_v5  ;;  %1509 = vmatpush.msra.mxu1 %v1332_v18  ;;  %v4411_v5 = vld [vmem:[%s5628_s6 + $0x20] sm:$0xff] }
 0x1bf   : > { %v4320_v10 = vpop.f32.mrf.mxu0  ;;  %v4322_v48 = vpop.f32.mrf.mxu1  ;;  %1541 = vmatpush.msra.mxu2 %v1381_v1  ;;  %1579 = vmatpush.msra.mxu3 %v1382_v2  ;;  %v4428_v2 = vld [vmem:[%s5628_s6 + $0x28] sm:$0xff] }
 0x1c0   : > { %1472 = vmatpush.msra.mxu0 %v1323_v47  ;;  %1510 = vmatpush.msra.mxu1 %v1324_v14 }
 0x1c1   : > { %1542 = vmatpush.msra.mxu2 %v1373_v25  ;;  %1580 = vmatpush.msra.mxu3 %v1374_v15  ;;  %v4445_v25 = vld [vmem:[%s5628_s6 + $0x30] sm:$0x7f] }
 0x1c2   : > { %3271 = vmatmul.msk.f32.vlgmr.msra.gmra.mxu0 %vm970_vm2, %v4327_v45  ;;  %3278 = vmatmul.msk.f32.vlgmr.msra.gmra.mxu1 %vm970_vm2, %v4327_v45 }
 0x1c3   : > { %v4341_v26 = vpop.f32.mrf.mxu2  ;;  %v4343_v4 = vpop.f32.mrf.mxu3  ;;  %1543 = vmatpush.msra.mxu2 %v1365_v46  ;;  %1581 = vmatpush.msra.mxu3 %v1366_v23 }
 0x1c5   : > { %1544 = vmatpush.msra.mxu2 %v1357_v3  ;;  %1582 = vmatpush.msra.mxu3 %v1358_v62 }
 0x1c7   : > { %v4353_v0 = vpop.f32.mrf.mxu0  ;;  %v4355_v58 = vpop.f32.mrf.mxu1  ;;  %1545 = vmatpush.msra.mxu2 %v1349_v41  ;;  %1583 = vmatpush.msra.mxu3 %v1350_v42 }
 0x1c9   : > { %1546 = vmatpush.msra.mxu2 %v1341_v57  ;;  %1584 = vmatpush.msra.mxu3 %v1342_v63 }
 0x1ca   : > { %3272 = vmatmul.msk.f32.gmra.mxu0 %vm970_vm2, %v4360_v52  ;;  %3279 = vmatmul.msk.f32.gmra.mxu1 %vm970_vm2, %v4360_v52 }
 0x1cb   : > { %v4366_v44 = vpop.f32.mrf.mxu2  ;;  %v4368_v59 = vpop.f32.mrf.mxu3  ;;  %1547 = vmatpush.msra.mxu2 %v1333_v22  ;;  %1585 = vmatpush.msra.mxu3 %v1334_v32  ;;  %v1183_v32 = vadd.f32 %v4353_v0, %v4290_v29  ;;  %v1177_v0 = vadd.f32 %v4296_v43, %v4304_v31 }
 0x1cd   : > { %1548 = vmatpush.msra.mxu2 %v1325_v40  ;;  %1586 = vmatpush.msra.mxu3 %v1326_v60  ;;  %v1224_v40 = vadd.f32 %v4355_v58, %v4290_v29  ;;  %v1218_v58 = vadd.f32 %v4298_v36, %v4304_v31 }
 0x1ce   : > { %3285 = vmatmul.msk.f32.vlgmr.msra.gmra.mxu2 %vm970_vm2, %v4327_v45  ;;  %3292 = vmatmul.msk.f32.vlgmr.msra.gmra.mxu3 %vm970_vm2, %v4327_v45 }
 0x1cf   : > { %v1185_v49 = vpop.f32.mrf.mxu0  ;;  %v1226_v53 = vpop.f32.mrf.mxu1 }
 0x1d0   : > { %v1186_v35 = vadd.f32 %v1185_v49, %v4282_v24  ;;  %v1227_v57 = vadd.f32 %v1226_v53, %v4282_v24  ;;  %v1180_v53 = vadd.f32 %v4320_v10, %v4292_v11 }
 0x1d2   : > { %3273 = vmatmul.msk.f32.gmra.mxu0 %vm970_vm2, %v4377_v9  ;;  %3280 = vmatmul.msk.f32.gmra.mxu1 %vm970_vm2, %v4377_v9 }
 0x1d3   : > { %v4383_v8 = vpop.f32.mrf.mxu2  ;;  %v4385_v33 = vpop.f32.mrf.mxu3 }
 0x1d6   : > { %3286 = vmatmul.msk.f32.gmra.mxu2 %vm970_vm2, %v4360_v52  ;;  %3293 = vmatmul.msk.f32.gmra.mxu3 %vm970_vm2, %v4360_v52 }
 0x1d7   : > { %v1188_v54 = vpop.f32.mrf.mxu0  ;;  %v1229_v37 = vpop.f32.mrf.mxu1 }
 0x1d8   : > { %v1189_v28 = vadd.f32 %v1188_v54, %v4276_v39  ;;  %v1230_v41 = vadd.f32 %v1229_v37, %v4276_v39  ;;  %v1221_v54 = vadd.f32 %v4322_v48, %v4292_v11  ;;  %v1351_v37 = vmax.f32 %v1186_v35, 0.0 }
 0x1da   : > { %3274 = vmatmul.msk.f32.gmra.mxu0 %vm970_vm2, %v4394_v50  ;;  %3281 = vmatmul.msk.f32.gmra.mxu1 %vm970_vm2, %v4394_v50  ;;  %v1359_v60 = vmax.f32 %v1189_v28, 0.0  ;;  %v1360_v49 = vmax.f32 %v1230_v41, 0.0 }
 0x1db   : > { %v4400_v20 = vpop.f32.mrf.mxu2  ;;  %v4402_v30 = vpop.f32.mrf.mxu3 }
 0x1de   : > { %3287 = vmatmul.msk.f32.gmra.mxu2 %vm970_vm2, %v4377_v9  ;;  %3294 = vmatmul.msk.f32.gmra.mxu3 %vm970_vm2, %v4377_v9 }
 0x1df   : > { %v1191_v56 = vpop.f32.mrf.mxu0  ;;  %v1232_v7 = vpop.f32.mrf.mxu1 }
 0x1e0   : > { %v1192_v23 = vadd.f32 %v1191_v56, %v4274_v38  ;;  %v1233_v55 = vadd.f32 %v1232_v7, %v4274_v38  ;;  %v1352_v56 = vmax.f32 %v1227_v57, 0.0 }
 0x1e2   : > { %3275 = vmatmul.msk.f32.gmra.mxu0 %vm970_vm2, %v4411_v5  ;;  %3282 = vmatmul.msk.f32.gmra.mxu1 %vm970_vm2, %v4411_v5  ;;  %v1367_v63 = vmax.f32 %v1192_v23, 0.0  ;;  %v1368_v22 = vmax.f32 %v1233_v55, 0.0 }
 0x1e3   : > { %v4417_v18 = vpop.f32.mrf.mxu2  ;;  %v4419_v13 = vpop.f32.mrf.mxu3 }
 0x1e4   : > { %v1271_v55 = vadd.f32 %v4417_v18, %v4276_v39  ;;  %v1306_v18 = vadd.f32 %v4385_v33, %v4290_v29 }
 0x1e6   : > { %3288 = vmatmul.msk.f32.gmra.mxu2 %vm970_vm2, %v4394_v50  ;;  %3295 = vmatmul.msk.f32.gmra.mxu3 %vm970_vm2, %v4394_v50 }
 0x1e7   : > { %v1194_v19 = vpop.f32.mrf.mxu0  ;;  %v1235_v1 = vpop.f32.mrf.mxu1 }
 0x1e8   : > { %v1195_v15 = vadd.f32 %v1194_v19, %v4272_v12  ;;  %v1236_v16 = vadd.f32 %v1235_v1, %v4272_v12  ;;  %v1343_v1 = vmax.f32 %v1183_v32, 0.0 }
 0x1ea   : > { %3276 = vmatmul.msk.f32.gmra.mxu0 %vm970_vm2, %v4428_v2  ;;  %3283 = vmatmul.msk.f32.gmra.mxu1 %vm970_vm2, %v4428_v2  ;;  %v1375_v42 = vmax.f32 %v1195_v15, 0.0  ;;  %v1376_v34 = vmax.f32 %v1236_v16, 0.0  ;;  %v1335_v16 = vmax.f32 %v1180_v53, 0.0  ;;  %v4573_v53 = vpop.permute.xlu0 %1413 }
 0x1eb   : > { %v4434_v47 = vpop.f32.mrf.mxu2  ;;  %v4436_v14 = vpop.f32.mrf.mxu3 }
 0x1ec   : > { %v1274_v36 = vadd.f32 %v4434_v47, %v4274_v38  ;;  %v1315_v23 = vadd.f32 %v4436_v14, %v4274_v38  ;;  %v1268_v38 = vadd.f32 %v4400_v20, %v4282_v24  ;;  %v1309_v14 = vadd.f32 %v4402_v30, %v4282_v24 }
 0x1ed   : > { %v1361_v20 = vmax.f32 %v1271_v55, 0.0  ;;  %v1262_v24 = vadd.f32 %v4366_v44, %v4292_v11  ;;  %v1303_v30 = vadd.f32 %v4368_v59, %v4292_v11 }
 0x1ee   : > { %3289 = vmatmul.msk.f32.gmra.mxu2 %vm970_vm2, %v4411_v5  ;;  %3296 = vmatmul.msk.f32.gmra.mxu3 %vm970_vm2, %v4411_v5  ;;  %v1353_v28 = vmax.f32 %v1268_v38, 0.0  ;;  %v1354_v41 = vmax.f32 %v1309_v14, 0.0 }
 0x1ef   : > { %v1197_v21 = vpop.f32.mrf.mxu0  ;;  %v1238_v6 = vpop.f32.mrf.mxu1  ;;  %v1338_v35 = vmax.f32 %v1303_v30, 0.0 }
 0x1f0   : > { %v1198_v51 = vadd.f32 %v1197_v21, %v4270_v17  ;;  %v1239_v46 = vadd.f32 %v1238_v6, %v4270_v17  ;;  %v1344_v21 = vmax.f32 %v1224_v40, 0.0 }
 0x1f2   : > { %v1383_v61 = vmax.f32 %v1198_v51, 0.0  ;;  %v1384_v3 = vmax.f32 %v1239_v46, 0.0  ;;  %3277 = vmatmul.msk.f32.gmra.mxu0 %vm970_vm2, %v4445_v25  ;;  %3284 = vmatmul.msk.f32.gmra.mxu1 %vm970_vm2, %v4445_v25  ;;  %v1336_v51 = vmax.f32 %v1221_v54, 0.0 }
 0x1f3   : > { %v1276_v62 = vpop.f32.mrf.mxu2  ;;  %v1317_v27 = vpop.f32.mrf.mxu3 }
 0x1f4   : > { %1617 = vmatpush.msrb.mxu0 %v1383_v61  ;;  %1655 = vmatpush.msrb.mxu1 %v1384_v3  ;;  %v1277_v48 = vadd.f32 %v1276_v62, %v4272_v12  ;;  %v1318_v15 = vadd.f32 %v1317_v27, %v4272_v12  ;;  %v1328_v12 = vmax.f32 %v1218_v58, 0.0  ;;  %v1312_v61 = vadd.f32 %v4419_v13, %v4276_v39 }
 0x1f5   : > { %v1369_v62 = vmax.f32 %v1274_v36, 0.0  ;;  %v1370_v27 = vmax.f32 %v1315_v23, 0.0  ;;  %v1265_v39 = vadd.f32 %v4383_v8, %v4290_v29  ;;  %v1259_v8 = vadd.f32 %v4341_v26, %v4304_v31 }
 0x1f6   : > { %1618 = vmatpush.msrb.mxu0 %v1375_v42  ;;  %1656 = vmatpush.msrb.mxu1 %v1376_v34  ;;  %v1377_v47 = vmax.f32 %v1277_v48, 0.0  ;;  %v1378_v3 = vmax.f32 %v1318_v15, 0.0  ;;  %v1362_v13 = vmax.f32 %v1312_v61, 0.0  ;;  %v1300_v29 = vadd.f32 %v4343_v4, %v4304_v31 }
 0x1f7   : > { %3290 = vmatmul.msk.f32.gmra.mxu2 %vm970_vm2, %v4428_v2  ;;  %3297 = vmatmul.msk.f32.gmra.mxu3 %vm970_vm2, %v4428_v2  ;;  %v1345_v33 = vmax.f32 %v1265_v39, 0.0  ;;  %v1346_v42 = vmax.f32 %v1306_v18, 0.0  ;;  %v1337_v34 = vmax.f32 %v1262_v24, 0.0  ;;  %v1329_v11 = vmax.f32 %v1259_v8, 0.0 }
 0x1f8   : > { %1619 = vmatpush.msrb.mxu0 %v1367_v63  ;;  %1657 = vmatpush.msrb.mxu1 %v1368_v22  ;;  %v1330_v44 = vmax.f32 %v1300_v29, 0.0  ;;  %v4569_v22 = vpop.permute.xlu1 %1403 }
 0x1fa   : > { %1620 = vmatpush.msrb.mxu0 %v1359_v60  ;;  %1658 = vmatpush.msrb.mxu1 %v1360_v49  ;;  %v4571_v60 = vpop.permute.xlu2 %1408 }
 0x1fb   : > { %v1279_v7 = vpop.f32.mrf.mxu2  ;;  %v1320_v19 = vpop.f32.mrf.mxu3 }
 0x1fc   : > { %v1280_v6 = vadd.f32 %v1279_v7, %v4270_v17  ;;  %v1321_v10 = vadd.f32 %v1320_v19, %v4270_v17  ;;  %1621 = vmatpush.msrb.mxu0 %v1351_v37  ;;  %1659 = vmatpush.msrb.mxu1 %v1352_v56  ;;  %v1327_v17 = vmax.f32 %v1177_v0, 0.0 }
 0x1fe   : > { %v1385_v43 = vmax.f32 %v1280_v6, 0.0  ;;  %v1386_v46 = vmax.f32 %v1321_v10, 0.0  ;;  %1622 = vmatpush.msrb.mxu0 %v1343_v1  ;;  %1660 = vmatpush.msrb.mxu1 %v1344_v21 }
 0x1ff   : > { %3291 = vmatmul.msk.f32.gmra.mxu2 %vm970_vm2, %v4445_v25  ;;  %3298 = vmatmul.msk.f32.gmra.mxu3 %vm970_vm2, %v4445_v25 }
 0x200   : > { %1623 = vmatpush.msrb.mxu0 %v1335_v16  ;;  %1661 = vmatpush.msrb.mxu1 %v1336_v51  ;;  %v4575_v54 = vpop.permute.xlu1 %1418 }
 0x201   : > { %1693 = vmatpush.msrb.mxu2 %v1385_v43  ;;  %1731 = vmatpush.msrb.mxu3 %v1386_v46 }
 0x202   : > { %1624 = vmatpush.msrb.mxu0 %v1327_v17  ;;  %1662 = vmatpush.msrb.mxu1 %v1328_v12  ;;  %v4605_v43 = vpop.permute.xlu2 %1423  ;;  %v4615_v12 = vpop.permute.xlu0 %1428 }
 0x203   : > { %1694 = vmatpush.msrb.mxu2 %v1377_v47  ;;  %1732 = vmatpush.msrb.mxu3 %v1378_v3 }
 0x204   : > { %3299 = vmatmul.msk.f32.vlgmr.msrb.gmra.mxu0 %vm970_vm2, %v4327_v45  ;;  %3306 = vmatmul.msk.f32.vlgmr.msrb.gmra.mxu1 %vm970_vm2, %v4327_v45 }
 0x205   : > { %1695 = vmatpush.msrb.mxu2 %v1369_v62  ;;  %1733 = vmatpush.msrb.mxu3 %v1370_v27 }
 0x207   : > { %1696 = vmatpush.msrb.mxu2 %v1361_v20  ;;  %1734 = vmatpush.msrb.mxu3 %v1362_v13 }
 0x208   : > { %v4625_v38 = vpop.permute.xlu1 %1433 }
 0x209   : > { %1697 = vmatpush.msrb.mxu2 %v1353_v28  ;;  %1735 = vmatpush.msrb.mxu3 %v1354_v41 }
 0x20b   : > { %1698 = vmatpush.msrb.mxu2 %v1345_v33  ;;  %1736 = vmatpush.msrb.mxu3 %v1346_v42 }
 0x20c   : > { %3300 = vmatmul.msk.f32.gmra.mxu0 %vm970_vm2, %v4360_v52  ;;  %3307 = vmatmul.msk.f32.gmra.mxu1 %vm970_vm2, %v4360_v52 }
 0x20d   : > { %1699 = vmatpush.msrb.mxu2 %v1337_v34  ;;  %1737 = vmatpush.msrb.mxu3 %v1338_v35 }
 0x20f   : > { %1700 = vmatpush.msrb.mxu2 %v1329_v11  ;;  %1738 = vmatpush.msrb.mxu3 %v1330_v44 }
 0x210   : > { %3313 = vmatmul.msk.f32.vlgmr.msrb.gmra.mxu2 %vm970_vm2, %v4327_v45  ;;  %3320 = vmatmul.msk.f32.vlgmr.msrb.gmra.mxu3 %vm970_vm2, %v4327_v45 }
 0x214   : > { %3301 = vmatmul.msk.f32.gmra.mxu0 %vm970_vm2, %v4377_v9  ;;  %3308 = vmatmul.msk.f32.gmra.mxu1 %vm970_vm2, %v4377_v9 }
 0x218   : > { %3314 = vmatmul.msk.f32.gmra.mxu2 %vm970_vm2, %v4360_v52  ;;  %3321 = vmatmul.msk.f32.gmra.mxu3 %vm970_vm2, %v4360_v52 }
 0x21c   : > { %3302 = vmatmul.msk.f32.gmra.mxu0 %vm970_vm2, %v4394_v50  ;;  %3309 = vmatmul.msk.f32.gmra.mxu1 %vm970_vm2, %v4394_v50 }
 0x220   : > { %3315 = vmatmul.msk.f32.gmra.mxu2 %vm970_vm2, %v4377_v9  ;;  %3322 = vmatmul.msk.f32.gmra.mxu3 %vm970_vm2, %v4377_v9 }
 0x224   : > { %3303 = vmatmul.msk.f32.gmra.mxu0 %vm970_vm2, %v4411_v5  ;;  %3310 = vmatmul.msk.f32.gmra.mxu1 %vm970_vm2, %v4411_v5 }
 0x228   : > { %3316 = vmatmul.msk.f32.gmra.mxu2 %vm970_vm2, %v4394_v50  ;;  %3323 = vmatmul.msk.f32.gmra.mxu3 %vm970_vm2, %v4394_v50 }
 0x22c   : > { %3304 = vmatmul.msk.f32.gmra.mxu0 %vm970_vm2, %v4428_v2  ;;  %3311 = vmatmul.msk.f32.gmra.mxu1 %vm970_vm2, %v4428_v2 }
 0x230   : > { %3317 = vmatmul.msk.f32.gmra.mxu2 %vm970_vm2, %v4411_v5  ;;  %3324 = vmatmul.msk.f32.gmra.mxu3 %vm970_vm2, %v4411_v5 }
 0x234   : > { %3305 = vmatmul.msk.f32.gmra.mxu0 %vm970_vm2, %v4445_v25  ;;  %3312 = vmatmul.msk.f32.gmra.mxu1 %vm970_vm2, %v4445_v25 }
 0x238   : > { %3318 = vmatmul.msk.f32.gmra.mxu2 %vm970_vm2, %v4428_v2  ;;  %3325 = vmatmul.msk.f32.gmra.mxu3 %vm970_vm2, %v4428_v2 }
 0x23f   : > { %v1474_v31 = vpop.f32.mrf.mxu0  ;;  %v1512_v45 = vpop.f32.mrf.mxu1 }
 0x240   : > { %3319 = vmatmul.msk.f32.gmra.mxu2 %vm970_vm2, %v4445_v25  ;;  %3326 = vmatmul.msk.f32.gmra.mxu3 %vm970_vm2, %v4445_v25  ;;  %v4584_v0 = vadd.f32 %v1474_v31, %v4569_v22  ;;  %v4587_v58 = vadd.f32 %v1512_v45, %v4569_v22 }
 0x247   : > { %v1477_v26 = vpop.f32.mrf.mxu0  ;;  %v1515_v4 = vpop.f32.mrf.mxu1 }
 0x248   : > { %v4578_v37 = vadd.f32 %v1477_v26, %v4571_v60  ;;  %v4581_v56 = vadd.f32 %v1515_v4, %v4571_v60 }
 0x24a   : > { %v1761_v6 = vmax.f32 %v4584_v0, %v4578_v37  ;;  %v1775_v10 = vmax.f32 %v4587_v58, %v4581_v56 }
 0x24f   : > { %v1480_v52 = vpop.f32.mrf.mxu0  ;;  %v1518_v59 = vpop.f32.mrf.mxu1 }
 0x250   : > { %v4590_v7 = vadd.f32 %v1480_v52, %v4573_v53  ;;  %v4593_v19 = vadd.f32 %v1518_v59, %v4573_v53 }
 0x251   : > { %v4565_v9 = vpop.f32.mrf.mxu2  ;;  %v4567_v50 = vpop.f32.mrf.mxu3 }
 0x252   : > { %v1762_v46 = vmax.f32 %v1761_v6, %v4590_v7  ;;  %v1776_v36 = vmax.f32 %v1775_v10, %v4593_v19  ;;  %v4649_v59 = vadd.f32 %v4565_v9, %v4569_v22 }
 0x257   : > { %v1483_v5 = vpop.f32.mrf.mxu0  ;;  %v1521_v57 = vpop.f32.mrf.mxu1 }
 0x258   : > { %v4600_v48 = vadd.f32 %v1483_v5, %v4575_v54  ;;  %v4603_v15 = vadd.f32 %v1521_v57, %v4575_v54  ;;  %v4653_v5 = vadd.f32 %v4567_v50, %v4569_v22 }
 0x259   : > { %v1553_v63 = vpop.f32.mrf.mxu2  ;;  %v1591_v2 = vpop.f32.mrf.mxu3 }
 0x25a   : > { %v1763_v55 = vmax.f32 %v1762_v46, %v4600_v48  ;;  %v1777_v61 = vmax.f32 %v1776_v36, %v4603_v15  ;;  %v4642_v45 = vadd.f32 %v1553_v63, %v4571_v60  ;;  %v4645_v26 = vadd.f32 %v1591_v2, %v4571_v60 }
 0x25c   : > { %v1801_v9 = vmax.f32 %v4653_v5, %v4645_v26 }
 0x25f   : > { %v1486_v32 = vpop.f32.mrf.mxu0  ;;  %v1524_v40 = vpop.f32.mrf.mxu1 }
 0x260   : > { %v4610_v23 = vadd.f32 %v1486_v32, %v4605_v43  ;;  %v4613_v17 = vadd.f32 %v1524_v40, %v4605_v43 }
 0x261   : > { %v1556_v49 = vpop.f32.mrf.mxu2  ;;  %v1594_v25 = vpop.f32.mrf.mxu3 }
 0x262   : > { %v1764_v14 = vmax.f32 %v1763_v55, %v4610_v23  ;;  %v1778_v62 = vmax.f32 %v1777_v61, %v4613_v17  ;;  %v4656_v57 = vadd.f32 %v1556_v49, %v4573_v53  ;;  %v4659_v32 = vadd.f32 %v1594_v25, %v4573_v53 }
 0x264   : > { %v1802_v10 = vmax.f32 %v1801_v9, %v4659_v32 }
 0x267   : > { %v1489_v1 = vpop.f32.mrf.mxu0  ;;  %v1527_v21 = vpop.f32.mrf.mxu1 }
 0x268   : > { %v4620_v47 = vadd.f32 %v1489_v1, %v4615_v12  ;;  %v4623_v3 = vadd.f32 %v1527_v21, %v4615_v12  ;;  %v1788_v21 = vmax.f32 %v4649_v59, %v4642_v45 }
 0x269   : > { %v1559_v16 = vpop.f32.mrf.mxu2  ;;  %v1597_v51 = vpop.f32.mrf.mxu3 }
 0x26a   : > { %v1765_v13 = vmax.f32 %v1764_v14, %v4620_v47  ;;  %v1779_v24 = vmax.f32 %v1778_v62, %v4623_v3  ;;  %v4666_v6 = vadd.f32 %v1559_v16, %v4575_v54  ;;  %v4669_v50 = vadd.f32 %v1597_v51, %v4575_v54 }
 0x26b   : > { %v1789_v25 = vmax.f32 %v1788_v21, %v4656_v57 }
 0x26f   : > { %v1492_v27 = vpop.f32.mrf.mxu0  ;;  %v1530_v39 = vpop.f32.mrf.mxu1 }
 0x270   : > { %v4630_v18 = vadd.f32 %v1492_v27, %v4625_v38  ;;  %v4633_v20 = vadd.f32 %v1530_v39, %v4625_v38  ;;  %v1790_v27 = vmax.f32 %v1789_v25, %v4666_v6 }
 0x271   : > { %v1562_v41 = vpop.f32.mrf.mxu2  ;;  %v1600_v33 = vpop.f32.mrf.mxu3 }
 0x272   : > { %v1767_v30 = vsel %vm1766_vm3, %v4630_v18, -inf  ;;  %v1780_v28 = vsel %vm1766_vm3, %v4633_v20, -inf  ;;  %v4676_v36 = vadd.f32 %v1562_v41, %v4605_v43 }
 0x273   : > { %v1768_v8 = vmax.f32 %v1765_v13, %v1767_v30  ;;  %v1781_v29 = vmax.f32 %v1779_v24, %v1780_v28  ;;  %v4689_v13 = vadd.f32 %v1600_v33, %v4605_v43  ;;  %v1803_v24 = vmax.f32 %v1802_v10, %v4669_v50 }
 0x275   : > { %v1769_v42 = vrot.slane %v1768_v8, 4  ;;  %v1782_v34 = vrot.slane %v1781_v29, 4 }
 0x277   : > { %v1770_v35 = vmax.f32 %v1768_v8, %v1769_v42  ;;  %v1783_v11 = vmax.f32 %v1781_v29, %v1782_v34  ;;  %v1791_v29 = vmax.f32 %v1790_v27, %v4676_v36  ;;  %v1804_v42 = vmax.f32 %v1803_v24, %v4689_v13 }
 0x279   : > { %v1771_v44 = vrot.slane %v1770_v35, 2  ;;  %v1784_v31 = vrot.slane %v1783_v11, 2 }
 0x27a   : > { %v1565_v63 = vpop.f32.mrf.mxu2  ;;  %v1603_v1 = vpop.f32.mrf.mxu3 }
 0x27b   : > { %v1772_v4 = vmax.f32 %v1770_v35, %v1771_v44  ;;  %v1785_v52 = vmax.f32 %v1783_v11, %v1784_v31  ;;  %v4696_v28 = vadd.f32 %v1565_v63, %v4615_v12  ;;  %v4699_v41 = vadd.f32 %v1603_v1, %v4615_v12 }
 0x27d   : > { %v1773_v40 = vrot.slane %v1772_v4, 1  ;;  %v1786_v2 = vrot.slane %v1785_v52, 1  ;;  %v1792_v31 = vmax.f32 %v1791_v29, %v4696_v28 }
 0x27f   : > { %v1774_v49 = vmax.f32 %v1772_v4, %v1773_v40  ;;  %v4673_v46 = vmax.f32 %v1785_v52, %v1786_v2 }
 0x281   : > { %v1866_v55 = vsub.f32 %v4584_v0, %v1774_v49  ;;  %v1874_v61 = vsub.f32 %v4578_v37, %v1774_v49  ;;  %v1882_v16 = vsub.f32 %v4590_v7, %v1774_v49  ;;  %v1890_v14 = vsub.f32 %v4600_v48, %v1774_v49  ;;  %v4682_v51 = vpop.f32.mrf.mxu0  ;;  %v4684_v62 = vpop.f32.mrf.mxu1 }
 0x282   : > { %v1898_v39 = vsub.f32 %v4610_v23, %v1774_v49  ;;  %v1914_v0 = vsub.f32 %v4630_v18, %v1774_v49  ;;  %v1867_v48 = vsub.f32 %v4587_v58, %v4673_v46  ;;  %v1875_v8 = vsub.f32 %v4581_v56, %v4673_v46  ;;  %v1568_v58 = vpop.f32.mrf.mxu2  ;;  %v1606_v11 = vpop.f32.mrf.mxu3 }
 0x283   : > { %v1922_v37 = vmul.f32 1.442695, %v1866_v55  ;;  %v1938_v30 = vmul.f32 1.442695, %v1874_v61  ;;  %v1954_v7 = vmul.f32 1.442695, %v1882_v16  ;;  %v1906_v18 = vsub.f32 %v4620_v47, %v1774_v49 }
 0x284   : > { %v1970_v23 = vmul.f32 1.442695, %v1890_v14  ;;  %v1986_v33 = vmul.f32 1.442695, %v1898_v39  ;;  %v2018_v34 = vmul.f32 1.442695, %v1914_v0  ;;  %v1883_v35 = vsub.f32 %v4593_v19, %v4673_v46 }
 0x285   : > { %3409 = vpow2.f32 %v1922_v37  ;;  %v1924_v44 = vmul.f32 1.442695, %v1867_v48  ;;  %v1805_v56 = vmax.f32 %v1804_v42, %v4699_v41  ;;  %v1891_v47 = vsub.f32 %v4603_v15, %v4673_v46 }
 0x286   : > { %3411 = vpow2.f32 %v1938_v30  ;;  %v1940_v4 = vmul.f32 1.442695, %v1875_v8  ;;  %v4713_v52 = vadd.f32 %v1568_v58, %v4625_v38  ;;  %v2002_v19 = vmul.f32 1.442695, %v1906_v18 }
 0x287   : > { %3413 = vpow2.f32 %v1954_v7  ;;  %v1899_v2 = vsub.f32 %v4613_v17, %v4673_v46  ;;  %v4722_v1 = vadd.f32 %v1606_v11, %v4625_v38  ;;  %v1907_v15 = vsub.f32 %v4623_v3, %v4673_v46 }
 0x288   : > { %3415 = vpow2.f32 %v1970_v23  ;;  %v1956_v9 = vmul.f32 1.442695, %v1883_v35  ;;  %v1793_v49 = vsel %vm1766_vm3, %v4713_v52, -inf  ;;  %v1915_v10 = vsub.f32 %v4633_v20, %v4673_v46 }
 0x289   : > { %v4715_v63 = vpop.f32.mrf.mxu0  ;;  %v4717_v40 = vpop.f32.mrf.mxu1  ;;  %3417 = vpow2.f32 %v1986_v33  ;;  %v1794_v17 = vmax.f32 %v1792_v31, %v1793_v49  ;;  %v1806_v55 = vsel %vm1766_vm3, %v4722_v1, -inf  ;;  %v1972_v16 = vmul.f32 1.442695, %v1891_v47 }
 0x28a   : > { %3419 = vpow2.f32 %v2018_v34  ;;  %v1807_v3 = vmax.f32 %v1805_v56, %v1806_v55  ;;  %v1988_v20 = vmul.f32 1.442695, %v1899_v2  ;;  %v2020_v37 = vmul.f32 1.442695, %v1915_v10 }
 0x28b   : > { %v4724_v21 = vpop.eup %3409  ;;  %3421 = vpow2.f32 %v1924_v44  ;;  %v1795_v27 = vrot.slane %v1794_v17, 4  ;;  %v2004_v23 = vmul.f32 1.442695, %v1907_v15 }
 0x28c   : > { %v4730_v25 = vpop.eup %3411  ;;  %3423 = vpow2.f32 %v1940_v4  ;;  %v1808_v46 = vrot.slane %v1807_v3, 4 }
 0x28d   : > { %v2034_v61 = vadd.f32 %v4730_v25, %v4724_v21  ;;  %v4738_v14 = vpop.eup %3413  ;;  %3425 = vpow2.f32 %v2002_v19  ;;  %v1796_v30 = vmax.f32 %v1794_v17, %v1795_v27 }
 0x28e   : > { %v4740_v39 = vpop.eup %3415  ;;  %3427 = vpow2.f32 %v1956_v9  ;;  %v1809_v8 = vmax.f32 %v1807_v3, %v1808_v46 }
 0x28f   : > { %v2035_v24 = vadd.f32 %v4738_v14, %v2034_v61  ;;  %v4743_v0 = vpop.eup %3417  ;;  %3429 = vpow2.f32 %v1972_v16  ;;  %v1797_v42 = vrot.slane %v1796_v30, 2 }
 0x290   : > { %v4745_v7 = vpop.eup %3419  ;;  %3431 = vpow2.f32 %v1988_v20  ;;  %v1810_v35 = vrot.slane %v1809_v8, 2 }
 0x291   : > { %v2036_v48 = vadd.f32 %v4740_v39, %v2035_v24  ;;  %v4748_v29 = vpop.f32.mrf.mxu0  ;;  %v4750_v18 = vpop.f32.mrf.mxu1  ;;  %3433 = vpow2.f32 %v2020_v37  ;;  %v1798_v47 = vmax.f32 %v1796_v30, %v1797_v42  ;;  %v2039_v15 = vsel %vm1766_vm3, %v4745_v7, 0.0 }
 0x292   : > { %v4752_v33 = vpop.eup %3421  ;;  %3435 = vpow2.f32 %v2004_v23  ;;  %v1811_v2 = vmax.f32 %v1809_v8, %v1810_v35  ;;  %v4778_v24 = vadd.f32 %v4682_v51, %v4569_v22 }
 0x293   : > { %v4754_v58 = vpop.eup %3423  ;;  %v2037_v34 = vadd.f32 %v4743_v0, %v2036_v48  ;;  %v4757_v11 = vpop.f32.mrf.mxu2  ;;  %v1799_v49 = vrot.slane %v1798_v47, 1 }
 0x294   : > { %v4759_v44 = vpop.f32.mrf.mxu3  ;;  %v4761_v31 = vpop.eup %3425  ;;  %v2047_v56 = vadd.f32 %v4754_v58, %v4752_v33  ;;  %v1812_v55 = vrot.slane %v1811_v2, 1 }
 0x295   : > { %v4765_v4 = vpop.eup %3427  ;;  %v2038_v19 = vadd.f32 %v4761_v31, %v2037_v34  ;;  %v1800_v16 = vmax.f32 %v1798_v47, %v1799_v49 }
 0x296   : > { %v2048_v9 = vadd.f32 %v4765_v4, %v2047_v56  ;;  %v4771_v10 = vpop.eup %3429  ;;  %v4780_v20 = vmax.f32 %v1811_v2, %v1812_v55 }
 0x297   : > { %v2040_v17 = vadd.f32 %v2039_v15, %v2038_v19  ;;  %v4774_v3 = vpop.eup %3431  ;;  %v1868_v23 = vsub.f32 %v4649_v59, %v1800_v16  ;;  %v1876_v8 = vsub.f32 %v4642_v45, %v1800_v16  ;;  %v1884_v42 = vsub.f32 %v4656_v57, %v1800_v16 }
 0x298   : > { %v2049_v61 = vadd.f32 %v4771_v10, %v2048_v9  ;;  %v4786_v30 = vpop.eup %3433  ;;  %v1892_v35 = vsub.f32 %v4666_v6, %v1800_v16  ;;  %v1900_v56 = vsub.f32 %v4676_v36, %v1800_v16  ;;  %v1908_v47 = vsub.f32 %v4696_v28, %v1800_v16 }
 0x299   : > { %v2041_v27 = vrot.slane %v2040_v17, 4  ;;  %v4782_v46 = vpop.f32.mrf.mxu0  ;;  %v4784_v37 = vpop.f32.mrf.mxu1  ;;  %v1916_v59 = vsub.f32 %v4713_v52, %v1800_v16  ;;  %v1926_v45 = vmul.f32 1.442695, %v1868_v23  ;;  %v1942_v9 = vmul.f32 1.442695, %v1876_v8 }
 0x29a   : > { %v2050_v48 = vadd.f32 %v4774_v3, %v2049_v61  ;;  %v4792_v34 = vpop.eup %3435  ;;  %v2052_v49 = vsel %vm1766_vm3, %v4786_v30, 0.0  ;;  %v1974_v6 = vmul.f32 1.442695, %v1892_v35  ;;  %v1990_v36 = vmul.f32 1.442695, %v1900_v56 }
 0x29b   : > { %v2042_v51 = vadd.f32 %v2041_v27, %v2040_v17  ;;  %v4797_v19 = vpop.f32.mrf.mxu2  ;;  %v1958_v17 = vmul.f32 1.442695, %v1884_v42  ;;  %3437 = vpow2.f32 %v1926_v45  ;;  %v1869_v28 = vsub.f32 %v4653_v5, %v4780_v20 }
 0x29c   : > { %v4799_v2 = vpop.f32.mrf.mxu3  ;;  %v2051_v15 = vadd.f32 %v4792_v34, %v2050_v48  ;;  %3439 = vpow2.f32 %v1942_v9  ;;  %v2006_v27 = vmul.f32 1.442695, %v1908_v47  ;;  %v1877_v52 = vsub.f32 %v4645_v26, %v4780_v20 }
 0x29d   : > { %v2043_v57 = vrot.slane %v2042_v51, 2  ;;  %3441 = vpow2.f32 %v1958_v17  ;;  %v2022_v48 = vmul.f32 1.442695, %v1916_v59  ;;  %v4811_v23 = vadd.f32 %v4715_v63, %v4571_v60 }
 0x29e   : > { %v2053_v55 = vadd.f32 %v2052_v49, %v2051_v15  ;;  %v4815_v42 = vadd.f32 %v4684_v62, %v4569_v22  ;;  %3443 = vpow2.f32 %v1974_v6  ;;  %v1885_v5 = vsub.f32 %v4659_v32, %v4780_v20 }
 0x29f   : > { %v2044_v61 = vadd.f32 %v2043_v57, %v2042_v51  ;;  %3445 = vpow2.f32 %v1990_v36  ;;  %v1928_v56 = vmul.f32 1.442695, %v1869_v28  ;;  %v4825_v63 = vadd.f32 %v4717_v40, %v4571_v60 }
 0x2a0   : > { %v2054_v16 = vrot.slane %v2053_v55, 4  ;;  %3447 = vpow2.f32 %v2006_v27  ;;  %v1893_v62 = vsub.f32 %v4669_v50, %v4780_v20  ;;  %v1944_v15 = vmul.f32 1.442695, %v1877_v52 }
 0x2a1   : > { %v2045_v8 = vrot.slane %v2044_v61, 1  ;;  %v4819_v51 = vpop.f32.mrf.mxu0  ;;  %v4821_v35 = vpop.f32.mrf.mxu1  ;;  %3449 = vpow2.f32 %v2022_v48  ;;  %v1814_v57 = vmax.f32 %v4778_v24, %v4811_v23  ;;  %v4839_v40 = vadd.f32 %v4748_v29, %v4573_v53 }
 0x2a2   : > { %v2055_v26 = vadd.f32 %v2054_v16, %v2053_v55  ;;  %v4833_v45 = vpop.eup %3437  ;;  %v1901_v50 = vsub.f32 %v4689_v13, %v4780_v20  ;;  %v1960_v17 = vmul.f32 1.442695, %v1885_v5  ;;  %v4847_v6 = vadd.f32 %v4750_v18, %v4573_v53 }
 0x2a3   : > { %v2046_v47 = vadd.f32 %v2045_v8, %v2044_v61  ;;  %v4829_v59 = vpop.f32.mrf.mxu2  ;;  %5645 = vst [vmem:[#allocation4_spill] sm:$0xff] %v4833_v45  ;;  %v4841_v49 = vpop.eup %3439  ;;  %v1917_v29 = vsub.f32 %v4722_v1, %v4780_v20  ;;  %v1909_v13 = vsub.f32 %v4699_v41, %v4780_v20  ;;  %v1976_v27 = vmul.f32 1.442695, %v1893_v62 }
 0x2a4   : > { %v4831_v32 = vpop.f32.mrf.mxu3  ;;  %v2056_v9 = vrot.slane %v2055_v26, 2  ;;  %5646 = vst [vmem:[#allocation5_spill] sm:$0xff] %v4841_v49  ;;  %v4849_v55 = vpop.eup %3441  ;;  %v2060_v28 = vadd.f32 %v4841_v49, %v4833_v45  ;;  %v4861_v18 = vadd.f32 %v4782_v46, %v4575_v54  ;;  %v1827_v1 = vmax.f32 %v4815_v42, %v4825_v63 }
 0x2a5   : > { %3451 = vrcp.f32 %v2046_v47  ;;  %5647 = vst [vmem:[#allocation6_spill] sm:$0xff] %v4849_v55  ;;  %v4855_v61 = vpop.eup %3443  ;;  %v1815_v8 = vmax.f32 %v1814_v57, %v4839_v40  ;;  %v1992_v41 = vmul.f32 1.442695, %v1901_v50  ;;  %v4873_v20 = vadd.f32 %v4757_v11, %v4569_v22 }
 0x2a6   : > { %v2057_v36 = vadd.f32 %v2056_v9, %v2055_v26  ;;  %3453 = vpow2.f32 %v1928_v56  ;;  %5648 = vst [vmem:[#allocation7_spill] sm:$0xff] %v4855_v61  ;;  %v4863_v52 = vpop.eup %3445  ;;  %v2061_v48 = vadd.f32 %v4849_v55, %v2060_v28  ;;  %v4877_v46 = vadd.f32 %v4784_v37, %v4575_v54 }
 0x2a7   : > { %3455 = vpow2.f32 %v1944_v15  ;;  %v4869_v5 = vpop.eup %3447  ;;  %5649 = vst [vmem:[#allocation8_spill] sm:$0xff] %v4873_v20  ;;  %v2024_v57 = vmul.f32 1.442695, %v1917_v29  ;;  %v1828_v28 = vmax.f32 %v1827_v1, %v4847_v6  ;;  %v2008_v50 = vmul.f32 1.442695, %v1909_v13 }
 0x2a8   : > { %v2058_v16 = vrot.slane %v2057_v36, 1  ;;  %3457 = vpow2.f32 %v1960_v17  ;;  %v4879_v62 = vpop.eup %3449  ;;  %v2062_v9 = vadd.f32 %v4855_v61, %v2061_v48  ;;  %v4885_v11 = vadd.f32 %v4759_v44, %v4569_v22 }
 0x2a9   : > { %v1641_v26 = vpop.f32.mrf.mxu0  ;;  %v1679_v56 = vpop.f32.mrf.mxu1  ;;  %3459 = vpow2.f32 %v1976_v27  ;;  %v1816_v37 = vmax.f32 %v1815_v8, %v4861_v18  ;;  %v4895_v29 = vadd.f32 %v4797_v19, %v4571_v60  ;;  %v1829_v22 = vmax.f32 %v1828_v28, %v4877_v46 }
 0x2aa   : > { %v2059_v15 = vadd.f32 %v2058_v16, %v2057_v36  ;;  %v2063_v36 = vadd.f32 %v4863_v52, %v2062_v9  ;;  %v4904_v44 = vadd.f32 %v4819_v51, %v4605_v43  ;;  %v2065_v8 = vsel %vm1766_vm3, %v4879_v62, 0.0 }
 0x2ab   : > { %v3452_v17 = vpop.eup %3451  ;;  %v4888_v45 = vpop.f32.mrf.mxu2  ;;  %5651 = vst [vmem:[#allocation10_spill] sm:$0xff] %v4895_v29  ;;  %v4918_v51 = vadd.f32 %v1641_v26, %v4615_v12 }
 0x2ac   : > { %v4890_v49 = vpop.eup %3453  ;;  %v2146_v55 = vmul.f32 %v3452_v17, %v2046_v47  ;;  %3461 = vrcp.f32 %v2059_v15  ;;  %v4897_v27 = vpop.f32.mrf.mxu3  ;;  %v4908_v47 = vadd.f32 %v4821_v35, %v4605_v43  ;;  %v2064_v48 = vadd.f32 %v4869_v5, %v2063_v36 }
 0x2ad   : > { %5650 = vst [vmem:[#allocation9_spill] sm:$0xff] %v4890_v49  ;;  %v4899_v13 = vpop.eup %3455  ;;  %3463 = vpow2.f32 %v1992_v41  ;;  %v4921_v41 = vadd.f32 %v1679_v56, %v4615_v12  ;;  %v1817_v26 = vmax.f32 %v1816_v37, %v4904_v44  ;;  %v4938_v56 = vadd.f32 %v4829_v59, %v4573_v53 }
 0x2ae   : > { %5652 = vst [vmem:[#allocation11_spill] sm:$0xff] %v4899_v13  ;;  %v2154_v16 = vsub.f32 2.0, %v2146_v55  ;;  %3465 = vpow2.f32 %v2024_v57  ;;  %v2073_v19 = vadd.f32 %v4899_v13, %v4890_v49  ;;  %v4913_v1 = vpop.eup %3457  ;;  %v2066_v55 = vadd.f32 %v2065_v8, %v2064_v48 }
 0x2af   : > { %5653 = vst [vmem:[#allocation12_spill] sm:$0xff] %v4913_v1  ;;  %3467 = vpow2.f32 %v2008_v50  ;;  %v4928_v57 = vadd.f32 %v4799_v2, %v4571_v60  ;;  %v4930_v28 = vpop.eup %3459  ;;  %v1840_v50 = vmax.f32 %v4873_v20, %v4895_v29  ;;  %v1830_v36 = vmax.f32 %v1829_v22, %v4908_v47 }
 0x2b0   : > { %v4923_v35 = vmul.f32 %v3452_v17, %v2154_v16  ;;  %v2074_v9 = vadd.f32 %v4913_v1, %v2073_v19  ;;  %5655 = vst [vmem:[#allocation14_spill] sm:$0xff] %v4930_v28  ;;  %v2067_v2 = vrot.slane %v2066_v55, 4  ;;  %v1818_v22 = vmax.f32 %v1817_v26, %v4918_v51 }
 0x2b1   : > { %5654 = vst [vmem:[#allocation13_spill] sm:$0xff] %v4928_v57  ;;  %v1644_v17 = vpop.f32.mrf.mxu0  ;;  %v1682_v16 = vpop.f32.mrf.mxu1  ;;  %v1831_v59 = vmax.f32 %v1830_v36, %v4921_v41 }
 0x2b2   : > { %v3462_v48 = vpop.eup %3461  ;;  %v2218_v60 = vmul.f32 %v4745_v7, %v4923_v35  ;;  %v2075_v19 = vadd.f32 %v4930_v28, %v2074_v9  ;;  %v4944_v8 = vadd.f32 %v1644_v17, %v4625_v38  ;;  %v4951_v20 = vadd.f32 %v1682_v16, %v4625_v38 }
 0x2b3   : > { %v4946_v29 = vpop.eup %3463  ;;  %v2147_v37 = vmul.f32 %v3462_v48, %v2059_v15  ;;  %v2068_v13 = vadd.f32 %v2067_v2, %v2066_v55  ;;  %v1714_v17 = vpop.f32.mrf.mxu2  ;;  %v2210_v15 = vmul.f32 %v4761_v31, %v4923_v35  ;;  %v4965_v16 = vadd.f32 %v4831_v32, %v4573_v53 }
 0x2b4   : > { %5656 = vst [vmem:[#allocation15_spill] sm:$0xff] %v4946_v29  ;;  %v4953_v49 = vpop.eup %3465  ;;  %v2076_v7 = vadd.f32 %v4946_v29, %v2075_v19  ;;  %v1819_v9 = vsel %vm1766_vm3, %v4944_v8, -inf  ;;  %3327 = vmatpush.msk.msra.mxu0 %vm1766_vm3, %v2218_v60  ;;  %v1832_v55 = vsel %vm1766_vm3, %v4951_v20, -inf  ;;  %v1752_v29 = vpop.f32.mrf.mxu3  ;;  %v2202_v31 = vmul.f32 %v4743_v0, %v4923_v35 }
 0x2b5   : > { %v4961_v26 = vpop.eup %3467  ;;  %v2155_v36 = vsub.f32 2.0, %v2147_v37  ;;  %v1820_v1 = vmax.f32 %v1818_v22, %v1819_v9  ;;  %v2069_v2 = vrot.slane %v2068_v13, 2  ;;  %v1833_v28 = vmax.f32 %v1831_v59, %v1832_v55 }
 0x2b6   : > { %v2077_v19 = vadd.f32 %v4961_v26, %v2076_v7  ;;  %2269 = vmatpush.msra.mxu0 %v2210_v15  ;;  %v2078_v37 = vsel %vm1766_vm3, %v4953_v49, 0.0  ;;  %v1853_v53 = vmax.f32 %v4885_v11, %v4928_v57  ;;  %v2194_v59 = vmul.f32 %v4740_v39, %v4923_v35 }
 0x2b7   : > { %v2163_v60 = vmul.f32 %v3462_v48, %v2155_v36  ;;  %v1821_v32 = vrot.slane %v1820_v1, 4  ;;  %v2070_v22 = vadd.f32 %v2069_v2, %v2068_v13  ;;  %v1834_v61 = vrot.slane %v1833_v28, 4 }
 0x2b8   : > { %v2079_v9 = vadd.f32 %v2078_v37, %v2077_v19  ;;  %2270 = vmatpush.msra.mxu0 %v2202_v31  ;;  %v1841_v15 = vmax.f32 %v1840_v50, %v4938_v56  ;;  %v4981_v0 = vmax.f32 %v1853_v53, %v4965_v16  ;;  %v4985_v57 = vadd.f32 %v4888_v45, %v4575_v54 }
 0x2b9   : > { %v2219_v7 = vmul.f32 %v4786_v30, %v2163_v60  ;;  %v1822_v48 = vmax.f32 %v1820_v1, %v1821_v32  ;;  %v2071_v36 = vrot.slane %v2070_v22, 1  ;;  %v1835_v13 = vmax.f32 %v1833_v28, %v1834_v61 }
 0x2ba   : > { %v2080_v55 = vrot.slane %v2079_v9, 4  ;;  %2271 = vmatpush.msra.mxu0 %v2194_v59  ;;  %v4989_v2 = vadd.f32 %v4897_v27, %v4575_v54  ;;  %v2211_v30 = vmul.f32 %v4792_v34, %v2163_v60  ;;  %v2186_v1 = vmul.f32 %v4738_v14, %v4923_v35 }
 0x2bb   : > { %v1823_v39 = vrot.slane %v1822_v48, 2  ;;  %3330 = vmatpush.msk.msra.mxu1 %vm1766_vm3, %v2219_v7  ;;  %v2072_v50 = vadd.f32 %v2071_v36, %v2070_v22  ;;  %v1836_v31 = vrot.slane %v1835_v13, 2  ;;  %v4996_v45 = vadd.f32 %v1714_v17, %v4605_v43  ;;  %v1717_v14 = vpop.f32.mrf.mxu2 }
 0x2bc   : > { %v2081_v19 = vadd.f32 %v2080_v55, %v2079_v9  ;;  %v2203_v28 = vmul.f32 %v4774_v3, %v2163_v60  ;;  %2272 = vmatpush.msra.mxu0 %v2186_v1  ;;  %v2178_v54 = vmul.f32 %v4730_v25, %v4923_v35  ;;  %v1842_v34 = vmax.f32 %v1841_v15, %v4985_v57  ;;  %v1755_v7 = vpop.f32.mrf.mxu3 }
 0x2bd   : > { %v1824_v61 = vmax.f32 %v1822_v48, %v1823_v39  ;;  %2292 = vmatpush.msra.mxu1 %v2211_v30  ;;  %3469 = vrcp.f32 %v2072_v50  ;;  %v1837_v37 = vmax.f32 %v1835_v13, %v1836_v31  ;;  %v1855_v53 = vmax.f32 %v4981_v0, %v4989_v2 }
 0x2be   : > { %v2082_v27 = vrot.slane %v2081_v19, 2  ;;  %v2195_v17 = vmul.f32 %v4771_v10, %v2163_v60  ;;  %2273 = vmatpush.msra.mxu0 %v2178_v54  ;;  %v2170_v3 = vmul.f32 %v4724_v21, %v4923_v35  ;;  %v5008_v25 = vmax.f32 %v1842_v34, %v4996_v45 }
 0x2bf   : > { %v1825_v32 = vrot.slane %v1824_v61, 1  ;;  %2293 = vmatpush.msra.mxu1 %v2203_v28  ;;  %v1838_v9 = vrot.slane %v1837_v37, 1  ;;  %v5011_v59 = vadd.f32 %v1752_v29, %v4605_v43  ;;  %v5014_v0 = vadd.f32 %v1717_v14, %v4615_v12 }
 0x2c0   : > { %v2083_v22 = vadd.f32 %v2082_v27, %v2081_v19  ;;  %v2187_v10 = vmul.f32 %v4765_v4, %v2163_v60  ;;  %2274 = vmatpush.msra.mxu0 %v2170_v3  ;;  %v2179_v21 = vmul.f32 %v4754_v58, %v2163_v60  ;;  %v2171_v35 = vmul.f32 %v4752_v33, %v2163_v60 }
 0x2c1   : > { %v1826_v15 = vmax.f32 %v1824_v61, %v1825_v32  ;;  %2294 = vmatpush.msra.mxu1 %v2195_v17  ;;  %v5017_v36 = vmax.f32 %v1837_v37, %v1838_v9  ;;  %v1844_v54 = vmax.f32 %v5008_v25, %v5014_v0 }
 0x2c2   : > { %v2084_v48 = vrot.slane %v2083_v22, 1 }
 0x2c3   : > { %v1870_v55 = vsub.f32 %v4778_v24, %v1826_v15  ;;  %v1878_v43 = vsub.f32 %v4811_v23, %v1826_v15  ;;  %v1886_v29 = vsub.f32 %v4839_v40, %v1826_v15  ;;  %v1894_v13 = vsub.f32 %v4861_v18, %v1826_v15  ;;  %2295 = vmatpush.msra.mxu1 %v2187_v10  ;;  %v3470_v39 = vpop.eup %3469  ;;  %v1720_v37 = vpop.f32.mrf.mxu2 }
 0x2c4   : > { %v2085_v30 = vadd.f32 %v2084_v48, %v2083_v22  ;;  %v1902_v4 = vsub.f32 %v4904_v44, %v1826_v15  ;;  %v1910_v1 = vsub.f32 %v4918_v51, %v1826_v15  ;;  %v1918_v19 = vsub.f32 %v4944_v8, %v1826_v15 }
 0x2c5   : > { %v2148_v58 = vmul.f32 %v3470_v39, %v2072_v50  ;;  %v1930_v31 = vmul.f32 1.442695, %v1870_v55  ;;  %v1946_v33 = vmul.f32 1.442695, %v1878_v43  ;;  %v1962_v60 = vmul.f32 1.442695, %v1886_v29  ;;  %2296 = vmatpush.msra.mxu1 %v2179_v21 }
 0x2c6   : > { %3471 = vrcp.f32 %v2085_v30  ;;  %v1978_v24 = vmul.f32 1.442695, %v1894_v13  ;;  %v1856_v23 = vmax.f32 %v1855_v53, %v5011_v59  ;;  %v5030_v40 = vadd.f32 %v1755_v7, %v4615_v12 }
 0x2c7   : > { %v2156_v18 = vsub.f32 2.0, %v2148_v58  ;;  %3473 = vpow2.f32 %v1930_v31  ;;  %v1994_v61 = vmul.f32 1.442695, %v1902_v4  ;;  %v1871_v44 = vsub.f32 %v4815_v42, %v5017_v36  ;;  %2297 = vmatpush.msra.mxu1 %v2171_v35 }
 0x2c8   : > { %3475 = vpow2.f32 %v1946_v33  ;;  %v2010_v51 = vmul.f32 1.442695, %v1910_v1  ;;  %v1879_v8 = vsub.f32 %v4825_v63, %v5017_v36  ;;  %v1887_v50 = vsub.f32 %v4847_v6, %v5017_v36  ;;  %v1758_v63 = vpop.f32.mrf.mxu3 }
 0x2c9   : > { %v5038_v28 = vmul.f32 %v3470_v39, %v2156_v18  ;;  %3477 = vpow2.f32 %v1962_v60  ;;  %v2026_v12 = vmul.f32 1.442695, %v1918_v19  ;;  %v1895_v42 = vsub.f32 %v4877_v46, %v5017_v36  ;;  %v5657_v19 = vld [vmem:[#allocation7_spill] sm:$0xff]  ;;  %v5658_v18 = vld [vmem:[#allocation6_spill] sm:$0xff] }
 0x2ca   : > { %3479 = vpow2.f32 %v1978_v24  ;;  %v1903_v27 = vsub.f32 %v4908_v47, %v5017_v36  ;;  %v1932_v34 = vmul.f32 1.442695, %v1871_v44  ;;  %v1948_v14 = vmul.f32 1.442695, %v1879_v8 }
 0x2cb   : > { %v2220_v6 = vmul.f32 %v4879_v62, %v5038_v28  ;;  %3481 = vpow2.f32 %v1994_v61  ;;  %v1857_v53 = vmax.f32 %v1856_v23, %v5030_v40  ;;  %v1911_v17 = vsub.f32 %v4921_v41, %v5017_v36 }
 0x2cc   : > { %v3472_v32 = vpop.eup %3471  ;;  %3483 = vpow2.f32 %v2010_v51  ;;  %v1919_v46 = vsub.f32 %v4951_v20, %v5017_v36  ;;  %v1964_v3 = vmul.f32 1.442695, %v1887_v50  ;;  %v5056_v9 = vadd.f32 %v1720_v37, %v4625_v38 }
 0x2cd   : > { %v5053_v47 = vpop.eup %3473  ;;  %v2149_v22 = vmul.f32 %v3472_v32, %v2085_v30  ;;  %3485 = vpow2.f32 %v2026_v12  ;;  %v5059_v62 = vadd.f32 %v1758_v63, %v4625_v38  ;;  %3333 = vmatpush.msk.msra.mxu2 %vm1766_vm3, %v2220_v6  ;;  %v1980_v41 = vmul.f32 1.442695, %v1895_v42  ;;  %v5660_v63 = vld [vmem:[#allocation15_spill] sm:$0xff] }
 0x2ce   : > { %v5062_v25 = vpop.eup %3475  ;;  %3487 = vpow2.f32 %v1932_v34  ;;  %v1996_v7 = vmul.f32 1.442695, %v1903_v27  ;;  %v2212_v20 = vmul.f32 %v4869_v5, %v5038_v28  ;;  %v1845_v38 = vsel %vm1766_vm3, %v5056_v9, -inf }
 0x2cf   : > { %v5066_v15 = vpop.eup %3477  ;;  %v2157_v10 = vsub.f32 2.0, %v2149_v22  ;;  %v2086_v48 = vadd.f32 %v5062_v25, %v5053_v47  ;;  %3489 = vpow2.f32 %v1948_v14  ;;  %v2028_v21 = vmul.f32 1.442695, %v1919_v46 }
 0x2d0   : > { %v5072_v36 = vpop.eup %3479  ;;  %v1846_v35 = vmax.f32 %v1844_v54, %v1845_v38  ;;  %v1858_v55 = vsel %vm1766_vm3, %v5059_v62, -inf  ;;  %2315 = vmatpush.msra.mxu2 %v2212_v20  ;;  %v2204_v5 = vmul.f32 %v4863_v52, %v5038_v28  ;;  %3491 = vpow2.f32 %v1964_v3  ;;  %v5659_v54 = vld [vmem:[#allocation5_spill] sm:$0xff] }
 0x2d1   : > { %v5078_v43 = vpop.eup %3481  ;;  %v2165_v29 = vmul.f32 %v3472_v32, %v2157_v10  ;;  %v2087_v13 = vadd.f32 %v5066_v15, %v2086_v48  ;;  %v1859_v39 = vmax.f32 %v1857_v53, %v1858_v55  ;;  %v2012_v4 = vmul.f32 1.442695, %v1911_v17  ;;  %v5661_v32 = vld [vmem:[#allocation4_spill] sm:$0xff] }
 0x2d2   : > { %v5081_v30 = vpop.eup %3483  ;;  %v1847_v1 = vrot.slane %v1846_v35, 4  ;;  %2316 = vmatpush.msra.mxu2 %v2204_v5  ;;  %v2196_v58 = vmul.f32 %v5657_v19, %v5038_v28  ;;  %3493 = vpow2.f32 %v1980_v41  ;;  %v2188_v61 = vmul.f32 %v5658_v18, %v5038_v28  ;;  %v5662_v41 = vld [vmem:[#allocation14_spill] sm:$0xff]  ;;  %v5663_v55 = vld [vmem:[#allocation12_spill] sm:$0xff]  ;;  %v5664_v19 = vld [vmem:[#allocation11_spill] sm:$0xff] }
 0x2d3   : > { %v5085_v31 = vpop.eup %3485  ;;  %v2221_v33 = vmul.f32 %v4953_v49, %v2165_v29  ;;  %v2088_v52 = vadd.f32 %v5072_v36, %v2087_v13  ;;  %v1860_v60 = vrot.slane %v1859_v39, 4  ;;  %3495 = vpow2.f32 %v2028_v21 }
 0x2d4   : > { %v5089_v24 = vpop.eup %3487  ;;  %v1848_v23 = vmax.f32 %v1846_v35, %v1847_v1  ;;  %2317 = vmatpush.msra.mxu2 %v2196_v58  ;;  %3497 = vpow2.f32 %v1996_v7  ;;  %v2213_v49 = vmul.f32 %v4961_v26, %v2165_v29  ;;  %v2180_v42 = vmul.f32 %v5659_v54, %v5038_v28 }
 0x2d5   : > { %v5093_v44 = vpop.eup %3489  ;;  %v2089_v51 = vadd.f32 %v5078_v43, %v2088_v52  ;;  %v1861_v8 = vmax.f32 %v1859_v39, %v1860_v60  ;;  %3336 = vmatpush.msk.msra.mxu3 %vm1766_vm3, %v2221_v33  ;;  %3499 = vpow2.f32 %v2012_v4  ;;  %v2205_v6 = vmul.f32 %v5660_v63, %v2165_v29  ;;  %v5665_v33 = vld [vmem:[#allocation9_spill] sm:$0xff] }
 0x2d6   : > { %v2099_v50 = vadd.f32 %v5093_v44, %v5089_v24  ;;  %v1849_v12 = vrot.slane %v1848_v23, 2  ;;  %2318 = vmatpush.msra.mxu2 %v2188_v61  ;;  %v5102_v27 = vpop.eup %3491  ;;  %v2091_v26 = vsel %vm1766_vm3, %v5085_v31, 0.0  ;;  %v2172_v17 = vmul.f32 %v5661_v32, %v5038_v28  ;;  %v5667_v61 = vld [vmem:[#allocation10_spill] sm:$0xff] }
 0x2d7   : > { %v2090_v34 = vadd.f32 %v5081_v30, %v2089_v51  ;;  %v1862_v37 = vrot.slane %v1861_v8, 2  ;;  %2338 = vmatpush.msra.mxu3 %v2213_v49  ;;  %v2197_v7 = vmul.f32 %v5662_v41, %v2165_v29  ;;  %v2189_v28 = vmul.f32 %v5663_v55, %v2165_v29 }
 0x2d8   : > { %v2100_v14 = vadd.f32 %v5102_v27, %v2099_v50  ;;  %v1850_v53 = vmax.f32 %v1848_v23, %v1849_v12  ;;  %2319 = vmatpush.msra.mxu2 %v2180_v42  ;;  %v5111_v46 = vpop.eup %3493  ;;  %v2181_v58 = vmul.f32 %v5664_v19, %v2165_v29  ;;  %v2173_v52 = vmul.f32 %v5665_v33, %v2165_v29  ;;  %v5666_v23 = vld [vmem:[#allocation8_spill] sm:$0xff] }
 0x2d9   : > { %v2092_v3 = vadd.f32 %v2091_v26, %v2090_v34  ;;  %v1863_v22 = vmax.f32 %v1861_v8, %v1862_v37  ;;  %2339 = vmatpush.msra.mxu3 %v2205_v6  ;;  %v5114_v20 = vpop.eup %3495 }
 0x2da   : > { %v2101_v10 = vadd.f32 %v5111_v46, %v2100_v14  ;;  %v1851_v48 = vrot.slane %v1850_v53, 1  ;;  %2320 = vmatpush.msra.mxu2 %v2172_v17  ;;  %v5117_v38 = vpop.eup %3497  ;;  %v2104_v1 = vsel %vm1766_vm3, %v5114_v20, 0.0 }
 0x2db   : > { %v2093_v21 = vrot.slane %v2092_v3, 4  ;;  %v1864_v35 = vrot.slane %v1863_v22, 1  ;;  %2340 = vmatpush.msra.mxu3 %v2197_v7  ;;  %v5121_v39 = vpop.eup %3499 }
 0x2dc   : > { %v2102_v5 = vadd.f32 %v5117_v38, %v2101_v10  ;;  %v1852_v13 = vmax.f32 %v1850_v53, %v1851_v48 }
 0x2dd   : > { %v2094_v4 = vadd.f32 %v2093_v21, %v2092_v3  ;;  %2341 = vmatpush.msra.mxu3 %v2189_v28  ;;  %v1865_v54 = vmax.f32 %v1863_v22, %v1864_v35 }
 0x2de   : > { %v2103_v60 = vadd.f32 %v5121_v39, %v2102_v5  ;;  %v1872_v18 = vsub.f32 %v5666_v23, %v1852_v13  ;;  %v1880_v51 = vsub.f32 %v5667_v61, %v1852_v13  ;;  %v1888_v8 = vsub.f32 %v4938_v56, %v1852_v13 }
 0x2df   : > { %v2095_v49 = vrot.slane %v2094_v4, 2  ;;  %v1896_v50 = vsub.f32 %v4985_v57, %v1852_v13  ;;  %v1904_v12 = vsub.f32 %v4996_v45, %v1852_v13  ;;  %2342 = vmatpush.msra.mxu3 %v2181_v58  ;;  %v1912_v34 = vsub.f32 %v5014_v0, %v1852_v13  ;;  %v5668_v45 = vld [vmem:[#allocation13_spill] sm:$0xff] }
 0x2e0   : > { %v2105_v42 = vadd.f32 %v2104_v1, %v2103_v60  ;;  %v1934_v37 = vmul.f32 1.442695, %v1872_v18  ;;  %v1950_v29 = vmul.f32 1.442695, %v1880_v51  ;;  %v1920_v6 = vsub.f32 %v5056_v9, %v1852_v13 }
 0x2e1   : > { %v2096_v63 = vadd.f32 %v2095_v49, %v2094_v4  ;;  %v1966_v26 = vmul.f32 1.442695, %v1888_v8  ;;  %v1982_v14 = vmul.f32 1.442695, %v1896_v50  ;;  %2343 = vmatpush.msra.mxu3 %v2173_v52  ;;  %v1998_v56 = vmul.f32 1.442695, %v1904_v12 }
 0x2e2   : > { %v2106_v53 = vrot.slane %v2105_v42, 4  ;;  %3501 = vpow2.f32 %v1934_v37  ;;  %v1873_v57 = vsub.f32 %v4885_v11, %v1865_v54  ;;  %v1881_v17 = vsub.f32 %v5668_v45, %v1865_v54 }
 0x2e3   : > { %v2097_v32 = vrot.slane %v2096_v63, 1  ;;  %3503 = vpow2.f32 %v1950_v29  ;;  %v2014_v0 = vmul.f32 1.442695, %v1912_v34  ;;  %v2030_v41 = vmul.f32 1.442695, %v1920_v6 }
 0x2e4   : > { %v2107_v3 = vadd.f32 %v2106_v53, %v2105_v42  ;;  %3505 = vpow2.f32 %v1966_v26  ;;  %v1889_v9 = vsub.f32 %v4965_v16, %v1865_v54  ;;  %v1936_v10 = vmul.f32 1.442695, %v1873_v57 }
 0x2e5   : > { %v2098_v22 = vadd.f32 %v2097_v32, %v2096_v63  ;;  %3507 = vpow2.f32 %v1982_v14  ;;  %v1897_v48 = vsub.f32 %v4989_v2, %v1865_v54  ;;  %v1952_v21 = vmul.f32 1.442695, %v1881_v17 }
 0x2e6   : > { %v2108_v7 = vrot.slane %v2107_v3, 2  ;;  %3509 = vpow2.f32 %v1998_v56  ;;  %v1905_v28 = vsub.f32 %v5011_v59, %v1865_v54  ;;  %v1968_v5 = vmul.f32 1.442695, %v1889_v9 }
 0x2e7   : > { %3511 = vrcp.f32 %v2098_v22  ;;  %v1921_v1 = vsub.f32 %v5059_v62, %v1865_v54  ;;  %v1913_v19 = vsub.f32 %v5030_v40, %v1865_v54  ;;  %v1984_v58 = vmul.f32 1.442695, %v1897_v48 }
 0x2e8   : > { %v5139_v35 = vpop.eup %3501  ;;  %v2109_v11 = vadd.f32 %v2108_v7, %v2107_v3  ;;  %3513 = vpow2.f32 %v2014_v0  ;;  %v2000_v23 = vmul.f32 1.442695, %v1905_v28 }
 0x2e9   : > { %v5141_v55 = vpop.eup %3503  ;;  %3515 = vpow2.f32 %v2030_v41  ;;  %v2032_v51 = vmul.f32 1.442695, %v1921_v1  ;;  %v2016_v40 = vmul.f32 1.442695, %v1913_v19 }
 0x2ea   : > { %v5144_v13 = vpop.eup %3505  ;;  %v2110_v16 = vrot.slane %v2109_v11, 1  ;;  %v2112_v4 = vadd.f32 %v5141_v55, %v5139_v35  ;;  %3517 = vpow2.f32 %v1936_v10 }
 0x2eb   : > { %v5149_v2 = vpop.eup %3507  ;;  %3519 = vpow2.f32 %v1952_v21 }
 0x2ec   : > { %v5152_v33 = vpop.eup %3509  ;;  %v2111_v52 = vadd.f32 %v2110_v16, %v2109_v11  ;;  %v2113_v59 = vadd.f32 %v5144_v13, %v2112_v4  ;;  %3521 = vpow2.f32 %v1968_v5 }
 0x2ed   : > { %v3512_v60 = vpop.eup %3511 }
 0x2ee   : > { %v5155_v18 = vpop.eup %3513  ;;  %v2150_v61 = vmul.f32 %v3512_v60, %v2098_v22  ;;  %3523 = vrcp.f32 %v2111_v52  ;;  %v2114_v62 = vadd.f32 %v5149_v2, %v2113_v59 }
 0x2ef   : > { %v5158_v8 = vpop.eup %3515  ;;  %3525 = vpow2.f32 %v1984_v58 }
 0x2f0   : > { %v5160_v49 = vpop.eup %3517  ;;  %v2158_v50 = vsub.f32 2.0, %v2150_v61  ;;  %v2115_v12 = vadd.f32 %v5152_v33, %v2114_v62  ;;  %3527 = vpow2.f32 %v2000_v23  ;;  %v2117_v63 = vsel %vm1766_vm3, %v5158_v8, 0.0 }
 0x2f1   : > { %v5163_v54 = vpop.eup %3519  ;;  %3529 = vpow2.f32 %v2032_v51 }
 0x2f2   : > { %v2166_v42 = vmul.f32 %v3512_v60, %v2158_v50  ;;  %v2116_v34 = vadd.f32 %v5155_v18, %v2115_v12  ;;  %v2125_v37 = vadd.f32 %v5163_v54, %v5160_v49  ;;  %v5168_v29 = vpop.eup %3521  ;;  %3531 = vpow2.f32 %v2016_v40 }
 0x2f4   : > { %v3524_v6 = vpop.eup %3523  ;;  %v2222_v26 = vmul.f32 %v5085_v31, %v2166_v42  ;;  %v2118_v14 = vadd.f32 %v2117_v63, %v2116_v34  ;;  %v2126_v53 = vadd.f32 %v5168_v29, %v2125_v37  ;;  %v2214_v17 = vmul.f32 %v5081_v30, %v2166_v42  ;;  %v5184_v31 = vld [vmem:[%s5630_s8] sm:$0xff] }
 0x2f5   : > { %v5174_v56 = vpop.eup %3525  ;;  %v2151_v32 = vmul.f32 %v3524_v6, %v2111_v52  ;;  %v2206_v7 = vmul.f32 %v5078_v43, %v2166_v42  ;;  %3337 = vmatmul.msk.f32.vlgmr.msra.gmra.mxu3 %vm2228_vm4, %v5184_v31  ;;  %3334 = vmatmul.msk.f32.vlgmr.msra.gmra.mxu2 %vm2228_vm4, %v5184_v31  ;;  %v2198_v11 = vmul.f32 %v5072_v36, %v2166_v42 }
 0x2f6   : > { %v2119_v57 = vrot.slane %v2118_v14, 4  ;;  %v2127_v45 = vadd.f32 %v5174_v56, %v2126_v53  ;;  %3339 = vmatpush.msk.msrb.mxu0 %vm1766_vm3, %v2222_v26  ;;  %v5179_v3 = vpop.eup %3527  ;;  %3331 = vmatmul.msk.f32.vlgmr.msra.gmra.mxu1 %vm2228_vm4, %v5184_v31  ;;  %v2190_v4 = vmul.f32 %v5066_v15, %v2166_v42  ;;  %v2182_v36 = vmul.f32 %v5062_v25, %v2166_v42 }
 0x2f7   : > { %v2159_v0 = vsub.f32 2.0, %v2151_v32  ;;  %v5186_v22 = vpop.eup %3529  ;;  %3328 = vmatmul.msk.f32.vlgmr.msra.gmra.mxu0 %vm2228_vm4, %v5184_v31  ;;  %v2174_v15 = vmul.f32 %v5053_v47, %v2166_v42 }
 0x2f8   : > { %v2120_v41 = vadd.f32 %v2119_v57, %v2118_v14  ;;  %v2128_v9 = vadd.f32 %v5179_v3, %v2127_v45  ;;  %2361 = vmatpush.msrb.mxu0 %v2214_v17  ;;  %v5192_v30 = vpop.eup %3531  ;;  %v2130_v28 = vsel %vm1766_vm3, %v5186_v22, 0.0  ;;  %v3356_v17 = vld [vmem:[%s5263_s18 + $0x30] sm:$0xff] }
 0x2f9   : > { %v2167_v10 = vmul.f32 %v3524_v6, %v2159_v0  ;;  %v2660_v0 = vmul.f32 %v3356_v17, %v3356_v17 }
 0x2fa   : > { %v2121_v48 = vrot.slane %v2120_v41, 2  ;;  %v2129_v21 = vadd.f32 %v5192_v30, %v2128_v9  ;;  %2362 = vmatpush.msrb.mxu0 %v2206_v7 }
 0x2fb   : > { %v2223_v43 = vmul.f32 %v5114_v20, %v2167_v10  ;;  %v2215_v1 = vmul.f32 %v5121_v39, %v2167_v10  ;;  %v5212_v20 = vld [vmem:[%s5630_s8 + $0x8] sm:$0xf]  ;;  %v2207_v52 = vmul.f32 %v5117_v38, %v2167_v10  ;;  %v2199_v39 = vmul.f32 %v5111_v46, %v2167_v10 }
 0x2fc   : > { %v2122_v5 = vadd.f32 %v2121_v48, %v2120_v41  ;;  %v2131_v16 = vadd.f32 %v2130_v28, %v2129_v21  ;;  %2363 = vmatpush.msrb.mxu0 %v2198_v11  ;;  %v2191_v38 = vmul.f32 %v5102_v27, %v2167_v10  ;;  %v2183_v23 = vmul.f32 %v5093_v44, %v2167_v10 }
 0x2fd   : > { %3342 = vmatpush.msk.msrb.mxu1 %vm1766_vm3, %v2223_v43  ;;  %3338 = vmatmul.msk.f32.gmra.mxu3 %vm2228_vm4, %v5212_v20  ;;  %v2175_v61 = vmul.f32 %v5089_v24, %v2167_v10  ;;  %v3580_v11 = vmov 1983009808  }
 0x2fe   : > { %v2123_v19 = vrot.slane %v2122_v5, 1  ;;  %v2132_v58 = vrot.slane %v2131_v16, 4  ;;  %2364 = vmatpush.msrb.mxu0 %v2190_v4  ;;  %3335 = vmatmul.msk.f32.gmra.mxu2 %vm2228_vm4, %v5212_v20  ;;  %v2449_v43 = vunpack.c.l.s4 %v3580_v11 }
 0x2ff   : > { %2384 = vmatpush.msrb.mxu1 %v2215_v1  ;;  %3329 = vmatmul.msk.f32.gmra.mxu0 %vm2228_vm4, %v5212_v20 }
 0x300   : > { %v2124_v59 = vadd.f32 %v2123_v19, %v2122_v5  ;;  %v2133_v60 = vadd.f32 %v2132_v58, %v2131_v16  ;;  %2365 = vmatpush.msrb.mxu0 %v2182_v36  ;;  %3332 = vmatmul.msk.f32.gmra.mxu1 %vm2228_vm4, %v5212_v20  ;;  %v5273_v58 = vunpack.c.0.s8 %v2449_v43 }
 0x301   : > { %2385 = vmatpush.msrb.mxu1 %v2207_v52 }
 0x302   : > { %3533 = vrcp.f32 %v2124_v59  ;;  %v2134_v25 = vrot.slane %v2133_v60, 2  ;;  %2366 = vmatpush.msrb.mxu0 %v2174_v15 }
 0x303   : > { %2386 = vmatpush.msrb.mxu1 %v2199_v39 }
 0x304   : > { %v2135_v47 = vadd.f32 %v2134_v25, %v2133_v60 }
 0x305   : > { %2387 = vmatpush.msrb.mxu1 %v2191_v38 }
 0x306   : > { %v2136_v46 = vrot.slane %v2135_v47, 1 }
 0x307   : > { %2388 = vmatpush.msrb.mxu1 %v2183_v23  ;;  %3340 = vmatmul.msk.f32.vlgmr.msrb.gmra.mxu0 %vm2228_vm4, %v5184_v31 }
 0x308   : > { %v3534_v62 = vpop.eup %3533  ;;  %v2137_v51 = vadd.f32 %v2136_v46, %v2135_v47 }
 0x309   : > { %v2152_v40 = vmul.f32 %v3534_v62, %v2124_v59  ;;  %2389 = vmatpush.msrb.mxu1 %v2175_v61 }
 0x30a   : > { %3535 = vrcp.f32 %v2137_v51  ;;  %3343 = vmatmul.msk.f32.vlgmr.msrb.gmra.mxu1 %vm2228_vm4, %v5184_v31 }
 0x30b   : > { %v2160_v27 = vsub.f32 2.0, %v2152_v40 }
 0x30d   : > { %v2168_v50 = vmul.f32 %v3534_v62, %v2160_v27 }
 0x30f   : > { %v2224_v12 = vmul.f32 %v5158_v8, %v2168_v50  ;;  %v2216_v24 = vmul.f32 %v5155_v18, %v2168_v50  ;;  %v2208_v37 = vmul.f32 %v5152_v33, %v2168_v50  ;;  %3341 = vmatmul.msk.f32.gmra.mxu0 %vm2228_vm4, %v5212_v20  ;;  %v2200_v8 = vmul.f32 %v5149_v2, %v2168_v50 }
 0x310   : > { %v3536_v44 = vpop.eup %3535  ;;  %v2192_v26 = vmul.f32 %v5144_v13, %v2168_v50  ;;  %v2184_v14 = vmul.f32 %v5141_v55, %v2168_v50  ;;  %v2176_v53 = vmul.f32 %v5139_v35, %v2168_v50  ;;  %v5266_v35 = vld [vmem:[%s5263_s18 + $0x18] sm:$0xff] }
 0x311   : > { %v2153_v42 = vmul.f32 %v3536_v44, %v2137_v51  ;;  %3345 = vmatpush.msk.msrb.mxu2 %vm1766_vm3, %v2224_v12  ;;  %v3581_v51 = vmov 1934713408  }
 0x312   : > { %3344 = vmatmul.msk.f32.gmra.mxu1 %vm2228_vm4, %v5212_v20  ;;  %v2497_v40 = vunpack.c.l.s4 %v3581_v51 }
 0x313   : > { %v2161_v34 = vsub.f32 2.0, %v2153_v42  ;;  %2407 = vmatpush.msrb.mxu2 %v2216_v24 }
 0x315   : > { %v2169_v63 = vmul.f32 %v3536_v44, %v2161_v34  ;;  %2408 = vmatpush.msrb.mxu2 %v2208_v37 }
 0x317   : > { %v2225_v6 = vmul.f32 %v5186_v22, %v2169_v63  ;;  %2409 = vmatpush.msrb.mxu2 %v2200_v8  ;;  %v2217_v18 = vmul.f32 %v5192_v30, %v2169_v63  ;;  %v2209_v33 = vmul.f32 %v5179_v3, %v2169_v63  ;;  %v2201_v2 = vmul.f32 %v5174_v56, %v2169_v63  ;;  %v3355_v56 = vld [vmem:[%s5263_s18 + $0x28] sm:$0xff] }
 0x318   : > { %v2193_v13 = vmul.f32 %v5168_v29, %v2169_v63  ;;  %v2185_v55 = vmul.f32 %v5163_v54, %v2169_v63  ;;  %v2177_v32 = vmul.f32 %v5160_v49, %v2169_v63  ;;  %v3354_v49 = vld [vmem:[%s5263_s18 + $0x20] sm:$0xff]  ;;  %v2655_v54 = vmul.f32 %v5266_v35, %v5266_v35 }
 0x319   : > { %3348 = vmatpush.msk.msrb.mxu3 %vm1766_vm3, %v2225_v6  ;;  %2410 = vmatpush.msrb.mxu2 %v2192_v26  ;;  %v2656_v29 = vmul.f32 %v3354_v49, %v3354_v49  ;;  %v2658_v45 = vmul.f32 %v3355_v56, %v3355_v56  ;;  %v5283_v8 = vunpack.c.0.s8 %v2497_v40 }
 0x31b   : > { %2430 = vmatpush.msrb.mxu3 %v2217_v18  ;;  %2411 = vmatpush.msrb.mxu2 %v2184_v14  ;;  %v2657_v57 = vadd.f32 %v2656_v29, %v2655_v54 }
 0x31d   : > { %2431 = vmatpush.msrb.mxu3 %v2209_v33  ;;  %2412 = vmatpush.msrb.mxu2 %v2176_v53  ;;  %v2659_v3 = vadd.f32 %v2658_v45, %v2657_v57 }
 0x31e   : > { %3346 = vmatmul.msk.f32.vlgmr.msrb.gmra.mxu2 %vm2228_vm4, %v5184_v31 }
 0x31f   : > { %2432 = vmatpush.msrb.mxu3 %v2201_v2 }
 0x321   : > { %2433 = vmatpush.msrb.mxu3 %v2193_v13 }
 0x323   : > { %2434 = vmatpush.msrb.mxu3 %v2185_v55 }
 0x325   : > { %2435 = vmatpush.msrb.mxu3 %v2177_v32 }
 0x326   : > { %3349 = vmatmul.msk.f32.vlgmr.msrb.gmra.mxu3 %vm2228_vm4, %v5184_v31  ;;  %3347 = vmatmul.msk.f32.gmra.mxu2 %vm2228_vm4, %v5212_v20  ;;  %v2661_v31 = vadd.f32 %v2660_v0, %v2659_v3 }
 0x328   : > { %3537 = vrsqrt.f32 %v2661_v31  ;;  %vm2668_vm6 = vweird.f32 %v2661_v31 }
 0x32e   : > { %3350 = vmatmul.msk.f32.gmra.mxu3 %vm2228_vm4, %v5212_v20  ;;  %v3538_v22 = vpop.eup %3537 }
 0x32f   : > { %v2663_v41 = vmul.f32 %v3538_v22, %v2661_v31  ;;  %vm2669_vm7 = vweird.f32 %v3538_v22 }
 0x330   : > { %vm2670_vm8 = vmor %vm2668_vm6, %vm2669_vm7 }
 0x331   : > { %v2664_v7 = vmul.f32 %v3538_v22, %v2663_v41 }
 0x333   : > { %v2665_v21 = vmul.f32 0.5, %v2664_v7 }
 0x335   : > { %v2666_v19 = vsub.f32 1.5, %v2665_v21 }
 0x337   : > { %v2667_v60 = vmul.f32 %v3538_v22, %v2666_v19 }
 0x339   : > { %v2671_v61 = vsel %vm2670_vm8, %v3538_v22, %v2667_v60 }
 0x33a   : > { %v2673_v34 = vmul.f32 %v3354_v49, %v2671_v61  ;;  %v2675_v37 = vmul.f32 %v3356_v17, %v2671_v61  ;;  %v2674_v63 = vmul.f32 %v3355_v56, %v2671_v61  ;;  %v2672_v53 = vmul.f32 %v5266_v35, %v2671_v61 }
 0x33c   : > { %v2677_v55 = vmul.f32 %v2675_v37, %v2675_v37  ;;  %v2691_v32 = vmul.f32 %v2673_v34, %v2673_v34  ;;  %v2676_v56 = vmul.f32 %v2674_v63, %v2674_v63  ;;  %v2681_v22 = vmul.f32 %v2674_v63, %v2673_v34 }
 0x33d   : > { %v2682_v41 = vmul.f32 %v2675_v37, %v2672_v53 }
 0x33e   : > { %v2692_v7 = vadd.f32 %v2691_v32, %v2677_v55  ;;  %v2678_v11 = vadd.f32 %v2677_v55, %v2676_v56 }
 0x373   : > { %v2299_v30 = vpop.f32.mrf.mxu1 }
 0x374   : > { %v2276_v9 = vpop.f32.mrf.mxu0  ;;  %v2458_v28 = vrot.slane %v2299_v30, 4 }
 0x375   : > { %v2446_v16 = vrot.slane %v2276_v9, 4 }
 0x378   : > { %v2345_v10 = vpop.f32.mrf.mxu3  ;;  %v2322_v48 = vpop.f32.mrf.mxu2 }
 0x379   : > { %v2456_v5 = vrot.slane %v2345_v10, 4  ;;  %v2443_v4 = vrot.slane %v2322_v48, 4  ;;  %v2459_v36 = vsel %vm2444_vm5, %v2345_v10, %v2458_v28  ;;  %v2447_v52 = vsel %vm2444_vm5, %v2322_v48, %v2446_v16 }
 0x37a   : > { %v2467_v15 = vperm.slane %v2459_v36, %v5273_v58  ;;  %v2455_v25 = vperm.slane %v2447_v52, %v5273_v58  ;;  %v2696_v10 = vmul.f32 %v2673_v34, %v2672_v53  ;;  %v2686_v16 = vmul.f32 %v2674_v63, %v2672_v53 }
 0x37b   : > { %v2457_v20 = vsel %vm2444_vm5, %v2456_v5, %v2299_v30  ;;  %v2445_v59 = vsel %vm2444_vm5, %v2443_v4, %v2276_v9  ;;  %v2695_v30 = vmul.f32 %v2675_v37, %v2674_v63  ;;  %v2685_v5 = vmul.f32 %v2675_v37, %v2673_v34 }
 0x37c   : > { %v2279_v1 = vpop.f32.mrf.mxu0  ;;  %v2463_v39 = vperm.slane %v2457_v20, %v5273_v58  ;;  %v2451_v47 = vperm.slane %v2445_v59, %v5273_v58  ;;  %v2504_v62 = vrot.slane %v2467_v15, 4  ;;  %v2506_v12 = vrot.slane %v2455_v25, 4 }
 0x37d   : > { %v2302_v46 = vpop.f32.mrf.mxu1  ;;  %v2689_v36 = vadd.f32 %v2682_v41, %v2681_v22  ;;  %v2693_v59 = vmul.f32 2.0, %v2692_v7  ;;  %v2697_v60 = vsub.f32 %v2695_v30, %v2696_v10  ;;  %v2687_v51 = vadd.f32 %v2686_v16, %v2685_v5 }
 0x37e   : > { %v2492_v50 = vrot.slane %v2463_v39, 4  ;;  %v2494_v42 = vrot.slane %v2451_v47, 4  ;;  %v2505_v6 = vsel %vm2444_vm5, %v2504_v62, %v2455_v25  ;;  %v2507_v33 = vsel %vm2444_vm5, %v2467_v15, %v2506_v12 }
 0x37f   : > { %v5293_v49 = vperm.slane %v2505_v6, %v5283_v8  ;;  %v5302_v45 = vperm.slane %v2507_v33, %v5283_v8  ;;  %v2683_v62 = vsub.f32 %v2681_v22, %v2682_v41  ;;  %v2699_v34 = vsub.f32 %v2685_v5, %v2686_v16 }
 0x380   : > { %v2348_v23 = vpop.f32.mrf.mxu3  ;;  %v2493_v14 = vsel %vm2444_vm5, %v2492_v50, %v2451_v47  ;;  %v2495_v2 = vsel %vm2444_vm5, %v2463_v39, %v2494_v42  ;;  %v2703_v47 = vadd.f32 %v2691_v32, %v2676_v56  ;;  %v5328_v50 = vmul.f32 2.0, %v2689_v36 }
 0x381   : > { %v2325_v38 = vpop.f32.mrf.mxu2  ;;  %v2562_v24 = vrot.slane %v2348_v23, 4  ;;  %v5299_v57 = vperm.slane %v2493_v14, %v5283_v8  ;;  %v5306_v3 = vperm.slane %v2495_v2, %v5283_v8  ;;  %v2550_v43 = vrot.slane %v5293_v49, 4 }
 0x382   : > { %v2556_v27 = vrot.slane %v2325_v38, 4  ;;  %v2679_v38 = vmul.f32 2.0, %v2678_v11  ;;  %v5331_v42 = vsub.f32 1.0, %v2693_v59  ;;  %v5340_v53 = vmul.f32 2.0, %v2683_v62  ;;  %v5361_v11 = vld [vmem:[%s5263_s18] sm:$0xff] }
 0x383   : > { %v2563_v13 = vsel %vm2444_vm5, %v2562_v24, %v2302_v46  ;;  %v2542_v4 = vrot.slane %v5299_v57, 4  ;;  %v2546_v20 = vrot.slane %v5306_v3, 4  ;;  %v5333_v24 = vmul.f32 2.0, %v2697_v60 }
 0x384   : > { %v2368_v44 = vpop.f32.mrf.mxu0  ;;  %v2557_v26 = vsel %vm2444_vm5, %v2556_v27, %v2279_v1  ;;  %v5309_v0 = vperm.slane %v2563_v13, %v5273_v58  ;;  %v2554_v1 = vrot.slane %v5302_v45, 4  ;;  %v5338_v33 = vsub.f32 1.0, %v2679_v38 }
 0x385   : > { %v2470_v18 = vrot.slane %v2368_v44, 4  ;;  %v5296_v54 = vperm.slane %v2557_v26, %v5273_v58  ;;  %v2704_v2 = vmul.f32 2.0, %v2703_v47  ;;  %v5352_v41 = vmul.f32 2.0, %v2687_v51 }
 0x386   : > { %v2580_v52 = vrot.slane %v5309_v0, 4 }
 0x387   : > { %v2391_v31 = vpop.f32.mrf.mxu1  ;;  %v2582_v48 = vrot.slane %v5296_v54, 4  ;;  %v5377_v36 = vsub.f32 1.0, %v2704_v2 }
 0x388   : > { %v2482_v28 = vrot.slane %v2391_v31, 4 }
 0x389   : > { %v5322_v15 = vsel %vm2444_vm5, %v5309_v0, %v2582_v48 }
 0x38c   : > { %v2371_v37 = vpop.f32.mrf.mxu0 }
 0x3a1   : > { %v2414_v29 = vpop.f32.mrf.mxu2 }
 0x3a2   : > { %v2468_v35 = vrot.slane %v2414_v29, 4  ;;  %v2471_v17 = vsel %vm2444_vm5, %v2414_v29, %v2470_v18  ;;  %v2701_v18 = vadd.f32 %v2696_v10, %v2695_v30 }
 0x3a3   : > { %v2479_v21 = vperm.slane %v2471_v17, %v5273_v58 }
 0x3a4   : > { %v2469_v9 = vsel %vm2444_vm5, %v2468_v35, %v2368_v44  ;;  %v5356_v7 = vmul.f32 2.0, %v2701_v18 }
 0x3a5   : > { %v2475_v19 = vperm.slane %v2469_v9, %v5273_v58  ;;  %v2530_v25 = vrot.slane %v2479_v21, 4  ;;  %v5354_v9 = vmul.f32 2.0, %v2699_v34 }
 0x3a7   : > { %v2518_v27 = vrot.slane %v2475_v19, 4 }
 0x3a9   : > { %v2437_v39 = vpop.f32.mrf.mxu3  ;;  %v2417_v23 = vpop.f32.mrf.mxu2 }
 0x3aa   : > { %v2480_v46 = vrot.slane %v2437_v39, 4  ;;  %v2483_v61 = vsel %vm2444_vm5, %v2437_v39, %v2482_v28  ;;  %v2568_v12 = vrot.slane %v2417_v23, 4  ;;  %v5364_v28 = vld [vmem:[%s5263_s18 + $0x8] sm:$0xff] }
 0x3ab   : > { %v2491_v40 = vperm.slane %v2483_v61, %v5273_v58 }
 0x3ac   : > { %v2481_v44 = vsel %vm2444_vm5, %v2480_v46, %v2391_v31  ;;  %v2569_v29 = vsel %vm2444_vm5, %v2568_v12, %v2371_v37 }
 0x3ad   : > { %v2487_v63 = vperm.slane %v2481_v44, %v5273_v58  ;;  %v2528_v6 = vrot.slane %v2491_v40, 4  ;;  %v2531_v26 = vsel %vm2444_vm5, %v2491_v40, %v2530_v25 }
 0x3ae   : > { %v2539_v14 = vperm.slane %v2531_v26, %v5283_v8 }
 0x3af   : > { %v2516_v13 = vrot.slane %v2487_v63, 4  ;;  %v2519_v55 = vsel %vm2444_vm5, %v2487_v63, %v2518_v27  ;;  %v2529_v32 = vsel %vm2444_vm5, %v2528_v6, %v2479_v21 }
 0x3b0   : > { %v2527_v56 = vperm.slane %v2519_v55, %v5283_v8  ;;  %v2535_v35 = vperm.slane %v2529_v32, %v5283_v8  ;;  %v2552_v17 = vrot.slane %v2539_v14, 4  ;;  %v2555_v31 = vsel %vm2444_vm5, %v2539_v14, %v2554_v1 }
 0x3b1   : > { %v2517_v22 = vsel %vm2444_vm5, %v2516_v13, %v2475_v19  ;;  %2619 = vst [vmem:[%s5349_s30 + $0x38] sm:$0xff] %v2555_v31  ;;  %v5366_v5 = vpop.f32.mrf.mxu3  ;;  %v5375_v19 = vld [vmem:[%s5263_s18 + $0x10] sm:$0xff] }
 0x3b2   : > { %v2523_v30 = vperm.slane %v2517_v22, %v5283_v8  ;;  %v2544_v10 = vrot.slane %v2527_v56, 4  ;;  %v2547_v48 = vsel %vm2444_vm5, %v2527_v56, %v2546_v20  ;;  %v2548_v21 = vrot.slane %v2535_v35, 4  ;;  %v2394_v22 = vpop.f32.mrf.mxu1 }
 0x3b3   : > { %v2551_v16 = vsel %vm2444_vm5, %v2535_v35, %v2550_v43  ;;  %v5371_v1 = vsel %vm2444_vm5, %v2552_v17, %v5302_v45  ;;  %2615 = vst [vmem:[%s5349_s30 + $0x18] sm:$0xff] %v2547_v48  ;;  %v5380_v20 = vperm.slane %v2569_v29, %v5273_v58  ;;  %v2574_v47 = vrot.slane %v5366_v5, 4 }
 0x3b4   : > { %v2540_v59 = vrot.slane %v2523_v30, 4  ;;  %v2543_v60 = vsel %vm2444_vm5, %v2523_v30, %v2542_v4  ;;  %v2545_v43 = vsel %vm2444_vm5, %v2544_v10, %v5306_v3  ;;  %v2549_v45 = vsel %vm2444_vm5, %v2548_v21, %v5293_v49  ;;  %2617 = vst [vmem:[%s5349_s30 + $0x28] sm:$0xff] %v2551_v16 }
 0x3b5   : > { %2613 = vst [vmem:[%s5349_s30 + $0x8] sm:$0xff] %v2543_v60  ;;  %v2630_v39 = vmul.f32 %v5364_v28, %v2543_v60  ;;  %v2635_v25 = vmul.f32 %v5361_v11, %v2549_v45  ;;  %v2636_v38 = vmul.f32 %v5364_v28, %v2551_v16  ;;  %v2632_v3 = vmul.f32 %v5375_v19, %v2545_v43 }
 0x3b6   : > { %v2541_v4 = vsel %vm2444_vm5, %v2540_v59, %v5299_v57  ;;  %2614 = vst [vmem:[%s5349_s30 + $0x10] sm:$0xff] %v2545_v43  ;;  %v2638_v49 = vmul.f32 %v5375_v19, %v5371_v1  ;;  %v2707_v23 = vmul.f32 %v5328_v50, %v2543_v60  ;;  %v2709_v40 = vmul.f32 %v5354_v9, %v2545_v43 }
 0x3b7   : > { %2612 = vst [vmem:[%s5349_s30] sm:$0xff] %v2541_v4  ;;  %v2629_v46 = vmul.f32 %v5361_v11, %v2541_v4  ;;  %v2637_v61 = vadd.f32 %v2636_v38, %v2635_v25  ;;  %v2706_v62 = vmul.f32 %v5338_v33, %v2541_v4  ;;  %v2711_v51 = vmul.f32 %v5340_v53, %v2541_v4 }
 0x3b8   : > { %2616 = vst [vmem:[%s5349_s30 + $0x20] sm:$0xff] %v2549_v45  ;;  %v2712_v57 = vmul.f32 %v5331_v42, %v2543_v60  ;;  %v2716_v27 = vmul.f32 %v5352_v41, %v2541_v4  ;;  %v2717_v12 = vmul.f32 %v5333_v24, %v2543_v60  ;;  %v2714_v63 = vmul.f32 %v5356_v7, %v2545_v43 }
 0x3b9   : > { %2618 = vst [vmem:[%s5349_s30 + $0x30] sm:$0xff] %v5371_v1  ;;  %v2631_v44 = vadd.f32 %v2630_v39, %v2629_v46  ;;  %v2639_v34 = vadd.f32 %v2638_v49, %v2637_v61  ;;  %v2708_v37 = vadd.f32 %v2707_v23, %v2706_v62  ;;  %v2721_v18 = vmul.f32 %v5338_v33, %v2549_v45 }
 0x3ba   : > { %v2713_v6 = vadd.f32 %v2712_v57, %v2711_v51  ;;  %v2718_v26 = vadd.f32 %v2717_v12, %v2716_v27  ;;  %v2722_v14 = vmul.f32 %v5328_v50, %v2551_v16  ;;  %v2719_v32 = vmul.f32 %v5377_v36, %v2545_v43 }
 0x3bb   : > { %v2633_v2 = vadd.f32 %v2632_v3, %v2631_v44  ;;  %v2640_v13 = vadd.f32 %v2639_v34, %v2555_v31  ;;  %v5416_v55 = vadd.f32 %v2709_v40, %v2708_v37  ;;  %v2724_v35 = vmul.f32 %v5354_v9, %v5371_v1 }
 0x3bc   : > { %v5419_v29 = vadd.f32 %v2714_v63, %v2713_v6  ;;  %v2723_v56 = vadd.f32 %v2722_v14, %v2721_v18  ;;  %v2726_v17 = vmul.f32 %v5340_v53, %v2549_v45  ;;  %v5424_v10 = vadd.f32 %v2719_v32, %v2718_v26 }
 0x3bd   : > { %v2634_v30 = vadd.f32 %v2633_v2, %v2547_v48  ;;  %v2727_v31 = vmul.f32 %v5331_v42, %v2551_v16  ;;  %v2731_v21 = vmul.f32 %v5352_v41, %v2549_v45  ;;  %3358 = vst [vmem:[%s5349_s30 + $0x68] sm:$0xff] %v2640_v13  ;;  %v2581_v5 = vsel %vm2444_vm5, %v2580_v52, %v5296_v54 }
 0x3be   : > { %v5433_v59 = vadd.f32 %v2724_v35, %v2723_v56  ;;  %v2732_v60 = vmul.f32 %v5333_v24, %v2551_v16  ;;  %3360 = vst [vmem:[%s5349_s30 + $0x78] sm:$0xff] %v5416_v55  ;;  %v2594_v48 = vrot.slane %v5380_v20, 4  ;;  %v2729_v45 = vmul.f32 %v5356_v7, %v5371_v1 }
 0x3bf   : > { %v2728_v43 = vadd.f32 %v2727_v31, %v2726_v17  ;;  %3357 = vst [vmem:[%s5349_s30 + $0x60] sm:$0xff] %v2634_v30  ;;  %v2575_v0 = vsel %vm2444_vm5, %v2574_v47, %v2394_v22  ;;  %v2591_v54 = vperm.slane %v5322_v15, %v5283_v8  ;;  %v2734_v16 = vmul.f32 %v5377_v36, %v5371_v1 }
 0x3c0   : > { %v2733_v52 = vadd.f32 %v2732_v60, %v2731_v21  ;;  %3361 = vst [vmem:[%s5349_s30 + $0x80] sm:$0xff] %v5419_v29  ;;  %v2579_v39 = vperm.slane %v2575_v0, %v5273_v58  ;;  %v2587_v25 = vperm.slane %v2581_v5, %v5283_v8  ;;  %v2751_v40 = vadd.f32 1.0, %v5416_v55 }
 0x3c1   : > { %v2730_v38 = vadd.f32 %v2729_v45, %v2728_v43  ;;  %3362 = vst [vmem:[%s5349_s30 + $0x88] sm:$0xff] %v5424_v10  ;;  %v2610_v1 = vrot.slane %v2591_v54, 4  ;;  %v2782_v6 = vsub.f32 1.0, %v5416_v55 }
 0x3c2   : > { %v5453_v4 = vadd.f32 %v2734_v16, %v2733_v52  ;;  %3363 = vst [vmem:[%s5349_s30 + $0x90] sm:$0xff] %v5433_v59  ;;  %v2592_v47 = vrot.slane %v2579_v39, 4  ;;  %v2595_v15 = vsel %vm2444_vm5, %v2579_v39, %v2594_v48  ;;  %v2606_v49 = vrot.slane %v2587_v25, 4 }
 0x3c3   : > { %3364 = vst [vmem:[%s5349_s30 + $0x98] sm:$0xff] %v2730_v38  ;;  %v2603_v3 = vperm.slane %v2595_v15, %v5283_v8  ;;  %v2798_v55 = vsub.f32 %v2782_v6, %v2730_v38 }
 0x3c4   : > { %3365 = vst [vmem:[%s5349_s30 + $0xa0] sm:$0xff] %v5453_v4  ;;  %v2593_v58 = vsel %vm2444_vm5, %v2592_v47, %v5380_v20 }
 0x3c5   : > { %v2599_v23 = vperm.slane %v2593_v58, %v5283_v8  ;;  %v2608_v46 = vrot.slane %v2603_v3, 4  ;;  %v2611_v61 = vsel %vm2444_vm5, %v2603_v3, %v2610_v1 }
 0x3c6   : > { %2623 = vst [vmem:[%s5349_s30 + $0x58] sm:$0xff] %v2611_v61 }
 0x3c7   : > { %v2604_v62 = vrot.slane %v2599_v23, 4  ;;  %v2607_v51 = vsel %vm2444_vm5, %v2599_v23, %v2606_v49  ;;  %v2609_v57 = vsel %vm2444_vm5, %v2608_v46, %v2591_v54 }
 0x3c8   : > { %2621 = vst [vmem:[%s5349_s30 + $0x48] sm:$0xff] %v2607_v51  ;;  %v2642_v27 = vmul.f32 %v5364_v28, %v2607_v51  ;;  %v2737_v12 = vmul.f32 %v5328_v50, %v2607_v51  ;;  %v2742_v8 = vmul.f32 %v5331_v42, %v2607_v51  ;;  %v2644_v26 = vmul.f32 %v5375_v19, %v2609_v57 }
 0x3c9   : > { %v2605_v20 = vsel %vm2444_vm5, %v2604_v62, %v2587_v25  ;;  %2622 = vst [vmem:[%s5349_s30 + $0x50] sm:$0xff] %v2609_v57  ;;  %v2739_v18 = vmul.f32 %v5354_v9, %v2609_v57  ;;  %v2747_v28 = vmul.f32 %v5333_v24, %v2607_v51  ;;  %v2767_v9 = vsub.f32 %v2751_v40, %v2730_v38 }
 0x3ca   : > { %2620 = vst [vmem:[%s5349_s30 + $0x40] sm:$0xff] %v2605_v20  ;;  %v2641_v44 = vmul.f32 %v5361_v11, %v2605_v20  ;;  %v2736_v34 = vmul.f32 %v5338_v33, %v2605_v20  ;;  %v2741_v37 = vmul.f32 %v5340_v53, %v2605_v20  ;;  %v2746_v63 = vmul.f32 %v5352_v41, %v2605_v20 }
 0x3cb   : > { %v2744_v11 = vmul.f32 %v5356_v7, %v2609_v57  ;;  %v2749_v33 = vmul.f32 %v5377_v36, %v2609_v57  ;;  %v2752_v53 = vadd.f32 %v2751_v40, %v2730_v38  ;;  %v2783_v24 = vadd.f32 %v2782_v6, %v2730_v38 }
 0x3cc   : > { %v2643_v50 = vadd.f32 %v2642_v27, %v2641_v44  ;;  %v2738_v42 = vadd.f32 %v2737_v12, %v2736_v34  ;;  %v2743_v14 = vadd.f32 %v2742_v8, %v2741_v37  ;;  %v2748_v2 = vadd.f32 %v2747_v28, %v2746_v63 }
 0x3ce   : > { %v2645_v41 = vadd.f32 %v2644_v26, %v2643_v50  ;;  %v5487_v13 = vadd.f32 %v2739_v18, %v2738_v42  ;;  %v5489_v19 = vadd.f32 %v2744_v11, %v2743_v14  ;;  %v2750_v32 = vadd.f32 %v2749_v33, %v2748_v2 }
 0x3d0   : > { %v2646_v56 = vadd.f32 %v2645_v41, %v2611_v61  ;;  %3366 = vst [vmem:[%s5349_s30 + $0xa8] sm:$0xff] %v5487_v13  ;;  %v2753_v7 = vadd.f32 %v2752_v53, %v2750_v32  ;;  %v2768_v35 = vsub.f32 %v2767_v9, %v2750_v32  ;;  %v2784_v17 = vsub.f32 %v2783_v24, %v2750_v32 }
 0x3d1   : > { %v2799_v22 = vadd.f32 %v2798_v55, %v2750_v32  ;;  %3367 = vst [vmem:[%s5349_s30 + $0xb0] sm:$0xff] %v5489_v19 }
 0x3d2   : > { %3359 = vst [vmem:[%s5349_s30 + $0x70] sm:$0xff] %v2646_v56  ;;  %v2754_v36 = vmax.f32 %v2753_v7, 0.0  ;;  %v2769_v30 = vmax.f32 %v2768_v35, 0.0  ;;  %v2785_v31 = vmax.f32 %v2784_v17, 0.0 }
 0x3d3   : > { %3368 = vst [vmem:[%s5349_s30 + $0xb8] sm:$0xff] %v2750_v32  ;;  %v2800_v21 = vmax.f32 %v2799_v22, 0.0 }
 0x3d4   : > { %3539 = vrsqrt.f32 %v2754_v36  ;;  %vm2762_vm9 = vcmp.eq.f32.partialorder %v2754_v36, inf  ;;  %vm2764_vm10 = vcmp.eq.f32.partialorder %v2754_v36, 0.0  ;;  %v2765_v61 = vand.u32 2147483648, %v2754_v36 }
 0x3d5   : > { %3541 = vrsqrt.f32 %v2769_v30  ;;  %vm2777_vm11 = vcmp.eq.f32.partialorder %v2769_v30, inf  ;;  %vm2779_vm12 = vcmp.eq.f32.partialorder %v2769_v30, 0.0  ;;  %v2780_v27 = vand.u32 2147483648, %v2769_v30 }
 0x3d6   : > { %3543 = vrsqrt.f32 %v2785_v31  ;;  %vm2793_vm13 = vcmp.eq.f32.partialorder %v2785_v31, inf  ;;  %vm2795_vm14 = vcmp.eq.f32.partialorder %v2785_v31, 0.0  ;;  %v2796_v34 = vand.u32 2147483648, %v2785_v31 }
 0x3d7   : > { %3545 = vrsqrt.f32 %v2800_v21  ;;  %vm2808_vm15 = vcmp.eq.f32.partialorder %v2800_v21, inf  ;;  %v2811_v28 = vand.u32 2147483648, %v2800_v21  ;;  %vm2810_vm0 = vcmp.eq.f32.partialorder %v2800_v21, 0.0 }
 0x3da   : > { %v3540_v5 = vpop.eup %3539 }
 0x3db   : > { %v3542_v60 = vpop.eup %3541  ;;  %v2756_v48 = vmul.f32 %v3540_v5, %v2754_v36 }
 0x3dc   : > { %v3544_v43 = vpop.eup %3543  ;;  %v2771_v45 = vmul.f32 %v3542_v60, %v2769_v30 }
 0x3dd   : > { %v3546_v0 = vpop.eup %3545  ;;  %v2757_v54 = vmul.f32 %v3540_v5, %v2756_v48  ;;  %v2787_v52 = vmul.f32 %v3544_v43, %v2785_v31 }
 0x3de   : > { %v2772_v16 = vmul.f32 %v3542_v60, %v2771_v45  ;;  %v2802_v39 = vmul.f32 %v3546_v0, %v2800_v21 }
 0x3df   : > { %v2758_v25 = vmul.f32 0.5, %v2757_v54  ;;  %v2788_v38 = vmul.f32 %v3544_v43, %v2787_v52  ;;  %v2840_v54 = vsub.f32 %v5424_v10, %v5487_v13 }
 0x3e0   : > { %v2773_v47 = vmul.f32 0.5, %v2772_v16  ;;  %v2803_v15 = vmul.f32 %v3546_v0, %v2802_v39  ;;  %v2848_v39 = vadd.f32 %v5487_v13, %v5424_v10 }
 0x3e1   : > { %v2759_v1 = vsub.f32 1.5, %v2758_v25  ;;  %v2789_v58 = vmul.f32 0.5, %v2788_v38 }
 0x3e2   : > { %v2774_v3 = vsub.f32 1.5, %v2773_v47  ;;  %v2804_v49 = vmul.f32 0.5, %v2803_v15 }
 0x3e3   : > { %v2760_v23 = vmul.f32 %v3540_v5, %v2759_v1  ;;  %v2790_v46 = vsub.f32 1.5, %v2789_v58 }
 0x3e4   : > { %v2775_v62 = vmul.f32 %v3542_v60, %v2774_v3  ;;  %v2805_v51 = vsub.f32 1.5, %v2804_v49 }
 0x3e5   : > { %v2761_v40 = vmul.f32 %v2760_v23, %v2754_v36  ;;  %v2791_v57 = vmul.f32 %v3544_v43, %v2790_v46 }
 0x3e6   : > { %v2776_v20 = vmul.f32 %v2775_v62, %v2769_v30  ;;  %v2806_v12 = vmul.f32 %v3546_v0, %v2805_v51  ;;  %v2838_v0 = vsub.f32 %v5489_v19, %v5453_v4 }
 0x3e7   : > { %v2763_v8 = vsel %vm2762_vm9, %v2754_v36, %v2761_v40  ;;  %v2792_v44 = vmul.f32 %v2791_v57, %v2785_v31  ;;  %v2842_v36 = vsub.f32 %v5433_v59, %v5419_v29 }
 0x3e8   : > { %v5498_v37 = vsel %vm2764_vm10, %v2765_v61, %v2763_v8  ;;  %v2778_v63 = vsel %vm2777_vm11, %v2769_v30, %v2776_v20  ;;  %v2807_v6 = vmul.f32 %v2806_v12, %v2800_v21 }
 0x3e9   : > { %v5500_v26 = vsel %vm2779_vm12, %v2780_v27, %v2778_v63  ;;  %v2794_v18 = vsel %vm2793_vm13, %v2785_v31, %v2792_v44  ;;  %v2813_v50 = vmax.f32 %v5498_v37, 0.1  ;;  %v2837_v16 = vmul.f32 0.5, %v5498_v37 }
 0x3ea   : > { %v5503_v42 = vsel %vm2795_vm14, %v2796_v34, %v2794_v18  ;;  %v2809_v14 = vsel %vm2808_vm15, %v2800_v21, %v2807_v6  ;;  %v2819_v11 = vmax.f32 %v5500_v26, 0.1  ;;  %v2859_v55 = vmax.f32 %v5498_v37, %v5500_v26 }
 0x3eb   : > { %v2812_v2 = vsel %vm2810_vm0, %v2811_v28, %v2809_v14  ;;  %3547 = vrcp.f32 %v2813_v50  ;;  %v2825_v33 = vmax.f32 %v5503_v42, 0.1  ;;  %v2846_v21 = vadd.f32 %v5433_v59, %v5419_v29  ;;  %v3004_v14 = vld [vmem:[%s5349_s30 + $0x10] sm:$0xff] (%p3662_p5) }
 0x3ec   : > { %3549 = vrcp.f32 %v2819_v11  ;;  %v2831_v53 = vmax.f32 %v2812_v2, 0.1  ;;  %v2860_v32 = vmax.f32 %v5503_v42, %v2812_v2  ;;  %v2853_v29 = vadd.f32 %v5489_v19, %v5453_v4  ;;  %3005 = vst [vmem:[%s5554_s29 + $0x20] sm:$0xff] (%p3662_p5), %v3004_v14 }
 0x3ed   : > { %3551 = vrcp.f32 %v2825_v33  ;;  %v2845_v38 = vmul.f32 0.5, %v5500_v26  ;;  %v2852_v47 = vmul.f32 0.5, %v5503_v42  ;;  %v2858_v58 = vmul.f32 0.5, %v2812_v2  ;;  %v3008_v2 = vld [vmem:[%s5349_s30 + $0x20] sm:$0xff] (%p3662_p5) }
 0x3ee   : > { %3553 = vrcp.f32 %v2831_v53  ;;  %v2861_v48 = vmax.f32 %v2859_v55, %v2860_v32  ;;  %3009 = vst [vmem:[%s5554_s29 + $0x40] sm:$0xff] (%p3662_p5), %v3008_v2  ;;  %v3020_v55 = vld [vmem:[%s5349_s30 + $0x50] sm:$0xff] (%p3662_p5)  ;;  %v3022_v32 = vld [vmem:[%s5349_s30 + $0x58] sm:$0xff] (%p3662_p5) }
 0x3ef   : > { %3021 = vst [vmem:[%s5554_s29 + $0xa0] sm:$0xff] (%p3662_p5), %v3020_v55 }
 0x3f0   : > { %vm2862_vm1 = vcmp.ge.f32.partialorder %v5498_v37, %v2861_v48  ;;  %vm2863_vm2 = vcmp.ge.f32.partialorder %v5500_v26, %v2861_v48  ;;  %vm2864_vm3 = vcmp.ge.f32.partialorder %v5503_v42, %v2861_v48  ;;  %v3000_v37 = vld [vmem:[%s5349_s30] sm:$0xff] (%p3662_p5)  ;;  %v3002_v26 = vld [vmem:[%s5349_s30 + $0x8] sm:$0xff] (%p3662_p5)  ;;  %3023 = vst [vmem:[%s5554_s29 + $0xb0] sm:$0xff] (%p3662_p5), %v3022_v32  ;;  %v3046_v48 = vld [vmem:[%s5349_s30 + $0xb8] sm:$0xff] (%p3662_p5) }
 0x3f1   : > { %v3548_v41 = vpop.eup %3547  ;;  %3001 = vst [vmem:[%s5554_s29] sm:$0xff] (%p3662_p5), %v3000_v37 }
 0x3f2   : > { %v3550_v9 = vpop.eup %3549  ;;  %v2815_v24 = vmul.f32 %v3548_v41, %v2813_v50  ;;  %3003 = vst [vmem:[%s5554_s29 + $0x10] sm:$0xff] (%p3662_p5), %v3002_v26 }
 0x3f3   : > { %v3552_v56 = vpop.eup %3551  ;;  %v2821_v7 = vmul.f32 %v3550_v9, %v2819_v11  ;;  %v3006_v11 = vld [vmem:[%s5349_s30 + $0x18] sm:$0xff] (%p3662_p5)  ;;  %3047 = vst [vmem:[%s5554_s29 + $0x170] sm:$0xff] (%p3662_p5), %v3046_v48 }
 0x3f4   : > { %v3554_v35 = vpop.eup %3553  ;;  %v2816_v17 = vsub.f32 2.0, %v2815_v24  ;;  %v2827_v22 = vmul.f32 %v3552_v56, %v2825_v33  ;;  %v3010_v33 = vld [vmem:[%s5349_s30 + $0x28] sm:$0xff] (%p3662_p5)  ;;  %3007 = vst [vmem:[%s5554_s29 + $0x30] sm:$0xff] (%p3662_p5), %v3006_v11 }
 0x3f5   : > { %v2822_v30 = vsub.f32 2.0, %v2821_v7  ;;  %v2833_v31 = vmul.f32 %v3554_v35, %v2831_v53  ;;  %v3012_v53 = vld [vmem:[%s5349_s30 + $0x30] sm:$0xff] (%p3662_p5)  ;;  %3011 = vst [vmem:[%s5554_s29 + $0x50] sm:$0xff] (%p3662_p5), %v3010_v33  ;;  %v3018_v24 = vld [vmem:[%s5349_s30 + $0x48] sm:$0xff] (%p3662_p5) }
 0x3f6   : > { %v2817_v5 = vmul.f32 %v3548_v41, %v2816_v17  ;;  %v2828_v60 = vsub.f32 2.0, %v2827_v22  ;;  %v3014_v41 = vld [vmem:[%s5349_s30 + $0x38] sm:$0xff] (%p3662_p5)  ;;  %3013 = vst [vmem:[%s5554_s29 + $0x60] sm:$0xff] (%p3662_p5), %v3012_v53  ;;  %v3026_v7 = vld [vmem:[%s5349_s30 + $0x68] sm:$0xff] (%p3662_p5)  ;;  %v3032_v22 = vld [vmem:[%s5349_s30 + $0x80] sm:$0xff] (%p3662_p5) }
 0x3f7   : > { %v2823_v43 = vmul.f32 %v3550_v9, %v2822_v30  ;;  %v2834_v45 = vsub.f32 2.0, %v2833_v31  ;;  %v3016_v9 = vld [vmem:[%s5349_s30 + $0x40] sm:$0xff] (%p3662_p5)  ;;  %3015 = vst [vmem:[%s5554_s29 + $0x70] sm:$0xff] (%p3662_p5), %v3014_v41  ;;  %v3030_v17 = vld [vmem:[%s5349_s30 + $0x78] sm:$0xff] (%p3662_p5)  ;;  %v3036_v30 = vld [vmem:[%s5349_s30 + $0x90] sm:$0xff] (%p3662_p5) }
 0x3f8   : > { %v2829_v52 = vmul.f32 %v3552_v56, %v2828_v60  ;;  %v2818_v15 = vmul.f32 0.5, %v2817_v5  ;;  %3017 = vst [vmem:[%s5554_s29 + $0x80] sm:$0xff] (%p3662_p5), %v3016_v9  ;;  %v3024_v56 = vld [vmem:[%s5349_s30 + $0x60] sm:$0xff] (%p3662_p5)  ;;  %v3038_v31 = vld [vmem:[%s5349_s30 + $0x98] sm:$0xff] (%p3662_p5)  ;;  %v3042_v5 = vld [vmem:[%s5349_s30 + $0xa8] sm:$0xff] (%p3662_p5) }
 0x3f9   : > { %v2824_v59 = vmul.f32 0.5, %v2823_v43  ;;  %v2835_v25 = vmul.f32 %v3554_v35, %v2834_v45  ;;  %3019 = vst [vmem:[%s5554_s29 + $0x90] sm:$0xff] (%p3662_p5), %v3018_v24  ;;  %v3028_v35 = vld [vmem:[%s5349_s30 + $0x70] sm:$0xff] (%p3662_p5) }
 0x3fa   : > { %v2830_v1 = vmul.f32 0.5, %v2829_v52  ;;  %v2839_v51 = vmul.f32 %v2838_v0, %v2818_v15  ;;  %v2841_v40 = vmul.f32 %v2840_v54, %v2818_v15  ;;  %v2843_v57 = vmul.f32 %v2842_v36, %v2818_v15  ;;  %3025 = vst [vmem:[%s5554_s29 + $0xc0] sm:$0xff] (%p3662_p5), %v3024_v56  ;;  %v3044_v60 = vld [vmem:[%s5349_s30 + $0xb0] sm:$0xff] (%p3662_p5) }
 0x3fb   : > { %v2836_v3 = vmul.f32 0.5, %v2835_v25  ;;  %v2844_v49 = vmul.f32 %v2838_v0, %v2824_v59  ;;  %v2849_v23 = vmul.f32 %v2848_v39, %v2824_v59  ;;  %v2847_v10 = vmul.f32 %v2846_v21, %v2824_v59  ;;  %3027 = vst [vmem:[%s5554_s29 + $0xd0] sm:$0xff] (%p3662_p5), %v3026_v7 }
 0x3fc   : > { %v2850_v13 = vmul.f32 %v2840_v54, %v2830_v1  ;;  %v2851_v46 = vmul.f32 %v2846_v21, %v2830_v1  ;;  %v2854_v4 = vmul.f32 %v2853_v29, %v2830_v1  ;;  %3029 = vst [vmem:[%s5554_s29 + $0xe0] sm:$0xff] (%p3662_p5), %v3028_v35  ;;  %v3040_v21 = vld [vmem:[%s5349_s30 + $0xa0] sm:$0xff] (%p3662_p5) }
 0x3fd   : > { %v2855_v19 = vmul.f32 %v2842_v36, %v2836_v3  ;;  %v2856_v61 = vmul.f32 %v2848_v39, %v2836_v3  ;;  %v2857_v62 = vmul.f32 %v2853_v29, %v2836_v3  ;;  %v3034_v36 = vld [vmem:[%s5349_s30 + $0x88] sm:$0xff] (%p3662_p5)  ;;  %3031 = vst [vmem:[%s5554_s29 + $0xf0] sm:$0xff] (%p3662_p5), %v3030_v17 }
 0x3fe   : > { %v2874_v20 = vsel %vm2864_vm3, %v2854_v4, %v2858_v58  ;;  %3033 = vst [vmem:[%s5554_s29 + $0x100] sm:$0xff] (%p3662_p5), %v3032_v22 }
 0x3ff   : > { %v2865_v27 = vsel %vm2864_vm3, %v2850_v13, %v2855_v19  ;;  %v2868_v12 = vsel %vm2864_vm3, %v2851_v46, %v2856_v61  ;;  %v2871_v8 = vsel %vm2864_vm3, %v2852_v47, %v2857_v62  ;;  %v2875_v44 = vsel %vm2863_vm2, %v2849_v23, %v2874_v20  ;;  %3035 = vst [vmem:[%s5554_s29 + $0x110] sm:$0xff] (%p3662_p5), %v3034_v36 }
 0x400   : > { %v2866_v34 = vsel %vm2863_vm2, %v2844_v49, %v2865_v27  ;;  %v2869_v63 = vsel %vm2863_vm2, %v2845_v38, %v2868_v12  ;;  %v2872_v6 = vsel %vm2863_vm2, %v2847_v10, %v2871_v8  ;;  %v2876_v18 = vsel %vm2862_vm1, %v2843_v57, %v2875_v44  ;;  %2915 = sbr.rel (!%p3662_p5) target bundleno = 1037 (0x40d), region = 98  ;;  %3037 = vst [vmem:[%s5554_s29 + $0x120] sm:$0xff] (%p3662_p5), %v3036_v30 }
 0x401   : > { %v2867_v28 = vsel %vm2862_vm1, %v2837_v16, %v2866_v34  ;;  %v2870_v50 = vsel %vm2862_vm1, %v2839_v51, %v2869_v63  ;;  %v2873_v42 = vsel %vm2862_vm1, %v2841_v40, %v2872_v6  ;;  %3372 = vst [vmem:[%s5349_s30 + $0xd8] sm:$0xff] %v2876_v18 }
 0x402   : > { %3369 = vst [vmem:[%s5349_s30 + $0xc0] sm:$0xff] %v2867_v28 }
 0x403   : > { %3370 = vst [vmem:[%s5349_s30 + $0xc8] sm:$0xff] %v2870_v50 }
 0x404   : > { %3371 = vst [vmem:[%s5349_s30 + $0xd0] sm:$0xff] %v2873_v42 }
 0x405   : > { %3039 = vst [vmem:[%s5554_s29 + $0x130] sm:$0xff] %v3038_v31 }
 0x406   : > { %3041 = vst [vmem:[%s5554_s29 + $0x140] sm:$0xff] %v3040_v21 }
 0x407   : > { %3043 = vst [vmem:[%s5554_s29 + $0x150] sm:$0xff] %v3042_v5 }
 0x408   : > { %3045 = vst [vmem:[%s5554_s29 + $0x160] sm:$0xff] %v3044_v60  ;;  %v3054_v54 = vld [vmem:[%s5349_s30 + $0xd8] sm:$0xff] }
 0x409   : > { %v3048_v43 = vld [vmem:[%s5349_s30 + $0xc0] sm:$0xff]  ;;  %3055 = vst [vmem:[%s5554_s29 + $0x1b0] sm:$0xff] %v3054_v54 }
 0x40a   : > { %v3050_v45 = vld [vmem:[%s5349_s30 + $0xc8] sm:$0xff]  ;;  %3049 = vst [vmem:[%s5554_s29 + $0x180] sm:$0xff] %v3048_v43 }
 0x40b   : > { %v3052_v0 = vld [vmem:[%s5349_s30 + $0xd0] sm:$0xff]  ;;  %3051 = vst [vmem:[%s5554_s29 + $0x190] sm:$0xff] %v3050_v45 }
 0x40c   : > { %3053 = vst [vmem:[%s5554_s29 + $0x1a0] sm:$0xff] %v3052_v0 }
 0x40d PF: > { %p16_p11 = scmp.ge.s32.totalorder %s3649_s13, 4   ;;  %s5669_s30 = smov %s3573_s10 }
 0x40e   : > { %s5670_s10 = smov %s3660_s16  ;;  %s5671_s11 = smov %s3649_s13 }
 0x40f   :  { %18 = sbr.rel (!%p16_p11) target bundleno = 2 (0x2), region = 192 }

</bundles_post_ra>
